<compile_context>
chip_gen: v7x
topology: tpu7x:2x2x1
jax: 0.10.0
libtpu: 0.0.40
codegen_flags: <defaults>
</compile_context>

<pallas_src>
import jax
import jax.numpy as jnp
from jax import lax
from jax.experimental import pallas as pl
from jax.experimental.pallas import tpu as pltpu

EPS = 1e-5  # BatchNorm eps (PyTorch default)


# ----------------------------------------------------------------------------
# Geometry of the padded-flat activation layout (per image)
# ----------------------------------------------------------------------------
def _geometry(h, w):
    ho, wo = h // 2, w // 2                 # spatial size after downsampling
    ph, pw = ho + 2, wo + 2                 # zero-padded grid (for 3x3, pad=1)
    p = ph * pw                             # padded-flat positions per image
    guard = pw + 2                          # >= |max tap offset| = pw + 1
    lanes = -(-(p + 2 * guard) // 128) * 128
    return dict(ho=ho, wo=wo, ph=ph, pw=pw, p=p, base=guard, lanes=lanes)


# ----------------------------------------------------------------------------
# Fused kernel: downsample bottleneck + 4 regular bottlenecks for ONE image
# ----------------------------------------------------------------------------
def _make_fused_kernel(geom):
    p, pw, base = geom['p'], geom['pw'], geom['base']

    # stride-2 3x3 conv taps: input row = 2*ho + dy - 1  ->  which 2x2 phase
    # grid (parity) and which shift inside that grid each tap reads.
    PHASE = (1, 0, 1)    # dy (or dx) = 0,1,2
    SHIFT = (-1, 0, 0)

    def kernel(phase_ref, mask_ref,
               wr0_ref, br0_ref, wr1_ref, br1_ref, wr2_ref, wl_ref, bl_ref,
               w0_ref, b0_ref, w1_ref, b1_ref, w2_ref, alpha_ref,
               o_ref, hpad_ref):
        hid_d = wr0_ref.shape[1]
        hid_r = w0_ref.shape[1]
        n_reg = w0_ref.shape[0]
        mask = mask_ref[...]                               # (1, p) interior mask

        # guards / borders of the padded scratch and output must read as zero
        hpad_ref[...] = jnp.zeros_like(hpad_ref)
        o_ref[...] = jnp.zeros_like(o_ref)

        def dot(a, b):
            return jnp.dot(a, b, preferred_element_type=jnp.float32)

        def conv3x3(load_tap, load_w, bias):
            acc = None
            for t in range(9):
                d = dot(load_w(t), load_tap(t))
                acc = d if acc is None else acc + d
            return jnp.maximum(acc + bias, 0.0)            # BN folded; ReLU

        def s1_tap(rows):
            # stride-1 3x3 tap: shifted slice of the zero-padded VMEM scratch
            def load(t):
                dy, dx = divmod(t, 3)
                off = (dy - 1) * pw + (dx - 1)
                return hpad_ref[0:rows, base + off:base + off + p]
            return load

        # ---------------- downsampling bottleneck ----------------
        # right conv0: 3x3 stride-2 pad-1 on x, via the 4 stride-2 phase grids
        def r0_tap(t):
            dy, dx = divmod(t, 3)
            pidx = PHASE[dy] * 2 + PHASE[dx]
            off = SHIFT[dy] * pw + SHIFT[dx]
            return phase_ref[0, pidx, :, base + off:base + off + p]

        h = conv3x3(r0_tap, lambda t: wr0_ref[t], br0_ref[...])      # (hid_d, p)
        hpad_ref[0:hid_d, base:base + p] = h * mask

        # right conv1: 3x3 stride-1 pad-1
        h = conv3x3(s1_tap(hid_d), lambda t: wr1_ref[t], br1_ref[...])

        # right conv2: 1x1 projection (no BN / act; Dropout = identity)
        right = dot(wr2_ref[...], h)                                 # (cout, p)

        # left branch: 2x2/stride-2 max-pool == elementwise max of the phases
        pooled = phase_ref[0, 0, :, base:base + p]
        for pidx in range(1, 4):
            pooled = jnp.maximum(pooled, phase_ref[0, pidx, :, base:base + p])
        left = jnp.maximum(dot(wl_ref[...], pooled) + bl_ref[...], 0.0)

        y = left + right
        a = alpha_ref[0:1, :]
        y = jnp.where(y >= 0.0, y, a * y)                            # PReLU

        # ---------------- regular bottlenecks ----------------
        for k in range(n_reg):
            h = jnp.maximum(dot(w0_ref[k], y) + b0_ref[k], 0.0)      # (hid_r, p)
            hpad_ref[0:hid_r, base:base + p] = h * mask
            h = conv3x3(s1_tap(hid_r), lambda t, k=k: w1_ref[k, t], b1_ref[k])
            y = y + dot(w2_ref[k], h)                                # residual
            a = alpha_ref[k + 1:k + 2, :]
            y = jnp.where(y >= 0.0, y, a * y)                        # PReLU

        o_ref[0, :, base:base + p] = y

    return kernel


# ----------------------------------------------------------------------------
# Forward wrapper (one pallas_call; only tiny layout prep stays in XLA)
# ----------------------------------------------------------------------------
@jax.jit
def modified_bottleneck1_forward(packed, x_nchw):
    x = x_nchw.astype(jnp.float32)
    n, cin, hh, ww = x.shape
    assert hh % 2 == 0 and ww % 2 == 0
    g = _geometry(hh, ww)
    ho, wo, ph, pw = g['ho'], g['wo'], g['ph'], g['pw']
    p, base, lanes = g['p'], g['base'], g['lanes']
    cout = packed['wl'].shape[0]
    hid_rows = max(packed['wr0'].shape[1], packed['w0'].shape[1])
    n_reg = packed['w0'].shape[0]

    # -- layout prep: 4 stride-2 phase grids of x, zero-padded and flattened
    #    into the 128-lane padded-flat buffers the kernel consumes.
    phases = []
    for py in range(2):
        for px in range(2):
            pg = x[:, :, py::2, px::2]                                # (n,cin,ho,wo)
            pg = jnp.pad(pg, ((0, 0), (0, 0), (1, 1), (1, 1)))        # (n,cin,ph,pw)
            pg = pg.reshape(n, cin, p)
            pg = jnp.pad(pg, ((0, 0), (0, 0), (base, lanes - base - p)))
            phases.append(pg)
    phases = jnp.stack(phases, axis=1)                                # (n,4,cin,lanes)

    # interior mask over the padded-flat positions
    idx = jnp.arange(p)
    r, c = idx // pw, idx % pw
    mask = (((r >= 1) & (r <= ho)) & ((c >= 1) & (c <= wo)))
    mask = mask.astype(jnp.float32)[None, :]                          # (1, p)

    kernel = _make_fused_kernel(g)

    def full(a):
        return pl.BlockSpec(a.shape, lambda i, _nd=a.ndim: (0,) * _nd)

    w = packed
    out = pl.pallas_call(
        kernel,
        out_shape=jax.ShapeDtypeStruct((n, cout, lanes), jnp.float32),
        grid=(n,),
        in_specs=[
            pl.BlockSpec((1, 4, cin, lanes), lambda i: (i, 0, 0, 0)),  # phases
            full(mask),
            full(w['wr0']), full(w['br0']), full(w['wr1']), full(w['br1']),
            full(w['wr2']), full(w['wl']), full(w['bl']),
            full(w['w0']), full(w['b0']), full(w['w1']), full(w['b1']),
            full(w['w2']), full(w['alphas']),
        ],
        out_specs=pl.BlockSpec((1, cout, lanes), lambda i: (i, 0, 0)),
        scratch_shapes=[pltpu.VMEM((hid_rows, lanes), jnp.float32)],
        compiler_params=pltpu.CompilerParams(
            dimension_semantics=("parallel",)),
    )(phases, mask, w['wr0'], w['br0'], w['wr1'], w['br1'], w['wr2'],
      w['wl'], w['bl'], w['w0'], w['b0'], w['w1'], w['b1'], w['w2'],
      w['alphas'])

    y = out[:, :, base:base + p].reshape(n, cout, ph, pw)[:, :, 1:ho + 1, 1:wo + 1]
    return y, None  # `indices` is always None in the modified module


# ----------------------------------------------------------------------------
# Parameters (PyTorch-style OIHW conv weights + BN running stats) and packing
# ----------------------------------------------------------------------------
def _init_convbn(key, cout, cin, k):
    ks = jax.random.split(key, 5)
    return dict(
        w=0.1 * jax.random.normal(ks[0], (cout, cin, k, k), jnp.float32),
        gamma=1.0 + 0.1 * jax.random.normal(ks[1], (cout,), jnp.float32),
        beta=0.1 * jax.random.normal(ks[2], (cout,), jnp.float32),
        mean=0.1 * jax.random.normal(ks[3], (cout,), jnp.float32),
        var=0.9 + 0.2 * jax.random.uniform(ks[4], (cout,), jnp.float32),
    )


def init_bottleneck1_params(key, in_channels, out_channels, shrink_ratio=0.25):
    hid_d = int(in_channels * shrink_ratio)     # matches PyTorch: int(in * ratio)
    hid_r = int(out_channels * shrink_ratio)
    ks = jax.random.split(key, 9)
    pool = dict(
        r0=_init_convbn(ks[0], hid_d, in_channels, 3),       # 3x3 stride 2
        r1=_init_convbn(ks[1], hid_d, hid_d, 3),             # 3x3
        r2_w=0.1 * jax.random.normal(ks[2], (out_channels, hid_d, 1, 1), jnp.float32),
        left=_init_convbn(ks[3], out_channels, in_channels, 1),
        alpha=jax.random.uniform(ks[4], (), jnp.float32, 0.1, 0.4),  # nn.PReLU weight
    )
    reg = []
    for i in range(4):
        kk = jax.random.split(ks[5 + i], 4)
        reg.append(dict(
            r0=_init_convbn(kk[0], hid_r, out_channels, 1),
            r1=_init_convbn(kk[1], hid_r, hid_r, 3),
            r2_w=0.1 * jax.random.normal(kk[2], (out_channels, hid_r, 1, 1), jnp.float32),
            alpha=jax.random.uniform(kk[3], (), jnp.float32, 0.1, 0.4),
        ))
    return dict(pool=pool, reg=reg)


def pack_params(params):
    """Fold eval-mode BN into the conv weights and repack into the transposed,
    tap-major layout the fused kernel consumes (done once, ahead of time)."""
    pool, reg = params['pool'], params['reg']

    def fold(q):
        s = q['gamma'] * jax.lax.rsqrt(q['var'] + EPS)
        return q['w'] * s[:, None, None, None], q['beta'] - q['mean'] * s

    def taps_t(w):  # (cout,cin,3,3) -> (9,cout,cin), tap index t = 3*dy + dx
        return jnp.transpose(w, (2, 3, 0, 1)).reshape(9, w.shape[0], w.shape[1])

    wr0, br0 = fold(pool['r0'])
    wr1, br1 = fold(pool['r1'])
    wl, bl = fold(pool['left'])
    w0, b0, w1, b1, w2, alphas = [], [], [], [], [], [pool['alpha']]
    for rp in reg:
        a, ab = fold(rp['r0'])
        c, cb = fold(rp['r1'])
        w0.append(a[:, :, 0, 0]); b0.append(ab[:, None])
        w1.append(taps_t(c));     b1.append(cb[:, None])
        w2.append(rp['r2_w'][:, :, 0, 0])
        alphas.append(rp['alpha'])
    return dict(
        wr0=taps_t(wr0), br0=br0[:, None],
        wr1=taps_t(wr1), br1=br1[:, None],
        wr2=pool['r2_w'][:, :, 0, 0],
        wl=wl[:, :, 0, 0], bl=bl[:, None],
        w0=jnp.stack(w0), b0=jnp.stack(b0),
        w1=jnp.stack(w1), b1=jnp.stack(b1),
        w2=jnp.stack(w2),
        alphas=jnp.stack(alphas)[:, None],
    )


# ----------------------------------------------------------------------------
# Pure-JAX reference (mirrors the PyTorch module, eval mode) for validation
# ----------------------------------------------------------------------------
def _reference_forward(params, x):
    dn = ('NCHW', 'OIHW', 'NCHW')
    hp = lax.Precision.HIGHEST

    def convbn(z, q, stride, padding):
        y = lax.conv_general_dilated(z, q['w'], (stride, stride),
                                     ((padding, padding), (padding, padding)),
                                     dimension_numbers=dn, precision=hp)
        s = q['gamma'] * jax.lax.rsqrt(q['var'] + EPS)
        b = q['beta'] - q['mean'] * s
        return jnp.maximum(y * s[None, :, None, None] + b[None, :, None, None], 0.0)

    def conv1x1(z, w):
        return lax.conv_general_dilated(z, w, (1, 1), ((0, 0), (0, 0)),
                                        dimension_numbers=dn, precision=hp)

    def prelu(z, a):
        return jnp.where(z >= 0.0, z, a * z)

    pool = params['pool']
    n, c, h, w = x.shape
    right = convbn(x, pool['r0'], 2, 1)
    right = convbn(right, pool['r1'], 1, 1)
    right = conv1x1(right, pool['r2_w'])                       # Dropout = identity
    left = x.reshape(n, c, h // 2, 2, w // 2, 2).max(axis=(3, 5))
    left = convbn(left, pool['left'], 1, 0)
    y = prelu(left + right, pool['alpha'])
    for rp in params['reg']:
        r = convbn(y, rp['r0'], 1, 0)
        r = convbn(r, rp['r1'], 1, 1)
        r = conv1x1(r, rp['r2_w'])
        y = prelu(y + r, rp['alpha'])
    return y


if __name__ == "__main__":
    key = jax.random.PRNGKey(0)
    k_params, k_x = jax.random.split(key)

    in_channels, out_channels = 16, 32
    batch, spatial = 2, 16

    params = init_bottleneck1_params(k_params, in_channels, out_channels)
    packed = pack_params(params)
    x = jax.random.normal(k_x, (batch, in_channels, spatial, spatial), jnp.float32)

    out, indices = modified_bottleneck1_forward(packed, x)
    out = jax.block_until_ready(out)

    expected = (batch, out_channels, spatial // 2, spatial // 2)
    assert out.shape == expected, (out.shape, expected)
    assert indices is None
    assert bool(jnp.all(jnp.isfinite(out)))

    ref = _reference_forward(params, x)
    err = float(jnp.max(jnp.abs(out - ref)))
    assert err < 5e-2, f"max |kernel - reference| = {err}"
    print("KERNEL_OK")
</pallas_src>

<mosaic_0001>
module attributes {stable_mosaic.version = 11 : i64} {
  func.func @kernel(%arg0: i32, %arg1: memref<1x4x16x128xf32, #tpu.memory_space<vmem>>, %arg2: memref<1x100xf32, #tpu.memory_space<vmem>>, %arg3: memref<9x4x16xf32, #tpu.memory_space<vmem>>, %arg4: memref<4x1xf32, #tpu.memory_space<vmem>>, %arg5: memref<9x4x4xf32, #tpu.memory_space<vmem>>, %arg6: memref<4x1xf32, #tpu.memory_space<vmem>>, %arg7: memref<32x4xf32, #tpu.memory_space<vmem>>, %arg8: memref<32x16xf32, #tpu.memory_space<vmem>>, %arg9: memref<32x1xf32, #tpu.memory_space<vmem>>, %arg10: memref<4x8x32xf32, #tpu.memory_space<vmem>>, %arg11: memref<4x8x1xf32, #tpu.memory_space<vmem>>, %arg12: memref<4x9x8x8xf32, #tpu.memory_space<vmem>>, %arg13: memref<4x8x1xf32, #tpu.memory_space<vmem>>, %arg14: memref<4x32x8xf32, #tpu.memory_space<vmem>>, %arg15: memref<5x1xf32, #tpu.memory_space<vmem>>, %arg16: memref<1x32x128xf32, #tpu.memory_space<vmem>>, %arg17: memref<8x128xf32, #tpu.memory_space<vmem>>) attributes {dimension_semantics = [#tpu.dimension_semantics<parallel>], iteration_bounds = array<i64: 2>, scalar_prefetch = 0 : i64, scratch_operands = 1 : i64, tpu.core_type = #tpu.core_type<tc>, window_params = [{transform_indices = @transform_0, window_bounds = array<i64: 1, 4, 16, 128>}, {pipeline_mode = #tpu.pipeline_mode<synchronous>, transform_indices = @transform_1, window_bounds = array<i64: 1, 100>}, {pipeline_mode = #tpu.pipeline_mode<synchronous>, transform_indices = @transform_2, window_bounds = array<i64: 9, 4, 16>}, {pipeline_mode = #tpu.pipeline_mode<synchronous>, transform_indices = @transform_3, window_bounds = array<i64: 4, 1>}, {pipeline_mode = #tpu.pipeline_mode<synchronous>, transform_indices = @transform_4, window_bounds = array<i64: 9, 4, 4>}, {pipeline_mode = #tpu.pipeline_mode<synchronous>, transform_indices = @transform_5, window_bounds = array<i64: 4, 1>}, {pipeline_mode = #tpu.pipeline_mode<synchronous>, transform_indices = @transform_6, window_bounds = array<i64: 32, 4>}, {pipeline_mode = #tpu.pipeline_mode<synchronous>, transform_indices = @transform_7, window_bounds = array<i64: 32, 16>}, {pipeline_mode = #tpu.pipeline_mode<synchronous>, transform_indices = @transform_8, window_bounds = array<i64: 32, 1>}, {pipeline_mode = #tpu.pipeline_mode<synchronous>, transform_indices = @transform_9, window_bounds = array<i64: 4, 8, 32>}, {pipeline_mode = #tpu.pipeline_mode<synchronous>, transform_indices = @transform_10, window_bounds = array<i64: 4, 8, 1>}, {pipeline_mode = #tpu.pipeline_mode<synchronous>, transform_indices = @transform_11, window_bounds = array<i64: 4, 9, 8, 8>}, {pipeline_mode = #tpu.pipeline_mode<synchronous>, transform_indices = @transform_12, window_bounds = array<i64: 4, 8, 1>}, {pipeline_mode = #tpu.pipeline_mode<synchronous>, transform_indices = @transform_13, window_bounds = array<i64: 4, 32, 8>}, {pipeline_mode = #tpu.pipeline_mode<synchronous>, transform_indices = @transform_14, window_bounds = array<i64: 5, 1>}, {transform_indices = @transform_15, window_bounds = array<i64: 1, 32, 128>}]} {
    %c0 = arith.constant 0 : index
    %c0_0 = arith.constant 0 : index
    %0 = vector.load %arg2[%c0, %c0_0] : memref<1x100xf32, #tpu.memory_space<vmem>>, vector<1x100xf32>
    %cst = arith.constant 0.000000e+00 : f32
    %1 = vector.broadcast %cst : f32 to vector<8x128xf32>
    %c0_1 = arith.constant 0 : index
    %c0_2 = arith.constant 0 : index
    %2 = vector.load %arg17[%c0_1, %c0_2] : memref<8x128xf32, #tpu.memory_space<vmem>>, vector<8x128xf32>
    tpu.vector_store %arg17[%c0_1, %c0_2], %1 {strides = array<i32>} : memref<8x128xf32, #tpu.memory_space<vmem>>, vector<8x128xf32>,
    %cst_3 = arith.constant 0.000000e+00 : f32
    %3 = vector.broadcast %cst_3 : f32 to vector<1x32x128xf32>
    %c0_4 = arith.constant 0 : index
    %c0_5 = arith.constant 0 : index
    %c0_6 = arith.constant 0 : index
    %4 = vector.load %arg16[%c0_4, %c0_5, %c0_6] : memref<1x32x128xf32, #tpu.memory_space<vmem>>, vector<1x32x128xf32>
    tpu.vector_store %arg16[%c0_4, %c0_5, %c0_6], %3 {strides = array<i32>} : memref<1x32x128xf32, #tpu.memory_space<vmem>>, vector<1x32x128xf32>,
    %c0_7 = arith.constant 0 : index
    %c0_8 = arith.constant 0 : index
    %5 = vector.load %arg4[%c0_7, %c0_8] : memref<4x1xf32, #tpu.memory_space<vmem>>, vector<4x1xf32>
    %c0_9 = arith.constant 0 : index
    %c0_10 = arith.constant 0 : index
    %c0_11 = arith.constant 0 : index
    %6 = vector.load %arg3[%c0_9, %c0_10, %c0_11] : memref<9x4x16xf32, #tpu.memory_space<vmem>>, vector<1x4x16xf32>
    %7 = vector.shape_cast %6 : vector<1x4x16xf32> to vector<4x16xf32>
    %c0_12 = arith.constant 0 : index
    %c3 = arith.constant 3 : index
    %c0_13 = arith.constant 0 : index
    %c1 = arith.constant 1 : index
    %8 = vector.load %arg1[%c0_12, %c3, %c0_13, %c1] : memref<1x4x16x128xf32, #tpu.memory_space<vmem>>, vector<1x1x16x100xf32>
    %9 = vector.shape_cast %8 : vector<1x1x16x100xf32> to vector<16x100xf32>
    %cst_14 = arith.constant dense<0.000000e+00> : vector<4x100xf32>
    %10 = tpu.matmul %7, %9, %cst_14 {dimension_numbers = #tpu.dot_dimension_numbers<[1], [0], [0], [1], [0, 0, 1, 1], [], []>} : vector<4x16xf32>, vector<16x100xf32>, vector<4x100xf32> -> vector<4x100xf32>
    %c1_15 = arith.constant 1 : index
    %c0_16 = arith.constant 0 : index
    %c0_17 = arith.constant 0 : index
    %11 = vector.load %arg3[%c1_15, %c0_16, %c0_17] : memref<9x4x16xf32, #tpu.memory_space<vmem>>, vector<1x4x16xf32>
    %12 = vector.shape_cast %11 : vector<1x4x16xf32> to vector<4x16xf32>
    %c0_18 = arith.constant 0 : index
    %c2 = arith.constant 2 : index
    %c0_19 = arith.constant 0 : index
    %c2_20 = arith.constant 2 : index
    %13 = vector.load %arg1[%c0_18, %c2, %c0_19, %c2_20] : memref<1x4x16x128xf32, #tpu.memory_space<vmem>>, vector<1x1x16x100xf32>
    %14 = vector.shape_cast %13 : vector<1x1x16x100xf32> to vector<16x100xf32>
    %cst_21 = arith.constant dense<0.000000e+00> : vector<4x100xf32>
    %15 = tpu.matmul %12, %14, %cst_21 {dimension_numbers = #tpu.dot_dimension_numbers<[1], [0], [0], [1], [0, 0, 1, 1], [], []>} : vector<4x16xf32>, vector<16x100xf32>, vector<4x100xf32> -> vector<4x100xf32>
    %16 = arith.addf %10, %15 : vector<4x100xf32>
    %c2_22 = arith.constant 2 : index
    %c0_23 = arith.constant 0 : index
    %c0_24 = arith.constant 0 : index
    %17 = vector.load %arg3[%c2_22, %c0_23, %c0_24] : memref<9x4x16xf32, #tpu.memory_space<vmem>>, vector<1x4x16xf32>
    %18 = vector.shape_cast %17 : vector<1x4x16xf32> to vector<4x16xf32>
    %c0_25 = arith.constant 0 : index
    %c3_26 = arith.constant 3 : index
    %c0_27 = arith.constant 0 : index
    %c2_28 = arith.constant 2 : index
    %19 = vector.load %arg1[%c0_25, %c3_26, %c0_27, %c2_28] : memref<1x4x16x128xf32, #tpu.memory_space<vmem>>, vector<1x1x16x100xf32>
    %20 = vector.shape_cast %19 : vector<1x1x16x100xf32> to vector<16x100xf32>
    %cst_29 = arith.constant dense<0.000000e+00> : vector<4x100xf32>
    %21 = tpu.matmul %18, %20, %cst_29 {dimension_numbers = #tpu.dot_dimension_numbers<[1], [0], [0], [1], [0, 0, 1, 1], [], []>} : vector<4x16xf32>, vector<16x100xf32>, vector<4x100xf32> -> vector<4x100xf32>
    %22 = arith.addf %16, %21 : vector<4x100xf32>
    %c3_30 = arith.constant 3 : index
    %c0_31 = arith.constant 0 : index
    %c0_32 = arith.constant 0 : index
    %23 = vector.load %arg3[%c3_30, %c0_31, %c0_32] : memref<9x4x16xf32, #tpu.memory_space<vmem>>, vector<1x4x16xf32>
    %24 = vector.shape_cast %23 : vector<1x4x16xf32> to vector<4x16xf32>
    %c0_33 = arith.constant 0 : index
    %c1_34 = arith.constant 1 : index
    %c0_35 = arith.constant 0 : index
    %c11 = arith.constant 11 : index
    %25 = vector.load %arg1[%c0_33, %c1_34, %c0_35, %c11] : memref<1x4x16x128xf32, #tpu.memory_space<vmem>>, vector<1x1x16x100xf32>
    %26 = vector.shape_cast %25 : vector<1x1x16x100xf32> to vector<16x100xf32>
    %cst_36 = arith.constant dense<0.000000e+00> : vector<4x100xf32>
    %27 = tpu.matmul %24, %26, %cst_36 {dimension_numbers = #tpu.dot_dimension_numbers<[1], [0], [0], [1], [0, 0, 1, 1], [], []>} : vector<4x16xf32>, vector<16x100xf32>, vector<4x100xf32> -> vector<4x100xf32>
    %28 = arith.addf %22, %27 : vector<4x100xf32>
    %c4 = arith.constant 4 : index
    %c0_37 = arith.constant 0 : index
    %c0_38 = arith.constant 0 : index
    %29 = vector.load %arg3[%c4, %c0_37, %c0_38] : memref<9x4x16xf32, #tpu.memory_space<vmem>>, vector<1x4x16xf32>
    %30 = vector.shape_cast %29 : vector<1x4x16xf32> to vector<4x16xf32>
    %c0_39 = arith.constant 0 : index
    %c0_40 = arith.constant 0 : index
    %c0_41 = arith.constant 0 : index
    %c12 = arith.constant 12 : index
    %31 = vector.load %arg1[%c0_39, %c0_40, %c0_41, %c12] : memref<1x4x16x128xf32, #tpu.memory_space<vmem>>, vector<1x1x16x100xf32>
    %32 = vector.shape_cast %31 : vector<1x1x16x100xf32> to vector<16x100xf32>
    %cst_42 = arith.constant dense<0.000000e+00> : vector<4x100xf32>
    %33 = tpu.matmul %30, %32, %cst_42 {dimension_numbers = #tpu.dot_dimension_numbers<[1], [0], [0], [1], [0, 0, 1, 1], [], []>} : vector<4x16xf32>, vector<16x100xf32>, vector<4x100xf32> -> vector<4x100xf32>
    %34 = arith.addf %28, %33 : vector<4x100xf32>
    %c5 = arith.constant 5 : index
    %c0_43 = arith.constant 0 : index
    %c0_44 = arith.constant 0 : index
    %35 = vector.load %arg3[%c5, %c0_43, %c0_44] : memref<9x4x16xf32, #tpu.memory_space<vmem>>, vector<1x4x16xf32>
    %36 = vector.shape_cast %35 : vector<1x4x16xf32> to vector<4x16xf32>
    %c0_45 = arith.constant 0 : index
    %c1_46 = arith.constant 1 : index
    %c0_47 = arith.constant 0 : index
    %c12_48 = arith.constant 12 : index
    %37 = vector.load %arg1[%c0_45, %c1_46, %c0_47, %c12_48] : memref<1x4x16x128xf32, #tpu.memory_space<vmem>>, vector<1x1x16x100xf32>
    %38 = vector.shape_cast %37 : vector<1x1x16x100xf32> to vector<16x100xf32>
    %cst_49 = arith.constant dense<0.000000e+00> : vector<4x100xf32>
    %39 = tpu.matmul %36, %38, %cst_49 {dimension_numbers = #tpu.dot_dimension_numbers<[1], [0], [0], [1], [0, 0, 1, 1], [], []>} : vector<4x16xf32>, vector<16x100xf32>, vector<4x100xf32> -> vector<4x100xf32>
    %40 = arith.addf %34, %39 : vector<4x100xf32>
    %c6 = arith.constant 6 : index
    %c0_50 = arith.constant 0 : index
    %c0_51 = arith.constant 0 : index
    %41 = vector.load %arg3[%c6, %c0_50, %c0_51] : memref<9x4x16xf32, #tpu.memory_space<vmem>>, vector<1x4x16xf32>
    %42 = vector.shape_cast %41 : vector<1x4x16xf32> to vector<4x16xf32>
    %c0_52 = arith.constant 0 : index
    %c3_53 = arith.constant 3 : index
    %c0_54 = arith.constant 0 : index
    %c11_55 = arith.constant 11 : index
    %43 = vector.load %arg1[%c0_52, %c3_53, %c0_54, %c11_55] : memref<1x4x16x128xf32, #tpu.memory_space<vmem>>, vector<1x1x16x100xf32>
    %44 = vector.shape_cast %43 : vector<1x1x16x100xf32> to vector<16x100xf32>
    %cst_56 = arith.constant dense<0.000000e+00> : vector<4x100xf32>
    %45 = tpu.matmul %42, %44, %cst_56 {dimension_numbers = #tpu.dot_dimension_numbers<[1], [0], [0], [1], [0, 0, 1, 1], [], []>} : vector<4x16xf32>, vector<16x100xf32>, vector<4x100xf32> -> vector<4x100xf32>
    %46 = arith.addf %40, %45 : vector<4x100xf32>
    %c7 = arith.constant 7 : index
    %c0_57 = arith.constant 0 : index
    %c0_58 = arith.constant 0 : index
    %47 = vector.load %arg3[%c7, %c0_57, %c0_58] : memref<9x4x16xf32, #tpu.memory_space<vmem>>, vector<1x4x16xf32>
    %48 = vector.shape_cast %47 : vector<1x4x16xf32> to vector<4x16xf32>
    %c0_59 = arith.constant 0 : index
    %c2_60 = arith.constant 2 : index
    %c0_61 = arith.constant 0 : index
    %c12_62 = arith.constant 12 : index
    %49 = vector.load %arg1[%c0_59, %c2_60, %c0_61, %c12_62] : memref<1x4x16x128xf32, #tpu.memory_space<vmem>>, vector<1x1x16x100xf32>
    %50 = vector.shape_cast %49 : vector<1x1x16x100xf32> to vector<16x100xf32>
    %cst_63 = arith.constant dense<0.000000e+00> : vector<4x100xf32>
    %51 = tpu.matmul %48, %50, %cst_63 {dimension_numbers = #tpu.dot_dimension_numbers<[1], [0], [0], [1], [0, 0, 1, 1], [], []>} : vector<4x16xf32>, vector<16x100xf32>, vector<4x100xf32> -> vector<4x100xf32>
    %52 = arith.addf %46, %51 : vector<4x100xf32>
    %c8 = arith.constant 8 : index
    %c0_64 = arith.constant 0 : index
    %c0_65 = arith.constant 0 : index
    %53 = vector.load %arg3[%c8, %c0_64, %c0_65] : memref<9x4x16xf32, #tpu.memory_space<vmem>>, vector<1x4x16xf32>
    %54 = vector.shape_cast %53 : vector<1x4x16xf32> to vector<4x16xf32>
    %c0_66 = arith.constant 0 : index
    %c3_67 = arith.constant 3 : index
    %c0_68 = arith.constant 0 : index
    %c12_69 = arith.constant 12 : index
    %55 = vector.load %arg1[%c0_66, %c3_67, %c0_68, %c12_69] : memref<1x4x16x128xf32, #tpu.memory_space<vmem>>, vector<1x1x16x100xf32>
    %56 = vector.shape_cast %55 : vector<1x1x16x100xf32> to vector<16x100xf32>
    %cst_70 = arith.constant dense<0.000000e+00> : vector<4x100xf32>
    %57 = tpu.matmul %54, %56, %cst_70 {dimension_numbers = #tpu.dot_dimension_numbers<[1], [0], [0], [1], [0, 0, 1, 1], [], []>} : vector<4x16xf32>, vector<16x100xf32>, vector<4x100xf32> -> vector<4x100xf32>
    %58 = arith.addf %52, %57 : vector<4x100xf32>
    %59 = vector.broadcast %5 : vector<4x1xf32> to vector<4x100xf32>
    %60 = arith.addf %58, %59 : vector<4x100xf32>
    %cst_71 = arith.constant 0.000000e+00 : f32
    %61 = vector.broadcast %cst_71 : f32 to vector<4x100xf32>
    %62 = arith.maximumf %60, %61 : vector<4x100xf32>
    %63 = vector.broadcast %0 : vector<1x100xf32> to vector<4x100xf32>
    %64 = arith.mulf %62, %63 : vector<4x100xf32>
    %c0_72 = arith.constant 0 : index
    %c12_73 = arith.constant 12 : index
    %65 = vector.load %arg17[%c0_72, %c12_73] : memref<8x128xf32, #tpu.memory_space<vmem>>, vector<4x100xf32>
    tpu.vector_store %arg17[%c0_72, %c12_73], %64 {strides = array<i32>} : memref<8x128xf32, #tpu.memory_space<vmem>>, vector<4x100xf32>,
    %c0_74 = arith.constant 0 : index
    %c0_75 = arith.constant 0 : index
    %66 = vector.load %arg6[%c0_74, %c0_75] : memref<4x1xf32, #tpu.memory_space<vmem>>, vector<4x1xf32>
    %c0_76 = arith.constant 0 : index
    %c0_77 = arith.constant 0 : index
    %c0_78 = arith.constant 0 : index
    %67 = vector.load %arg5[%c0_76, %c0_77, %c0_78] : memref<9x4x4xf32, #tpu.memory_space<vmem>>, vector<1x4x4xf32>
    %68 = vector.shape_cast %67 : vector<1x4x4xf32> to vector<4x4xf32>
    %c0_79 = arith.constant 0 : index
    %c1_80 = arith.constant 1 : index
    %69 = vector.load %arg17[%c0_79, %c1_80] : memref<8x128xf32, #tpu.memory_space<vmem>>, vector<4x100xf32>
    %cst_81 = arith.constant dense<0.000000e+00> : vector<4x100xf32>
    %70 = tpu.matmul %68, %69, %cst_81 {dimension_numbers = #tpu.dot_dimension_numbers<[1], [0], [0], [1], [0, 0, 1, 1], [], []>} : vector<4x4xf32>, vector<4x100xf32>, vector<4x100xf32> -> vector<4x100xf32>
    %c1_82 = arith.constant 1 : index
    %c0_83 = arith.constant 0 : index
    %c0_84 = arith.constant 0 : index
    %71 = vector.load %arg5[%c1_82, %c0_83, %c0_84] : memref<9x4x4xf32, #tpu.memory_space<vmem>>, vector<1x4x4xf32>
    %72 = vector.shape_cast %71 : vector<1x4x4xf32> to vector<4x4xf32>
    %c0_85 = arith.constant 0 : index
    %c2_86 = arith.constant 2 : index
    %73 = vector.load %arg17[%c0_85, %c2_86] : memref<8x128xf32, #tpu.memory_space<vmem>>, vector<4x100xf32>
    %cst_87 = arith.constant dense<0.000000e+00> : vector<4x100xf32>
    %74 = tpu.matmul %72, %73, %cst_87 {dimension_numbers = #tpu.dot_dimension_numbers<[1], [0], [0], [1], [0, 0, 1, 1], [], []>} : vector<4x4xf32>, vector<4x100xf32>, vector<4x100xf32> -> vector<4x100xf32>
    %75 = arith.addf %70, %74 : vector<4x100xf32>
    %c2_88 = arith.constant 2 : index
    %c0_89 = arith.constant 0 : index
    %c0_90 = arith.constant 0 : index
    %76 = vector.load %arg5[%c2_88, %c0_89, %c0_90] : memref<9x4x4xf32, #tpu.memory_space<vmem>>, vector<1x4x4xf32>
    %77 = vector.shape_cast %76 : vector<1x4x4xf32> to vector<4x4xf32>
    %c0_91 = arith.constant 0 : index
    %c3_92 = arith.constant 3 : index
    %78 = vector.load %arg17[%c0_91, %c3_92] : memref<8x128xf32, #tpu.memory_space<vmem>>, vector<4x100xf32>
    %cst_93 = arith.constant dense<0.000000e+00> : vector<4x100xf32>
    %79 = tpu.matmul %77, %78, %cst_93 {dimension_numbers = #tpu.dot_dimension_numbers<[1], [0], [0], [1], [0, 0, 1, 1], [], []>} : vector<4x4xf32>, vector<4x100xf32>, vector<4x100xf32> -> vector<4x100xf32>
    %80 = arith.addf %75, %79 : vector<4x100xf32>
    %c3_94 = arith.constant 3 : index
    %c0_95 = arith.constant 0 : index
    %c0_96 = arith.constant 0 : index
    %81 = vector.load %arg5[%c3_94, %c0_95, %c0_96] : memref<9x4x4xf32, #tpu.memory_space<vmem>>, vector<1x4x4xf32>
    %82 = vector.shape_cast %81 : vector<1x4x4xf32> to vector<4x4xf32>
    %c0_97 = arith.constant 0 : index
    %c11_98 = arith.constant 11 : index
    %83 = vector.load %arg17[%c0_97, %c11_98] : memref<8x128xf32, #tpu.memory_space<vmem>>, vector<4x100xf32>
    %cst_99 = arith.constant dense<0.000000e+00> : vector<4x100xf32>
    %84 = tpu.matmul %82, %83, %cst_99 {dimension_numbers = #tpu.dot_dimension_numbers<[1], [0], [0], [1], [0, 0, 1, 1], [], []>} : vector<4x4xf32>, vector<4x100xf32>, vector<4x100xf32> -> vector<4x100xf32>
    %85 = arith.addf %80, %84 : vector<4x100xf32>
    %c4_100 = arith.constant 4 : index
    %c0_101 = arith.constant 0 : index
    %c0_102 = arith.constant 0 : index
    %86 = vector.load %arg5[%c4_100, %c0_101, %c0_102] : memref<9x4x4xf32, #tpu.memory_space<vmem>>, vector<1x4x4xf32>
    %87 = vector.shape_cast %86 : vector<1x4x4xf32> to vector<4x4xf32>
    %c0_103 = arith.constant 0 : index
    %c12_104 = arith.constant 12 : index
    %88 = vector.load %arg17[%c0_103, %c12_104] : memref<8x128xf32, #tpu.memory_space<vmem>>, vector<4x100xf32>
    %cst_105 = arith.constant dense<0.000000e+00> : vector<4x100xf32>
    %89 = tpu.matmul %87, %88, %cst_105 {dimension_numbers = #tpu.dot_dimension_numbers<[1], [0], [0], [1], [0, 0, 1, 1], [], []>} : vector<4x4xf32>, vector<4x100xf32>, vector<4x100xf32> -> vector<4x100xf32>
    %90 = arith.addf %85, %89 : vector<4x100xf32>
    %c5_106 = arith.constant 5 : index
    %c0_107 = arith.constant 0 : index
    %c0_108 = arith.constant 0 : index
    %91 = vector.load %arg5[%c5_106, %c0_107, %c0_108] : memref<9x4x4xf32, #tpu.memory_space<vmem>>, vector<1x4x4xf32>
    %92 = vector.shape_cast %91 : vector<1x4x4xf32> to vector<4x4xf32>
    %c0_109 = arith.constant 0 : index
    %c13 = arith.constant 13 : index
    %93 = vector.load %arg17[%c0_109, %c13] : memref<8x128xf32, #tpu.memory_space<vmem>>, vector<4x100xf32>
    %cst_110 = arith.constant dense<0.000000e+00> : vector<4x100xf32>
    %94 = tpu.matmul %92, %93, %cst_110 {dimension_numbers = #tpu.dot_dimension_numbers<[1], [0], [0], [1], [0, 0, 1, 1], [], []>} : vector<4x4xf32>, vector<4x100xf32>, vector<4x100xf32> -> vector<4x100xf32>
    %95 = arith.addf %90, %94 : vector<4x100xf32>
    %c6_111 = arith.constant 6 : index
    %c0_112 = arith.constant 0 : index
    %c0_113 = arith.constant 0 : index
    %96 = vector.load %arg5[%c6_111, %c0_112, %c0_113] : memref<9x4x4xf32, #tpu.memory_space<vmem>>, vector<1x4x4xf32>
    %97 = vector.shape_cast %96 : vector<1x4x4xf32> to vector<4x4xf32>
    %c0_114 = arith.constant 0 : index
    %c21 = arith.constant 21 : index
    %98 = vector.load %arg17[%c0_114, %c21] : memref<8x128xf32, #tpu.memory_space<vmem>>, vector<4x100xf32>
    %cst_115 = arith.constant dense<0.000000e+00> : vector<4x100xf32>
    %99 = tpu.matmul %97, %98, %cst_115 {dimension_numbers = #tpu.dot_dimension_numbers<[1], [0], [0], [1], [0, 0, 1, 1], [], []>} : vector<4x4xf32>, vector<4x100xf32>, vector<4x100xf32> -> vector<4x100xf32>
    %100 = arith.addf %95, %99 : vector<4x100xf32>
    %c7_116 = arith.constant 7 : index
    %c0_117 = arith.constant 0 : index
    %c0_118 = arith.constant 0 : index
    %101 = vector.load %arg5[%c7_116, %c0_117, %c0_118] : memref<9x4x4xf32, #tpu.memory_space<vmem>>, vector<1x4x4xf32>
    %102 = vector.shape_cast %101 : vector<1x4x4xf32> to vector<4x4xf32>
    %c0_119 = arith.constant 0 : index
    %c22 = arith.constant 22 : index
    %103 = vector.load %arg17[%c0_119, %c22] : memref<8x128xf32, #tpu.memory_space<vmem>>, vector<4x100xf32>
    %cst_120 = arith.constant dense<0.000000e+00> : vector<4x100xf32>
    %104 = tpu.matmul %102, %103, %cst_120 {dimension_numbers = #tpu.dot_dimension_numbers<[1], [0], [0], [1], [0, 0, 1, 1], [], []>} : vector<4x4xf32>, vector<4x100xf32>, vector<4x100xf32> -> vector<4x100xf32>
    %105 = arith.addf %100, %104 : vector<4x100xf32>
    %c8_121 = arith.constant 8 : index
    %c0_122 = arith.constant 0 : index
    %c0_123 = arith.constant 0 : index
    %106 = vector.load %arg5[%c8_121, %c0_122, %c0_123] : memref<9x4x4xf32, #tpu.memory_space<vmem>>, vector<1x4x4xf32>
    %107 = vector.shape_cast %106 : vector<1x4x4xf32> to vector<4x4xf32>
    %c0_124 = arith.constant 0 : index
    %c23 = arith.constant 23 : index
    %108 = vector.load %arg17[%c0_124, %c23] : memref<8x128xf32, #tpu.memory_space<vmem>>, vector<4x100xf32>
    %cst_125 = arith.constant dense<0.000000e+00> : vector<4x100xf32>
    %109 = tpu.matmul %107, %108, %cst_125 {dimension_numbers = #tpu.dot_dimension_numbers<[1], [0], [0], [1], [0, 0, 1, 1], [], []>} : vector<4x4xf32>, vector<4x100xf32>, vector<4x100xf32> -> vector<4x100xf32>
    %110 = arith.addf %105, %109 : vector<4x100xf32>
    %111 = vector.broadcast %66 : vector<4x1xf32> to vector<4x100xf32>
    %112 = arith.addf %110, %111 : vector<4x100xf32>
    %cst_126 = arith.constant 0.000000e+00 : f32
    %113 = vector.broadcast %cst_126 : f32 to vector<4x100xf32>
    %114 = arith.maximumf %112, %113 : vector<4x100xf32>
    %c0_127 = arith.constant 0 : index
    %c0_128 = arith.constant 0 : index
    %115 = vector.load %arg7[%c0_127, %c0_128] : memref<32x4xf32, #tpu.memory_space<vmem>>, vector<32x4xf32>
    %cst_129 = arith.constant dense<0.000000e+00> : vector<32x100xf32>
    %116 = tpu.matmul %115, %114, %cst_129 {dimension_numbers = #tpu.dot_dimension_numbers<[1], [0], [0], [1], [0, 0, 1, 1], [], []>} : vector<32x4xf32>, vector<4x100xf32>, vector<32x100xf32> -> vector<32x100xf32>
    %c0_130 = arith.constant 0 : index
    %c0_131 = arith.constant 0 : index
    %c0_132 = arith.constant 0 : index
    %c12_133 = arith.constant 12 : index
    %117 = vector.load %arg1[%c0_130, %c0_131, %c0_132, %c12_133] : memref<1x4x16x128xf32, #tpu.memory_space<vmem>>, vector<1x1x16x100xf32>
    %118 = vector.shape_cast %117 : vector<1x1x16x100xf32> to vector<16x100xf32>
    %c0_134 = arith.constant 0 : index
    %c1_135 = arith.constant 1 : index
    %c0_136 = arith.constant 0 : index
    %c12_137 = arith.constant 12 : index
    %119 = vector.load %arg1[%c0_134, %c1_135, %c0_136, %c12_137] : memref<1x4x16x128xf32, #tpu.memory_space<vmem>>, vector<1x1x16x100xf32>
    %120 = vector.shape_cast %119 : vector<1x1x16x100xf32> to vector<16x100xf32>
    %121 = arith.maximumf %118, %120 : vector<16x100xf32>
    %c0_138 = arith.constant 0 : index
    %c2_139 = arith.constant 2 : index
    %c0_140 = arith.constant 0 : index
    %c12_141 = arith.constant 12 : index
    %122 = vector.load %arg1[%c0_138, %c2_139, %c0_140, %c12_141] : memref<1x4x16x128xf32, #tpu.memory_space<vmem>>, vector<1x1x16x100xf32>
    %123 = vector.shape_cast %122 : vector<1x1x16x100xf32> to vector<16x100xf32>
    %124 = arith.maximumf %121, %123 : vector<16x100xf32>
    %c0_142 = arith.constant 0 : index
    %c3_143 = arith.constant 3 : index
    %c0_144 = arith.constant 0 : index
    %c12_145 = arith.constant 12 : index
    %125 = vector.load %arg1[%c0_142, %c3_143, %c0_144, %c12_145] : memref<1x4x16x128xf32, #tpu.memory_space<vmem>>, vector<1x1x16x100xf32>
    %126 = vector.shape_cast %125 : vector<1x1x16x100xf32> to vector<16x100xf32>
    %127 = arith.maximumf %124, %126 : vector<16x100xf32>
    %c0_146 = arith.constant 0 : index
    %c0_147 = arith.constant 0 : index
    %128 = vector.load %arg8[%c0_146, %c0_147] : memref<32x16xf32, #tpu.memory_space<vmem>>, vector<32x16xf32>
    %cst_148 = arith.constant dense<0.000000e+00> : vector<32x100xf32>
    %129 = tpu.matmul %128, %127, %cst_148 {dimension_numbers = #tpu.dot_dimension_numbers<[1], [0], [0], [1], [0, 0, 1, 1], [], []>} : vector<32x16xf32>, vector<16x100xf32>, vector<32x100xf32> -> vector<32x100xf32>
    %c0_149 = arith.constant 0 : index
    %c0_150 = arith.constant 0 : index
    %130 = vector.load %arg9[%c0_149, %c0_150] : memref<32x1xf32, #tpu.memory_space<vmem>>, vector<32x1xf32>
    %131 = vector.broadcast %130 : vector<32x1xf32> to vector<32x100xf32>
    %132 = arith.addf %129, %131 : vector<32x100xf32>
    %cst_151 = arith.constant 0.000000e+00 : f32
    %133 = vector.broadcast %cst_151 : f32 to vector<32x100xf32>
    %134 = arith.maximumf %132, %133 : vector<32x100xf32>
    %135 = arith.addf %134, %116 : vector<32x100xf32>
    %c0_152 = arith.constant 0 : index
    %c0_153 = arith.constant 0 : index
    %136 = vector.load %arg15[%c0_152, %c0_153] : memref<5x1xf32, #tpu.memory_space<vmem>>, vector<1x1xf32>
    %cst_154 = arith.constant 0.000000e+00 : f32
    %137 = vector.broadcast %cst_154 : f32 to vector<32x100xf32>
    %138 = arith.cmpf oge, %135, %137 : vector<32x100xf32>
    %139 = vector.broadcast %136 : vector<1x1xf32> to vector<32x100xf32>
    %140 = arith.mulf %139, %135 : vector<32x100xf32>
    %141 = arith.select %138, %135, %140 : vector<32x100xi1>, vector<32x100xf32>
    %c0_155 = arith.constant 0 : index
    %c0_156 = arith.constant 0 : index
    %c0_157 = arith.constant 0 : index
    %142 = vector.load %arg10[%c0_155, %c0_156, %c0_157] : memref<4x8x32xf32, #tpu.memory_space<vmem>>, vector<1x8x32xf32>
    %143 = vector.shape_cast %142 : vector<1x8x32xf32> to vector<8x32xf32>
    %cst_158 = arith.constant dense<0.000000e+00> : vector<8x100xf32>
    %144 = tpu.matmul %143, %141, %cst_158 {dimension_numbers = #tpu.dot_dimension_numbers<[1], [0], [0], [1], [0, 0, 1, 1], [], []>} : vector<8x32xf32>, vector<32x100xf32>, vector<8x100xf32> -> vector<8x100xf32>
    %c0_159 = arith.constant 0 : index
    %c0_160 = arith.constant 0 : index
    %c0_161 = arith.constant 0 : index
    %145 = vector.load %arg11[%c0_159, %c0_160, %c0_161] : memref<4x8x1xf32, #tpu.memory_space<vmem>>, vector<1x8x1xf32>
    %146 = vector.shape_cast %145 : vector<1x8x1xf32> to vector<8x1xf32>
    %147 = vector.broadcast %146 : vector<8x1xf32> to vector<8x100xf32>
    %148 = arith.addf %144, %147 : vector<8x100xf32>
    %cst_162 = arith.constant 0.000000e+00 : f32
    %149 = vector.broadcast %cst_162 : f32 to vector<8x100xf32>
    %150 = arith.maximumf %148, %149 : vector<8x100xf32>
    %151 = vector.broadcast %0 : vector<1x100xf32> to vector<8x100xf32>
    %152 = arith.mulf %150, %151 : vector<8x100xf32>
    %c0_163 = arith.constant 0 : index
    %c12_164 = arith.constant 12 : index
    %153 = vector.load %arg17[%c0_163, %c12_164] : memref<8x128xf32, #tpu.memory_space<vmem>>, vector<8x100xf32>
    tpu.vector_store %arg17[%c0_163, %c12_164], %152 {strides = array<i32>} : memref<8x128xf32, #tpu.memory_space<vmem>>, vector<8x100xf32>,
    %c0_165 = arith.constant 0 : index
    %c0_166 = arith.constant 0 : index
    %c0_167 = arith.constant 0 : index
    %154 = vector.load %arg13[%c0_165, %c0_166, %c0_167] : memref<4x8x1xf32, #tpu.memory_space<vmem>>, vector<1x8x1xf32>
    %155 = vector.shape_cast %154 : vector<1x8x1xf32> to vector<8x1xf32>
    %c0_168 = arith.constant 0 : index
    %c0_169 = arith.constant 0 : index
    %c0_170 = arith.constant 0 : index
    %c0_171 = arith.constant 0 : index
    %156 = vector.load %arg12[%c0_168, %c0_169, %c0_170, %c0_171] : memref<4x9x8x8xf32, #tpu.memory_space<vmem>>, vector<1x1x8x8xf32>
    %157 = vector.shape_cast %156 : vector<1x1x8x8xf32> to vector<8x8xf32>
    %c0_172 = arith.constant 0 : index
    %c1_173 = arith.constant 1 : index
    %158 = vector.load %arg17[%c0_172, %c1_173] : memref<8x128xf32, #tpu.memory_space<vmem>>, vector<8x100xf32>
    %cst_174 = arith.constant dense<0.000000e+00> : vector<8x100xf32>
    %159 = tpu.matmul %157, %158, %cst_174 {dimension_numbers = #tpu.dot_dimension_numbers<[1], [0], [0], [1], [0, 0, 1, 1], [], []>} : vector<8x8xf32>, vector<8x100xf32>, vector<8x100xf32> -> vector<8x100xf32>
    %c0_175 = arith.constant 0 : index
    %c1_176 = arith.constant 1 : index
    %c0_177 = arith.constant 0 : index
    %c0_178 = arith.constant 0 : index
    %160 = vector.load %arg12[%c0_175, %c1_176, %c0_177, %c0_178] : memref<4x9x8x8xf32, #tpu.memory_space<vmem>>, vector<1x1x8x8xf32>
    %161 = vector.shape_cast %160 : vector<1x1x8x8xf32> to vector<8x8xf32>
    %c0_179 = arith.constant 0 : index
    %c2_180 = arith.constant 2 : index
    %162 = vector.load %arg17[%c0_179, %c2_180] : memref<8x128xf32, #tpu.memory_space<vmem>>, vector<8x100xf32>
    %cst_181 = arith.constant dense<0.000000e+00> : vector<8x100xf32>
    %163 = tpu.matmul %161, %162, %cst_181 {dimension_numbers = #tpu.dot_dimension_numbers<[1], [0], [0], [1], [0, 0, 1, 1], [], []>} : vector<8x8xf32>, vector<8x100xf32>, vector<8x100xf32> -> vector<8x100xf32>
    %164 = arith.addf %159, %163 : vector<8x100xf32>
    %c0_182 = arith.constant 0 : index
    %c2_183 = arith.constant 2 : index
    %c0_184 = arith.constant 0 : index
    %c0_185 = arith.constant 0 : index
    %165 = vector.load %arg12[%c0_182, %c2_183, %c0_184, %c0_185] : memref<4x9x8x8xf32, #tpu.memory_space<vmem>>, vector<1x1x8x8xf32>
    %166 = vector.shape_cast %165 : vector<1x1x8x8xf32> to vector<8x8xf32>
    %c0_186 = arith.constant 0 : index
    %c3_187 = arith.constant 3 : index
    %167 = vector.load %arg17[%c0_186, %c3_187] : memref<8x128xf32, #tpu.memory_space<vmem>>, vector<8x100xf32>
    %cst_188 = arith.constant dense<0.000000e+00> : vector<8x100xf32>
    %168 = tpu.matmul %166, %167, %cst_188 {dimension_numbers = #tpu.dot_dimension_numbers<[1], [0], [0], [1], [0, 0, 1, 1], [], []>} : vector<8x8xf32>, vector<8x100xf32>, vector<8x100xf32> -> vector<8x100xf32>
    %169 = arith.addf %164, %168 : vector<8x100xf32>
    %c0_189 = arith.constant 0 : index
    %c3_190 = arith.constant 3 : index
    %c0_191 = arith.constant 0 : index
    %c0_192 = arith.constant 0 : index
    %170 = vector.load %arg12[%c0_189, %c3_190, %c0_191, %c0_192] : memref<4x9x8x8xf32, #tpu.memory_space<vmem>>, vector<1x1x8x8xf32>
    %171 = vector.shape_cast %170 : vector<1x1x8x8xf32> to vector<8x8xf32>
    %c0_193 = arith.constant 0 : index
    %c11_194 = arith.constant 11 : index
    %172 = vector.load %arg17[%c0_193, %c11_194] : memref<8x128xf32, #tpu.memory_space<vmem>>, vector<8x100xf32>
    %cst_195 = arith.constant dense<0.000000e+00> : vector<8x100xf32>
    %173 = tpu.matmul %171, %172, %cst_195 {dimension_numbers = #tpu.dot_dimension_numbers<[1], [0], [0], [1], [0, 0, 1, 1], [], []>} : vector<8x8xf32>, vector<8x100xf32>, vector<8x100xf32> -> vector<8x100xf32>
    %174 = arith.addf %169, %173 : vector<8x100xf32>
    %c0_196 = arith.constant 0 : index
    %c4_197 = arith.constant 4 : index
    %c0_198 = arith.constant 0 : index
    %c0_199 = arith.constant 0 : index
    %175 = vector.load %arg12[%c0_196, %c4_197, %c0_198, %c0_199] : memref<4x9x8x8xf32, #tpu.memory_space<vmem>>, vector<1x1x8x8xf32>
    %176 = vector.shape_cast %175 : vector<1x1x8x8xf32> to vector<8x8xf32>
    %c0_200 = arith.constant 0 : index
    %c12_201 = arith.constant 12 : index
    %177 = vector.load %arg17[%c0_200, %c12_201] : memref<8x128xf32, #tpu.memory_space<vmem>>, vector<8x100xf32>
    %cst_202 = arith.constant dense<0.000000e+00> : vector<8x100xf32>
    %178 = tpu.matmul %176, %177, %cst_202 {dimension_numbers = #tpu.dot_dimension_numbers<[1], [0], [0], [1], [0, 0, 1, 1], [], []>} : vector<8x8xf32>, vector<8x100xf32>, vector<8x100xf32> -> vector<8x100xf32>
    %179 = arith.addf %174, %178 : vector<8x100xf32>
    %c0_203 = arith.constant 0 : index
    %c5_204 = arith.constant 5 : index
    %c0_205 = arith.constant 0 : index
    %c0_206 = arith.constant 0 : index
    %180 = vector.load %arg12[%c0_203, %c5_204, %c0_205, %c0_206] : memref<4x9x8x8xf32, #tpu.memory_space<vmem>>, vector<1x1x8x8xf32>
    %181 = vector.shape_cast %180 : vector<1x1x8x8xf32> to vector<8x8xf32>
    %c0_207 = arith.constant 0 : index
    %c13_208 = arith.constant 13 : index
    %182 = vector.load %arg17[%c0_207, %c13_208] : memref<8x128xf32, #tpu.memory_space<vmem>>, vector<8x100xf32>
    %cst_209 = arith.constant dense<0.000000e+00> : vector<8x100xf32>
    %183 = tpu.matmul %181, %182, %cst_209 {dimension_numbers = #tpu.dot_dimension_numbers<[1], [0], [0], [1], [0, 0, 1, 1], [], []>} : vector<8x8xf32>, vector<8x100xf32>, vector<8x100xf32> -> vector<8x100xf32>
    %184 = arith.addf %179, %183 : vector<8x100xf32>
    %c0_210 = arith.constant 0 : index
    %c6_211 = arith.constant 6 : index
    %c0_212 = arith.constant 0 : index
    %c0_213 = arith.constant 0 : index
    %185 = vector.load %arg12[%c0_210, %c6_211, %c0_212, %c0_213] : memref<4x9x8x8xf32, #tpu.memory_space<vmem>>, vector<1x1x8x8xf32>
    %186 = vector.shape_cast %185 : vector<1x1x8x8xf32> to vector<8x8xf32>
    %c0_214 = arith.constant 0 : index
    %c21_215 = arith.constant 21 : index
    %187 = vector.load %arg17[%c0_214, %c21_215] : memref<8x128xf32, #tpu.memory_space<vmem>>, vector<8x100xf32>
    %cst_216 = arith.constant dense<0.000000e+00> : vector<8x100xf32>
    %188 = tpu.matmul %186, %187, %cst_216 {dimension_numbers = #tpu.dot_dimension_numbers<[1], [0], [0], [1], [0, 0, 1, 1], [], []>} : vector<8x8xf32>, vector<8x100xf32>, vector<8x100xf32> -> vector<8x100xf32>
    %189 = arith.addf %184, %188 : vector<8x100xf32>
    %c0_217 = arith.constant 0 : index
    %c7_218 = arith.constant 7 : index
    %c0_219 = arith.constant 0 : index
    %c0_220 = arith.constant 0 : index
    %190 = vector.load %arg12[%c0_217, %c7_218, %c0_219, %c0_220] : memref<4x9x8x8xf32, #tpu.memory_space<vmem>>, vector<1x1x8x8xf32>
    %191 = vector.shape_cast %190 : vector<1x1x8x8xf32> to vector<8x8xf32>
    %c0_221 = arith.constant 0 : index
    %c22_222 = arith.constant 22 : index
    %192 = vector.load %arg17[%c0_221, %c22_222] : memref<8x128xf32, #tpu.memory_space<vmem>>, vector<8x100xf32>
    %cst_223 = arith.constant dense<0.000000e+00> : vector<8x100xf32>
    %193 = tpu.matmul %191, %192, %cst_223 {dimension_numbers = #tpu.dot_dimension_numbers<[1], [0], [0], [1], [0, 0, 1, 1], [], []>} : vector<8x8xf32>, vector<8x100xf32>, vector<8x100xf32> -> vector<8x100xf32>
    %194 = arith.addf %189, %193 : vector<8x100xf32>
    %c0_224 = arith.constant 0 : index
    %c8_225 = arith.constant 8 : index
    %c0_226 = arith.constant 0 : index
    %c0_227 = arith.constant 0 : index
    %195 = vector.load %arg12[%c0_224, %c8_225, %c0_226, %c0_227] : memref<4x9x8x8xf32, #tpu.memory_space<vmem>>, vector<1x1x8x8xf32>
    %196 = vector.shape_cast %195 : vector<1x1x8x8xf32> to vector<8x8xf32>
    %c0_228 = arith.constant 0 : index
    %c23_229 = arith.constant 23 : index
    %197 = vector.load %arg17[%c0_228, %c23_229] : memref<8x128xf32, #tpu.memory_space<vmem>>, vector<8x100xf32>
    %cst_230 = arith.constant dense<0.000000e+00> : vector<8x100xf32>
    %198 = tpu.matmul %196, %197, %cst_230 {dimension_numbers = #tpu.dot_dimension_numbers<[1], [0], [0], [1], [0, 0, 1, 1], [], []>} : vector<8x8xf32>, vector<8x100xf32>, vector<8x100xf32> -> vector<8x100xf32>
    %199 = arith.addf %194, %198 : vector<8x100xf32>
    %200 = vector.broadcast %155 : vector<8x1xf32> to vector<8x100xf32>
    %201 = arith.addf %199, %200 : vector<8x100xf32>
    %cst_231 = arith.constant 0.000000e+00 : f32
    %202 = vector.broadcast %cst_231 : f32 to vector<8x100xf32>
    %203 = arith.maximumf %201, %202 : vector<8x100xf32>
    %c0_232 = arith.constant 0 : index
    %c0_233 = arith.constant 0 : index
    %c0_234 = arith.constant 0 : index
    %204 = vector.load %arg14[%c0_232, %c0_233, %c0_234] : memref<4x32x8xf32, #tpu.memory_space<vmem>>, vector<1x32x8xf32>
    %205 = vector.shape_cast %204 : vector<1x32x8xf32> to vector<32x8xf32>
    %cst_235 = arith.constant dense<0.000000e+00> : vector<32x100xf32>
    %206 = tpu.matmul %205, %203, %cst_235 {dimension_numbers = #tpu.dot_dimension_numbers<[1], [0], [0], [1], [0, 0, 1, 1], [], []>} : vector<32x8xf32>, vector<8x100xf32>, vector<32x100xf32> -> vector<32x100xf32>
    %207 = arith.addf %141, %206 : vector<32x100xf32>
    %c1_236 = arith.constant 1 : index
    %c0_237 = arith.constant 0 : index
    %208 = vector.load %arg15[%c1_236, %c0_237] : memref<5x1xf32, #tpu.memory_space<vmem>>, vector<1x1xf32>
    %cst_238 = arith.constant 0.000000e+00 : f32
    %209 = vector.broadcast %cst_238 : f32 to vector<32x100xf32>
    %210 = arith.cmpf oge, %207, %209 : vector<32x100xf32>
    %211 = vector.broadcast %208 : vector<1x1xf32> to vector<32x100xf32>
    %212 = arith.mulf %211, %207 : vector<32x100xf32>
    %213 = arith.select %210, %207, %212 : vector<32x100xi1>, vector<32x100xf32>
    %c1_239 = arith.constant 1 : index
    %c0_240 = arith.constant 0 : index
    %c0_241 = arith.constant 0 : index
    %214 = vector.load %arg10[%c1_239, %c0_240, %c0_241] : memref<4x8x32xf32, #tpu.memory_space<vmem>>, vector<1x8x32xf32>
    %215 = vector.shape_cast %214 : vector<1x8x32xf32> to vector<8x32xf32>
    %cst_242 = arith.constant dense<0.000000e+00> : vector<8x100xf32>
    %216 = tpu.matmul %215, %213, %cst_242 {dimension_numbers = #tpu.dot_dimension_numbers<[1], [0], [0], [1], [0, 0, 1, 1], [], []>} : vector<8x32xf32>, vector<32x100xf32>, vector<8x100xf32> -> vector<8x100xf32>
    %c1_243 = arith.constant 1 : index
    %c0_244 = arith.constant 0 : index
    %c0_245 = arith.constant 0 : index
    %217 = vector.load %arg11[%c1_243, %c0_244, %c0_245] : memref<4x8x1xf32, #tpu.memory_space<vmem>>, vector<1x8x1xf32>
    %218 = vector.shape_cast %217 : vector<1x8x1xf32> to vector<8x1xf32>
    %219 = vector.broadcast %218 : vector<8x1xf32> to vector<8x100xf32>
    %220 = arith.addf %216, %219 : vector<8x100xf32>
    %cst_246 = arith.constant 0.000000e+00 : f32
    %221 = vector.broadcast %cst_246 : f32 to vector<8x100xf32>
    %222 = arith.maximumf %220, %221 : vector<8x100xf32>
    %223 = vector.broadcast %0 : vector<1x100xf32> to vector<8x100xf32>
    %224 = arith.mulf %222, %223 : vector<8x100xf32>
    %c0_247 = arith.constant 0 : index
    %c12_248 = arith.constant 12 : index
    %225 = vector.load %arg17[%c0_247, %c12_248] : memref<8x128xf32, #tpu.memory_space<vmem>>, vector<8x100xf32>
    tpu.vector_store %arg17[%c0_247, %c12_248], %224 {strides = array<i32>} : memref<8x128xf32, #tpu.memory_space<vmem>>, vector<8x100xf32>,
    %c1_249 = arith.constant 1 : index
    %c0_250 = arith.constant 0 : index
    %c0_251 = arith.constant 0 : index
    %226 = vector.load %arg13[%c1_249, %c0_250, %c0_251] : memref<4x8x1xf32, #tpu.memory_space<vmem>>, vector<1x8x1xf32>
    %227 = vector.shape_cast %226 : vector<1x8x1xf32> to vector<8x1xf32>
    %c1_252 = arith.constant 1 : index
    %c0_253 = arith.constant 0 : index
    %c0_254 = arith.constant 0 : index
    %c0_255 = arith.constant 0 : index
    %228 = vector.load %arg12[%c1_252, %c0_253, %c0_254, %c0_255] : memref<4x9x8x8xf32, #tpu.memory_space<vmem>>, vector<1x1x8x8xf32>
    %229 = vector.shape_cast %228 : vector<1x1x8x8xf32> to vector<8x8xf32>
    %c0_256 = arith.constant 0 : index
    %c1_257 = arith.constant 1 : index
    %230 = vector.load %arg17[%c0_256, %c1_257] : memref<8x128xf32, #tpu.memory_space<vmem>>, vector<8x100xf32>
    %cst_258 = arith.constant dense<0.000000e+00> : vector<8x100xf32>
    %231 = tpu.matmul %229, %230, %cst_258 {dimension_numbers = #tpu.dot_dimension_numbers<[1], [0], [0], [1], [0, 0, 1, 1], [], []>} : vector<8x8xf32>, vector<8x100xf32>, vector<8x100xf32> -> vector<8x100xf32>
    %c1_259 = arith.constant 1 : index
    %c1_260 = arith.constant 1 : index
    %c0_261 = arith.constant 0 : index
    %c0_262 = arith.constant 0 : index
    %232 = vector.load %arg12[%c1_259, %c1_260, %c0_261, %c0_262] : memref<4x9x8x8xf32, #tpu.memory_space<vmem>>, vector<1x1x8x8xf32>
    %233 = vector.shape_cast %232 : vector<1x1x8x8xf32> to vector<8x8xf32>
    %c0_263 = arith.constant 0 : index
    %c2_264 = arith.constant 2 : index
    %234 = vector.load %arg17[%c0_263, %c2_264] : memref<8x128xf32, #tpu.memory_space<vmem>>, vector<8x100xf32>
    %cst_265 = arith.constant dense<0.000000e+00> : vector<8x100xf32>
    %235 = tpu.matmul %233, %234, %cst_265 {dimension_numbers = #tpu.dot_dimension_numbers<[1], [0], [0], [1], [0, 0, 1, 1], [], []>} : vector<8x8xf32>, vector<8x100xf32>, vector<8x100xf32> -> vector<8x100xf32>
    %236 = arith.addf %231, %235 : vector<8x100xf32>
    %c1_266 = arith.constant 1 : index
    %c2_267 = arith.constant 2 : index
    %c0_268 = arith.constant 0 : index
    %c0_269 = arith.constant 0 : index
    %237 = vector.load %arg12[%c1_266, %c2_267, %c0_268, %c0_269] : memref<4x9x8x8xf32, #tpu.memory_space<vmem>>, vector<1x1x8x8xf32>
    %238 = vector.shape_cast %237 : vector<1x1x8x8xf32> to vector<8x8xf32>
    %c0_270 = arith.constant 0 : index
    %c3_271 = arith.constant 3 : index
    %239 = vector.load %arg17[%c0_270, %c3_271] : memref<8x128xf32, #tpu.memory_space<vmem>>, vector<8x100xf32>
    %cst_272 = arith.constant dense<0.000000e+00> : vector<8x100xf32>
    %240 = tpu.matmul %238, %239, %cst_272 {dimension_numbers = #tpu.dot_dimension_numbers<[1], [0], [0], [1], [0, 0, 1, 1], [], []>} : vector<8x8xf32>, vector<8x100xf32>, vector<8x100xf32> -> vector<8x100xf32>
    %241 = arith.addf %236, %240 : vector<8x100xf32>
    %c1_273 = arith.constant 1 : index
    %c3_274 = arith.constant 3 : index
    %c0_275 = arith.constant 0 : index
    %c0_276 = arith.constant 0 : index
    %242 = vector.load %arg12[%c1_273, %c3_274, %c0_275, %c0_276] : memref<4x9x8x8xf32, #tpu.memory_space<vmem>>, vector<1x1x8x8xf32>
    %243 = vector.shape_cast %242 : vector<1x1x8x8xf32> to vector<8x8xf32>
    %c0_277 = arith.constant 0 : index
    %c11_278 = arith.constant 11 : index
    %244 = vector.load %arg17[%c0_277, %c11_278] : memref<8x128xf32, #tpu.memory_space<vmem>>, vector<8x100xf32>
    %cst_279 = arith.constant dense<0.000000e+00> : vector<8x100xf32>
    %245 = tpu.matmul %243, %244, %cst_279 {dimension_numbers = #tpu.dot_dimension_numbers<[1], [0], [0], [1], [0, 0, 1, 1], [], []>} : vector<8x8xf32>, vector<8x100xf32>, vector<8x100xf32> -> vector<8x100xf32>
    %246 = arith.addf %241, %245 : vector<8x100xf32>
    %c1_280 = arith.constant 1 : index
    %c4_281 = arith.constant 4 : index
    %c0_282 = arith.constant 0 : index
    %c0_283 = arith.constant 0 : index
    %247 = vector.load %arg12[%c1_280, %c4_281, %c0_282, %c0_283] : memref<4x9x8x8xf32, #tpu.memory_space<vmem>>, vector<1x1x8x8xf32>
    %248 = vector.shape_cast %247 : vector<1x1x8x8xf32> to vector<8x8xf32>
    %c0_284 = arith.constant 0 : index
    %c12_285 = arith.constant 12 : index
    %249 = vector.load %arg17[%c0_284, %c12_285] : memref<8x128xf32, #tpu.memory_space<vmem>>, vector<8x100xf32>
    %cst_286 = arith.constant dense<0.000000e+00> : vector<8x100xf32>
    %250 = tpu.matmul %248, %249, %cst_286 {dimension_numbers = #tpu.dot_dimension_numbers<[1], [0], [0], [1], [0, 0, 1, 1], [], []>} : vector<8x8xf32>, vector<8x100xf32>, vector<8x100xf32> -> vector<8x100xf32>
    %251 = arith.addf %246, %250 : vector<8x100xf32>
    %c1_287 = arith.constant 1 : index
    %c5_288 = arith.constant 5 : index
    %c0_289 = arith.constant 0 : index
    %c0_290 = arith.constant 0 : index
    %252 = vector.load %arg12[%c1_287, %c5_288, %c0_289, %c0_290] : memref<4x9x8x8xf32, #tpu.memory_space<vmem>>, vector<1x1x8x8xf32>
    %253 = vector.shape_cast %252 : vector<1x1x8x8xf32> to vector<8x8xf32>
    %c0_291 = arith.constant 0 : index
    %c13_292 = arith.constant 13 : index
    %254 = vector.load %arg17[%c0_291, %c13_292] : memref<8x128xf32, #tpu.memory_space<vmem>>, vector<8x100xf32>
    %cst_293 = arith.constant dense<0.000000e+00> : vector<8x100xf32>
    %255 = tpu.matmul %253, %254, %cst_293 {dimension_numbers = #tpu.dot_dimension_numbers<[1], [0], [0], [1], [0, 0, 1, 1], [], []>} : vector<8x8xf32>, vector<8x100xf32>, vector<8x100xf32> -> vector<8x100xf32>
    %256 = arith.addf %251, %255 : vector<8x100xf32>
    %c1_294 = arith.constant 1 : index
    %c6_295 = arith.constant 6 : index
    %c0_296 = arith.constant 0 : index
    %c0_297 = arith.constant 0 : index
    %257 = vector.load %arg12[%c1_294, %c6_295, %c0_296, %c0_297] : memref<4x9x8x8xf32, #tpu.memory_space<vmem>>, vector<1x1x8x8xf32>
    %258 = vector.shape_cast %257 : vector<1x1x8x8xf32> to vector<8x8xf32>
    %c0_298 = arith.constant 0 : index
    %c21_299 = arith.constant 21 : index
    %259 = vector.load %arg17[%c0_298, %c21_299] : memref<8x128xf32, #tpu.memory_space<vmem>>, vector<8x100xf32>
    %cst_300 = arith.constant dense<0.000000e+00> : vector<8x100xf32>
    %260 = tpu.matmul %258, %259, %cst_300 {dimension_numbers = #tpu.dot_dimension_numbers<[1], [0], [0], [1], [0, 0, 1, 1], [], []>} : vector<8x8xf32>, vector<8x100xf32>, vector<8x100xf32> -> vector<8x100xf32>
    %261 = arith.addf %256, %260 : vector<8x100xf32>
    %c1_301 = arith.constant 1 : index
    %c7_302 = arith.constant 7 : index
    %c0_303 = arith.constant 0 : index
    %c0_304 = arith.constant 0 : index
    %262 = vector.load %arg12[%c1_301, %c7_302, %c0_303, %c0_304] : memref<4x9x8x8xf32, #tpu.memory_space<vmem>>, vector<1x1x8x8xf32>
    %263 = vector.shape_cast %262 : vector<1x1x8x8xf32> to vector<8x8xf32>
    %c0_305 = arith.constant 0 : index
    %c22_306 = arith.constant 22 : index
    %264 = vector.load %arg17[%c0_305, %c22_306] : memref<8x128xf32, #tpu.memory_space<vmem>>, vector<8x100xf32>
    %cst_307 = arith.constant dense<0.000000e+00> : vector<8x100xf32>
    %265 = tpu.matmul %263, %264, %cst_307 {dimension_numbers = #tpu.dot_dimension_numbers<[1], [0], [0], [1], [0, 0, 1, 1], [], []>} : vector<8x8xf32>, vector<8x100xf32>, vector<8x100xf32> -> vector<8x100xf32>
    %266 = arith.addf %261, %265 : vector<8x100xf32>
    %c1_308 = arith.constant 1 : index
    %c8_309 = arith.constant 8 : index
    %c0_310 = arith.constant 0 : index
    %c0_311 = arith.constant 0 : index
    %267 = vector.load %arg12[%c1_308, %c8_309, %c0_310, %c0_311] : memref<4x9x8x8xf32, #tpu.memory_space<vmem>>, vector<1x1x8x8xf32>
    %268 = vector.shape_cast %267 : vector<1x1x8x8xf32> to vector<8x8xf32>
    %c0_312 = arith.constant 0 : index
    %c23_313 = arith.constant 23 : index
    %269 = vector.load %arg17[%c0_312, %c23_313] : memref<8x128xf32, #tpu.memory_space<vmem>>, vector<8x100xf32>
    %cst_314 = arith.constant dense<0.000000e+00> : vector<8x100xf32>
    %270 = tpu.matmul %268, %269, %cst_314 {dimension_numbers = #tpu.dot_dimension_numbers<[1], [0], [0], [1], [0, 0, 1, 1], [], []>} : vector<8x8xf32>, vector<8x100xf32>, vector<8x100xf32> -> vector<8x100xf32>
    %271 = arith.addf %266, %270 : vector<8x100xf32>
    %272 = vector.broadcast %227 : vector<8x1xf32> to vector<8x100xf32>
    %273 = arith.addf %271, %272 : vector<8x100xf32>
    %cst_315 = arith.constant 0.000000e+00 : f32
    %274 = vector.broadcast %cst_315 : f32 to vector<8x100xf32>
    %275 = arith.maximumf %273, %274 : vector<8x100xf32>
    %c1_316 = arith.constant 1 : index
    %c0_317 = arith.constant 0 : index
    %c0_318 = arith.constant 0 : index
    %276 = vector.load %arg14[%c1_316, %c0_317, %c0_318] : memref<4x32x8xf32, #tpu.memory_space<vmem>>, vector<1x32x8xf32>
    %277 = vector.shape_cast %276 : vector<1x32x8xf32> to vector<32x8xf32>
    %cst_319 = arith.constant dense<0.000000e+00> : vector<32x100xf32>
    %278 = tpu.matmul %277, %275, %cst_319 {dimension_numbers = #tpu.dot_dimension_numbers<[1], [0], [0], [1], [0, 0, 1, 1], [], []>} : vector<32x8xf32>, vector<8x100xf32>, vector<32x100xf32> -> vector<32x100xf32>
    %279 = arith.addf %213, %278 : vector<32x100xf32>
    %c2_320 = arith.constant 2 : index
    %c0_321 = arith.constant 0 : index
    %280 = vector.load %arg15[%c2_320, %c0_321] : memref<5x1xf32, #tpu.memory_space<vmem>>, vector<1x1xf32>
    %cst_322 = arith.constant 0.000000e+00 : f32
    %281 = vector.broadcast %cst_322 : f32 to vector<32x100xf32>
    %282 = arith.cmpf oge, %279, %281 : vector<32x100xf32>
    %283 = vector.broadcast %280 : vector<1x1xf32> to vector<32x100xf32>
    %284 = arith.mulf %283, %279 : vector<32x100xf32>
    %285 = arith.select %282, %279, %284 : vector<32x100xi1>, vector<32x100xf32>
    %c2_323 = arith.constant 2 : index
    %c0_324 = arith.constant 0 : index
    %c0_325 = arith.constant 0 : index
    %286 = vector.load %arg10[%c2_323, %c0_324, %c0_325] : memref<4x8x32xf32, #tpu.memory_space<vmem>>, vector<1x8x32xf32>
    %287 = vector.shape_cast %286 : vector<1x8x32xf32> to vector<8x32xf32>
    %cst_326 = arith.constant dense<0.000000e+00> : vector<8x100xf32>
    %288 = tpu.matmul %287, %285, %cst_326 {dimension_numbers = #tpu.dot_dimension_numbers<[1], [0], [0], [1], [0, 0, 1, 1], [], []>} : vector<8x32xf32>, vector<32x100xf32>, vector<8x100xf32> -> vector<8x100xf32>
    %c2_327 = arith.constant 2 : index
    %c0_328 = arith.constant 0 : index
    %c0_329 = arith.constant 0 : index
    %289 = vector.load %arg11[%c2_327, %c0_328, %c0_329] : memref<4x8x1xf32, #tpu.memory_space<vmem>>, vector<1x8x1xf32>
    %290 = vector.shape_cast %289 : vector<1x8x1xf32> to vector<8x1xf32>
    %291 = vector.broadcast %290 : vector<8x1xf32> to vector<8x100xf32>
    %292 = arith.addf %288, %291 : vector<8x100xf32>
    %cst_330 = arith.constant 0.000000e+00 : f32
    %293 = vector.broadcast %cst_330 : f32 to vector<8x100xf32>
    %294 = arith.maximumf %292, %293 : vector<8x100xf32>
    %295 = vector.broadcast %0 : vector<1x100xf32> to vector<8x100xf32>
    %296 = arith.mulf %294, %295 : vector<8x100xf32>
    %c0_331 = arith.constant 0 : index
    %c12_332 = arith.constant 12 : index
    %297 = vector.load %arg17[%c0_331, %c12_332] : memref<8x128xf32, #tpu.memory_space<vmem>>, vector<8x100xf32>
    tpu.vector_store %arg17[%c0_331, %c12_332], %296 {strides = array<i32>} : memref<8x128xf32, #tpu.memory_space<vmem>>, vector<8x100xf32>,
    %c2_333 = arith.constant 2 : index
    %c0_334 = arith.constant 0 : index
    %c0_335 = arith.constant 0 : index
    %298 = vector.load %arg13[%c2_333, %c0_334, %c0_335] : memref<4x8x1xf32, #tpu.memory_space<vmem>>, vector<1x8x1xf32>
    %299 = vector.shape_cast %298 : vector<1x8x1xf32> to vector<8x1xf32>
    %c2_336 = arith.constant 2 : index
    %c0_337 = arith.constant 0 : index
    %c0_338 = arith.constant 0 : index
    %c0_339 = arith.constant 0 : index
    %300 = vector.load %arg12[%c2_336, %c0_337, %c0_338, %c0_339] : memref<4x9x8x8xf32, #tpu.memory_space<vmem>>, vector<1x1x8x8xf32>
    %301 = vector.shape_cast %300 : vector<1x1x8x8xf32> to vector<8x8xf32>
    %c0_340 = arith.constant 0 : index
    %c1_341 = arith.constant 1 : index
    %302 = vector.load %arg17[%c0_340, %c1_341] : memref<8x128xf32, #tpu.memory_space<vmem>>, vector<8x100xf32>
    %cst_342 = arith.constant dense<0.000000e+00> : vector<8x100xf32>
    %303 = tpu.matmul %301, %302, %cst_342 {dimension_numbers = #tpu.dot_dimension_numbers<[1], [0], [0], [1], [0, 0, 1, 1], [], []>} : vector<8x8xf32>, vector<8x100xf32>, vector<8x100xf32> -> vector<8x100xf32>
    %c2_343 = arith.constant 2 : index
    %c1_344 = arith.constant 1 : index
    %c0_345 = arith.constant 0 : index
    %c0_346 = arith.constant 0 : index
    %304 = vector.load %arg12[%c2_343, %c1_344, %c0_345, %c0_346] : memref<4x9x8x8xf32, #tpu.memory_space<vmem>>, vector<1x1x8x8xf32>
    %305 = vector.shape_cast %304 : vector<1x1x8x8xf32> to vector<8x8xf32>
    %c0_347 = arith.constant 0 : index
    %c2_348 = arith.constant 2 : index
    %306 = vector.load %arg17[%c0_347, %c2_348] : memref<8x128xf32, #tpu.memory_space<vmem>>, vector<8x100xf32>
    %cst_349 = arith.constant dense<0.000000e+00> : vector<8x100xf32>
    %307 = tpu.matmul %305, %306, %cst_349 {dimension_numbers = #tpu.dot_dimension_numbers<[1], [0], [0], [1], [0, 0, 1, 1], [], []>} : vector<8x8xf32>, vector<8x100xf32>, vector<8x100xf32> -> vector<8x100xf32>
    %308 = arith.addf %303, %307 : vector<8x100xf32>
    %c2_350 = arith.constant 2 : index
    %c2_351 = arith.constant 2 : index
    %c0_352 = arith.constant 0 : index
    %c0_353 = arith.constant 0 : index
    %309 = vector.load %arg12[%c2_350, %c2_351, %c0_352, %c0_353] : memref<4x9x8x8xf32, #tpu.memory_space<vmem>>, vector<1x1x8x8xf32>
    %310 = vector.shape_cast %309 : vector<1x1x8x8xf32> to vector<8x8xf32>
    %c0_354 = arith.constant 0 : index
    %c3_355 = arith.constant 3 : index
    %311 = vector.load %arg17[%c0_354, %c3_355] : memref<8x128xf32, #tpu.memory_space<vmem>>, vector<8x100xf32>
    %cst_356 = arith.constant dense<0.000000e+00> : vector<8x100xf32>
    %312 = tpu.matmul %310, %311, %cst_356 {dimension_numbers = #tpu.dot_dimension_numbers<[1], [0], [0], [1], [0, 0, 1, 1], [], []>} : vector<8x8xf32>, vector<8x100xf32>, vector<8x100xf32> -> vector<8x100xf32>
    %313 = arith.addf %308, %312 : vector<8x100xf32>
    %c2_357 = arith.constant 2 : index
    %c3_358 = arith.constant 3 : index
    %c0_359 = arith.constant 0 : index
    %c0_360 = arith.constant 0 : index
    %314 = vector.load %arg12[%c2_357, %c3_358, %c0_359, %c0_360] : memref<4x9x8x8xf32, #tpu.memory_space<vmem>>, vector<1x1x8x8xf32>
    %315 = vector.shape_cast %314 : vector<1x1x8x8xf32> to vector<8x8xf32>
    %c0_361 = arith.constant 0 : index
    %c11_362 = arith.constant 11 : index
    %316 = vector.load %arg17[%c0_361, %c11_362] : memref<8x128xf32, #tpu.memory_space<vmem>>, vector<8x100xf32>
    %cst_363 = arith.constant dense<0.000000e+00> : vector<8x100xf32>
    %317 = tpu.matmul %315, %316, %cst_363 {dimension_numbers = #tpu.dot_dimension_numbers<[1], [0], [0], [1], [0, 0, 1, 1], [], []>} : vector<8x8xf32>, vector<8x100xf32>, vector<8x100xf32> -> vector<8x100xf32>
    %318 = arith.addf %313, %317 : vector<8x100xf32>
    %c2_364 = arith.constant 2 : index
    %c4_365 = arith.constant 4 : index
    %c0_366 = arith.constant 0 : index
    %c0_367 = arith.constant 0 : index
    %319 = vector.load %arg12[%c2_364, %c4_365, %c0_366, %c0_367] : memref<4x9x8x8xf32, #tpu.memory_space<vmem>>, vector<1x1x8x8xf32>
    %320 = vector.shape_cast %319 : vector<1x1x8x8xf32> to vector<8x8xf32>
    %c0_368 = arith.constant 0 : index
    %c12_369 = arith.constant 12 : index
    %321 = vector.load %arg17[%c0_368, %c12_369] : memref<8x128xf32, #tpu.memory_space<vmem>>, vector<8x100xf32>
    %cst_370 = arith.constant dense<0.000000e+00> : vector<8x100xf32>
    %322 = tpu.matmul %320, %321, %cst_370 {dimension_numbers = #tpu.dot_dimension_numbers<[1], [0], [0], [1], [0, 0, 1, 1], [], []>} : vector<8x8xf32>, vector<8x100xf32>, vector<8x100xf32> -> vector<8x100xf32>
    %323 = arith.addf %318, %322 : vector<8x100xf32>
    %c2_371 = arith.constant 2 : index
    %c5_372 = arith.constant 5 : index
    %c0_373 = arith.constant 0 : index
    %c0_374 = arith.constant 0 : index
    %324 = vector.load %arg12[%c2_371, %c5_372, %c0_373, %c0_374] : memref<4x9x8x8xf32, #tpu.memory_space<vmem>>, vector<1x1x8x8xf32>
    %325 = vector.shape_cast %324 : vector<1x1x8x8xf32> to vector<8x8xf32>
    %c0_375 = arith.constant 0 : index
    %c13_376 = arith.constant 13 : index
    %326 = vector.load %arg17[%c0_375, %c13_376] : memref<8x128xf32, #tpu.memory_space<vmem>>, vector<8x100xf32>
    %cst_377 = arith.constant dense<0.000000e+00> : vector<8x100xf32>
    %327 = tpu.matmul %325, %326, %cst_377 {dimension_numbers = #tpu.dot_dimension_numbers<[1], [0], [0], [1], [0, 0, 1, 1], [], []>} : vector<8x8xf32>, vector<8x100xf32>, vector<8x100xf32> -> vector<8x100xf32>
    %328 = arith.addf %323, %327 : vector<8x100xf32>
    %c2_378 = arith.constant 2 : index
    %c6_379 = arith.constant 6 : index
    %c0_380 = arith.constant 0 : index
    %c0_381 = arith.constant 0 : index
    %329 = vector.load %arg12[%c2_378, %c6_379, %c0_380, %c0_381] : memref<4x9x8x8xf32, #tpu.memory_space<vmem>>, vector<1x1x8x8xf32>
    %330 = vector.shape_cast %329 : vector<1x1x8x8xf32> to vector<8x8xf32>
    %c0_382 = arith.constant 0 : index
    %c21_383 = arith.constant 21 : index
    %331 = vector.load %arg17[%c0_382, %c21_383] : memref<8x128xf32, #tpu.memory_space<vmem>>, vector<8x100xf32>
    %cst_384 = arith.constant dense<0.000000e+00> : vector<8x100xf32>
    %332 = tpu.matmul %330, %331, %cst_384 {dimension_numbers = #tpu.dot_dimension_numbers<[1], [0], [0], [1], [0, 0, 1, 1], [], []>} : vector<8x8xf32>, vector<8x100xf32>, vector<8x100xf32> -> vector<8x100xf32>
    %333 = arith.addf %328, %332 : vector<8x100xf32>
    %c2_385 = arith.constant 2 : index
    %c7_386 = arith.constant 7 : index
    %c0_387 = arith.constant 0 : index
    %c0_388 = arith.constant 0 : index
    %334 = vector.load %arg12[%c2_385, %c7_386, %c0_387, %c0_388] : memref<4x9x8x8xf32, #tpu.memory_space<vmem>>, vector<1x1x8x8xf32>
    %335 = vector.shape_cast %334 : vector<1x1x8x8xf32> to vector<8x8xf32>
    %c0_389 = arith.constant 0 : index
    %c22_390 = arith.constant 22 : index
    %336 = vector.load %arg17[%c0_389, %c22_390] : memref<8x128xf32, #tpu.memory_space<vmem>>, vector<8x100xf32>
    %cst_391 = arith.constant dense<0.000000e+00> : vector<8x100xf32>
    %337 = tpu.matmul %335, %336, %cst_391 {dimension_numbers = #tpu.dot_dimension_numbers<[1], [0], [0], [1], [0, 0, 1, 1], [], []>} : vector<8x8xf32>, vector<8x100xf32>, vector<8x100xf32> -> vector<8x100xf32>
    %338 = arith.addf %333, %337 : vector<8x100xf32>
    %c2_392 = arith.constant 2 : index
    %c8_393 = arith.constant 8 : index
    %c0_394 = arith.constant 0 : index
    %c0_395 = arith.constant 0 : index
    %339 = vector.load %arg12[%c2_392, %c8_393, %c0_394, %c0_395] : memref<4x9x8x8xf32, #tpu.memory_space<vmem>>, vector<1x1x8x8xf32>
    %340 = vector.shape_cast %339 : vector<1x1x8x8xf32> to vector<8x8xf32>
    %c0_396 = arith.constant 0 : index
    %c23_397 = arith.constant 23 : index
    %341 = vector.load %arg17[%c0_396, %c23_397] : memref<8x128xf32, #tpu.memory_space<vmem>>, vector<8x100xf32>
    %cst_398 = arith.constant dense<0.000000e+00> : vector<8x100xf32>
    %342 = tpu.matmul %340, %341, %cst_398 {dimension_numbers = #tpu.dot_dimension_numbers<[1], [0], [0], [1], [0, 0, 1, 1], [], []>} : vector<8x8xf32>, vector<8x100xf32>, vector<8x100xf32> -> vector<8x100xf32>
    %343 = arith.addf %338, %342 : vector<8x100xf32>
    %344 = vector.broadcast %299 : vector<8x1xf32> to vector<8x100xf32>
    %345 = arith.addf %343, %344 : vector<8x100xf32>
    %cst_399 = arith.constant 0.000000e+00 : f32
    %346 = vector.broadcast %cst_399 : f32 to vector<8x100xf32>
    %347 = arith.maximumf %345, %346 : vector<8x100xf32>
    %c2_400 = arith.constant 2 : index
    %c0_401 = arith.constant 0 : index
    %c0_402 = arith.constant 0 : index
    %348 = vector.load %arg14[%c2_400, %c0_401, %c0_402] : memref<4x32x8xf32, #tpu.memory_space<vmem>>, vector<1x32x8xf32>
    %349 = vector.shape_cast %348 : vector<1x32x8xf32> to vector<32x8xf32>
    %cst_403 = arith.constant dense<0.000000e+00> : vector<32x100xf32>
    %350 = tpu.matmul %349, %347, %cst_403 {dimension_numbers = #tpu.dot_dimension_numbers<[1], [0], [0], [1], [0, 0, 1, 1], [], []>} : vector<32x8xf32>, vector<8x100xf32>, vector<32x100xf32> -> vector<32x100xf32>
    %351 = arith.addf %285, %350 : vector<32x100xf32>
    %c3_404 = arith.constant 3 : index
    %c0_405 = arith.constant 0 : index
    %352 = vector.load %arg15[%c3_404, %c0_405] : memref<5x1xf32, #tpu.memory_space<vmem>>, vector<1x1xf32>
    %cst_406 = arith.constant 0.000000e+00 : f32
    %353 = vector.broadcast %cst_406 : f32 to vector<32x100xf32>
    %354 = arith.cmpf oge, %351, %353 : vector<32x100xf32>
    %355 = vector.broadcast %352 : vector<1x1xf32> to vector<32x100xf32>
    %356 = arith.mulf %355, %351 : vector<32x100xf32>
    %357 = arith.select %354, %351, %356 : vector<32x100xi1>, vector<32x100xf32>
    %c3_407 = arith.constant 3 : index
    %c0_408 = arith.constant 0 : index
    %c0_409 = arith.constant 0 : index
    %358 = vector.load %arg10[%c3_407, %c0_408, %c0_409] : memref<4x8x32xf32, #tpu.memory_space<vmem>>, vector<1x8x32xf32>
    %359 = vector.shape_cast %358 : vector<1x8x32xf32> to vector<8x32xf32>
    %cst_410 = arith.constant dense<0.000000e+00> : vector<8x100xf32>
    %360 = tpu.matmul %359, %357, %cst_410 {dimension_numbers = #tpu.dot_dimension_numbers<[1], [0], [0], [1], [0, 0, 1, 1], [], []>} : vector<8x32xf32>, vector<32x100xf32>, vector<8x100xf32> -> vector<8x100xf32>
    %c3_411 = arith.constant 3 : index
    %c0_412 = arith.constant 0 : index
    %c0_413 = arith.constant 0 : index
    %361 = vector.load %arg11[%c3_411, %c0_412, %c0_413] : memref<4x8x1xf32, #tpu.memory_space<vmem>>, vector<1x8x1xf32>
    %362 = vector.shape_cast %361 : vector<1x8x1xf32> to vector<8x1xf32>
    %363 = vector.broadcast %362 : vector<8x1xf32> to vector<8x100xf32>
    %364 = arith.addf %360, %363 : vector<8x100xf32>
    %cst_414 = arith.constant 0.000000e+00 : f32
    %365 = vector.broadcast %cst_414 : f32 to vector<8x100xf32>
    %366 = arith.maximumf %364, %365 : vector<8x100xf32>
    %367 = vector.broadcast %0 : vector<1x100xf32> to vector<8x100xf32>
    %368 = arith.mulf %366, %367 : vector<8x100xf32>
    %c0_415 = arith.constant 0 : index
    %c12_416 = arith.constant 12 : index
    %369 = vector.load %arg17[%c0_415, %c12_416] : memref<8x128xf32, #tpu.memory_space<vmem>>, vector<8x100xf32>
    tpu.vector_store %arg17[%c0_415, %c12_416], %368 {strides = array<i32>} : memref<8x128xf32, #tpu.memory_space<vmem>>, vector<8x100xf32>,
    %c3_417 = arith.constant 3 : index
    %c0_418 = arith.constant 0 : index
    %c0_419 = arith.constant 0 : index
    %370 = vector.load %arg13[%c3_417, %c0_418, %c0_419] : memref<4x8x1xf32, #tpu.memory_space<vmem>>, vector<1x8x1xf32>
    %371 = vector.shape_cast %370 : vector<1x8x1xf32> to vector<8x1xf32>
    %c3_420 = arith.constant 3 : index
    %c0_421 = arith.constant 0 : index
    %c0_422 = arith.constant 0 : index
    %c0_423 = arith.constant 0 : index
    %372 = vector.load %arg12[%c3_420, %c0_421, %c0_422, %c0_423] : memref<4x9x8x8xf32, #tpu.memory_space<vmem>>, vector<1x1x8x8xf32>
    %373 = vector.shape_cast %372 : vector<1x1x8x8xf32> to vector<8x8xf32>
    %c0_424 = arith.constant 0 : index
    %c1_425 = arith.constant 1 : index
    %374 = vector.load %arg17[%c0_424, %c1_425] : memref<8x128xf32, #tpu.memory_space<vmem>>, vector<8x100xf32>
    %cst_426 = arith.constant dense<0.000000e+00> : vector<8x100xf32>
    %375 = tpu.matmul %373, %374, %cst_426 {dimension_numbers = #tpu.dot_dimension_numbers<[1], [0], [0], [1], [0, 0, 1, 1], [], []>} : vector<8x8xf32>, vector<8x100xf32>, vector<8x100xf32> -> vector<8x100xf32>
    %c3_427 = arith.constant 3 : index
    %c1_428 = arith.constant 1 : index
    %c0_429 = arith.constant 0 : index
    %c0_430 = arith.constant 0 : index
    %376 = vector.load %arg12[%c3_427, %c1_428, %c0_429, %c0_430] : memref<4x9x8x8xf32, #tpu.memory_space<vmem>>, vector<1x1x8x8xf32>
    %377 = vector.shape_cast %376 : vector<1x1x8x8xf32> to vector<8x8xf32>
    %c0_431 = arith.constant 0 : index
    %c2_432 = arith.constant 2 : index
    %378 = vector.load %arg17[%c0_431, %c2_432] : memref<8x128xf32, #tpu.memory_space<vmem>>, vector<8x100xf32>
    %cst_433 = arith.constant dense<0.000000e+00> : vector<8x100xf32>
    %379 = tpu.matmul %377, %378, %cst_433 {dimension_numbers = #tpu.dot_dimension_numbers<[1], [0], [0], [1], [0, 0, 1, 1], [], []>} : vector<8x8xf32>, vector<8x100xf32>, vector<8x100xf32> -> vector<8x100xf32>
    %380 = arith.addf %375, %379 : vector<8x100xf32>
    %c3_434 = arith.constant 3 : index
    %c2_435 = arith.constant 2 : index
    %c0_436 = arith.constant 0 : index
    %c0_437 = arith.constant 0 : index
    %381 = vector.load %arg12[%c3_434, %c2_435, %c0_436, %c0_437] : memref<4x9x8x8xf32, #tpu.memory_space<vmem>>, vector<1x1x8x8xf32>
    %382 = vector.shape_cast %381 : vector<1x1x8x8xf32> to vector<8x8xf32>
    %c0_438 = arith.constant 0 : index
    %c3_439 = arith.constant 3 : index
    %383 = vector.load %arg17[%c0_438, %c3_439] : memref<8x128xf32, #tpu.memory_space<vmem>>, vector<8x100xf32>
    %cst_440 = arith.constant dense<0.000000e+00> : vector<8x100xf32>
    %384 = tpu.matmul %382, %383, %cst_440 {dimension_numbers = #tpu.dot_dimension_numbers<[1], [0], [0], [1], [0, 0, 1, 1], [], []>} : vector<8x8xf32>, vector<8x100xf32>, vector<8x100xf32> -> vector<8x100xf32>
    %385 = arith.addf %380, %384 : vector<8x100xf32>
    %c3_441 = arith.constant 3 : index
    %c3_442 = arith.constant 3 : index
    %c0_443 = arith.constant 0 : index
    %c0_444 = arith.constant 0 : index
    %386 = vector.load %arg12[%c3_441, %c3_442, %c0_443, %c0_444] : memref<4x9x8x8xf32, #tpu.memory_space<vmem>>, vector<1x1x8x8xf32>
    %387 = vector.shape_cast %386 : vector<1x1x8x8xf32> to vector<8x8xf32>
    %c0_445 = arith.constant 0 : index
    %c11_446 = arith.constant 11 : index
    %388 = vector.load %arg17[%c0_445, %c11_446] : memref<8x128xf32, #tpu.memory_space<vmem>>, vector<8x100xf32>
    %cst_447 = arith.constant dense<0.000000e+00> : vector<8x100xf32>
    %389 = tpu.matmul %387, %388, %cst_447 {dimension_numbers = #tpu.dot_dimension_numbers<[1], [0], [0], [1], [0, 0, 1, 1], [], []>} : vector<8x8xf32>, vector<8x100xf32>, vector<8x100xf32> -> vector<8x100xf32>
    %390 = arith.addf %385, %389 : vector<8x100xf32>
    %c3_448 = arith.constant 3 : index
    %c4_449 = arith.constant 4 : index
    %c0_450 = arith.constant 0 : index
    %c0_451 = arith.constant 0 : index
    %391 = vector.load %arg12[%c3_448, %c4_449, %c0_450, %c0_451] : memref<4x9x8x8xf32, #tpu.memory_space<vmem>>, vector<1x1x8x8xf32>
    %392 = vector.shape_cast %391 : vector<1x1x8x8xf32> to vector<8x8xf32>
    %c0_452 = arith.constant 0 : index
    %c12_453 = arith.constant 12 : index
    %393 = vector.load %arg17[%c0_452, %c12_453] : memref<8x128xf32, #tpu.memory_space<vmem>>, vector<8x100xf32>
    %cst_454 = arith.constant dense<0.000000e+00> : vector<8x100xf32>
    %394 = tpu.matmul %392, %393, %cst_454 {dimension_numbers = #tpu.dot_dimension_numbers<[1], [0], [0], [1], [0, 0, 1, 1], [], []>} : vector<8x8xf32>, vector<8x100xf32>, vector<8x100xf32> -> vector<8x100xf32>
    %395 = arith.addf %390, %394 : vector<8x100xf32>
    %c3_455 = arith.constant 3 : index
    %c5_456 = arith.constant 5 : index
    %c0_457 = arith.constant 0 : index
    %c0_458 = arith.constant 0 : index
    %396 = vector.load %arg12[%c3_455, %c5_456, %c0_457, %c0_458] : memref<4x9x8x8xf32, #tpu.memory_space<vmem>>, vector<1x1x8x8xf32>
    %397 = vector.shape_cast %396 : vector<1x1x8x8xf32> to vector<8x8xf32>
    %c0_459 = arith.constant 0 : index
    %c13_460 = arith.constant 13 : index
    %398 = vector.load %arg17[%c0_459, %c13_460] : memref<8x128xf32, #tpu.memory_space<vmem>>, vector<8x100xf32>
    %cst_461 = arith.constant dense<0.000000e+00> : vector<8x100xf32>
    %399 = tpu.matmul %397, %398, %cst_461 {dimension_numbers = #tpu.dot_dimension_numbers<[1], [0], [0], [1], [0, 0, 1, 1], [], []>} : vector<8x8xf32>, vector<8x100xf32>, vector<8x100xf32> -> vector<8x100xf32>
    %400 = arith.addf %395, %399 : vector<8x100xf32>
    %c3_462 = arith.constant 3 : index
    %c6_463 = arith.constant 6 : index
    %c0_464 = arith.constant 0 : index
    %c0_465 = arith.constant 0 : index
    %401 = vector.load %arg12[%c3_462, %c6_463, %c0_464, %c0_465] : memref<4x9x8x8xf32, #tpu.memory_space<vmem>>, vector<1x1x8x8xf32>
    %402 = vector.shape_cast %401 : vector<1x1x8x8xf32> to vector<8x8xf32>
    %c0_466 = arith.constant 0 : index
    %c21_467 = arith.constant 21 : index
    %403 = vector.load %arg17[%c0_466, %c21_467] : memref<8x128xf32, #tpu.memory_space<vmem>>, vector<8x100xf32>
    %cst_468 = arith.constant dense<0.000000e+00> : vector<8x100xf32>
    %404 = tpu.matmul %402, %403, %cst_468 {dimension_numbers = #tpu.dot_dimension_numbers<[1], [0], [0], [1], [0, 0, 1, 1], [], []>} : vector<8x8xf32>, vector<8x100xf32>, vector<8x100xf32> -> vector<8x100xf32>
    %405 = arith.addf %400, %404 : vector<8x100xf32>
    %c3_469 = arith.constant 3 : index
    %c7_470 = arith.constant 7 : index
    %c0_471 = arith.constant 0 : index
    %c0_472 = arith.constant 0 : index
    %406 = vector.load %arg12[%c3_469, %c7_470, %c0_471, %c0_472] : memref<4x9x8x8xf32, #tpu.memory_space<vmem>>, vector<1x1x8x8xf32>
    %407 = vector.shape_cast %406 : vector<1x1x8x8xf32> to vector<8x8xf32>
    %c0_473 = arith.constant 0 : index
    %c22_474 = arith.constant 22 : index
    %408 = vector.load %arg17[%c0_473, %c22_474] : memref<8x128xf32, #tpu.memory_space<vmem>>, vector<8x100xf32>
    %cst_475 = arith.constant dense<0.000000e+00> : vector<8x100xf32>
    %409 = tpu.matmul %407, %408, %cst_475 {dimension_numbers = #tpu.dot_dimension_numbers<[1], [0], [0], [1], [0, 0, 1, 1], [], []>} : vector<8x8xf32>, vector<8x100xf32>, vector<8x100xf32> -> vector<8x100xf32>
    %410 = arith.addf %405, %409 : vector<8x100xf32>
    %c3_476 = arith.constant 3 : index
    %c8_477 = arith.constant 8 : index
    %c0_478 = arith.constant 0 : index
    %c0_479 = arith.constant 0 : index
    %411 = vector.load %arg12[%c3_476, %c8_477, %c0_478, %c0_479] : memref<4x9x8x8xf32, #tpu.memory_space<vmem>>, vector<1x1x8x8xf32>
    %412 = vector.shape_cast %411 : vector<1x1x8x8xf32> to vector<8x8xf32>
    %c0_480 = arith.constant 0 : index
    %c23_481 = arith.constant 23 : index
    %413 = vector.load %arg17[%c0_480, %c23_481] : memref<8x128xf32, #tpu.memory_space<vmem>>, vector<8x100xf32>
    %cst_482 = arith.constant dense<0.000000e+00> : vector<8x100xf32>
    %414 = tpu.matmul %412, %413, %cst_482 {dimension_numbers = #tpu.dot_dimension_numbers<[1], [0], [0], [1], [0, 0, 1, 1], [], []>} : vector<8x8xf32>, vector<8x100xf32>, vector<8x100xf32> -> vector<8x100xf32>
    %415 = arith.addf %410, %414 : vector<8x100xf32>
    %416 = vector.broadcast %371 : vector<8x1xf32> to vector<8x100xf32>
    %417 = arith.addf %415, %416 : vector<8x100xf32>
    %cst_483 = arith.constant 0.000000e+00 : f32
    %418 = vector.broadcast %cst_483 : f32 to vector<8x100xf32>
    %419 = arith.maximumf %417, %418 : vector<8x100xf32>
    %c3_484 = arith.constant 3 : index
    %c0_485 = arith.constant 0 : index
    %c0_486 = arith.constant 0 : index
    %420 = vector.load %arg14[%c3_484, %c0_485, %c0_486] : memref<4x32x8xf32, #tpu.memory_space<vmem>>, vector<1x32x8xf32>
    %421 = vector.shape_cast %420 : vector<1x32x8xf32> to vector<32x8xf32>
    %cst_487 = arith.constant dense<0.000000e+00> : vector<32x100xf32>
    %422 = tpu.matmul %421, %419, %cst_487 {dimension_numbers = #tpu.dot_dimension_numbers<[1], [0], [0], [1], [0, 0, 1, 1], [], []>} : vector<32x8xf32>, vector<8x100xf32>, vector<32x100xf32> -> vector<32x100xf32>
    %423 = arith.addf %357, %422 : vector<32x100xf32>
    %c4_488 = arith.constant 4 : index
    %c0_489 = arith.constant 0 : index
    %424 = vector.load %arg15[%c4_488, %c0_489] : memref<5x1xf32, #tpu.memory_space<vmem>>, vector<1x1xf32>
    %cst_490 = arith.constant 0.000000e+00 : f32
    %425 = vector.broadcast %cst_490 : f32 to vector<32x100xf32>
    %426 = arith.cmpf oge, %423, %425 : vector<32x100xf32>
    %427 = vector.broadcast %424 : vector<1x1xf32> to vector<32x100xf32>
    %428 = arith.mulf %427, %423 : vector<32x100xf32>
    %429 = arith.select %426, %423, %428 : vector<32x100xi1>, vector<32x100xf32>
    %c0_491 = arith.constant 0 : index
    %c0_492 = arith.constant 0 : index
    %c12_493 = arith.constant 12 : index
    %430 = vector.load %arg16[%c0_491, %c0_492, %c12_493] : memref<1x32x128xf32, #tpu.memory_space<vmem>>, vector<1x32x100xf32>
    %431 = vector.shape_cast %430 : vector<1x32x100xf32> to vector<32x100xf32>
    %432 = vector.shape_cast %429 : vector<32x100xf32> to vector<1x32x100xf32>
    tpu.vector_store %arg16[%c0_491, %c0_492, %c12_493], %432 {strides = array<i32>} : memref<1x32x128xf32, #tpu.memory_space<vmem>>, vector<1x32x100xf32>,
    return
  }
  func.func @transform_0(%arg0: i32) -> (i32, i32, i32, i32) {
    %c0_i32 = arith.constant 0 : i32
    %c0_i32_0 = arith.constant 0 : i32
    %c0_i32_1 = arith.constant 0 : i32
    %c0_i32_2 = arith.constant 0 : i32
    return %arg0, %c0_i32, %c0_i32_0, %c0_i32_1 : i32, i32, i32, i32
  }
  func.func @transform_1(%arg0: i32) -> (i32, i32) {
    %c0_i32 = arith.constant 0 : i32
    %c0_i32_0 = arith.constant 0 : i32
    %c0_i32_1 = arith.constant 0 : i32
    return %c0_i32, %c0_i32_0 : i32, i32
  }
  func.func @transform_2(%arg0: i32) -> (i32, i32, i32) {
    %c0_i32 = arith.constant 0 : i32
    %c0_i32_0 = arith.constant 0 : i32
    %c0_i32_1 = arith.constant 0 : i32
    %c0_i32_2 = arith.constant 0 : i32
    return %c0_i32, %c0_i32_0, %c0_i32_1 : i32, i32, i32
  }
  func.func @transform_3(%arg0: i32) -> (i32, i32) {
    %c0_i32 = arith.constant 0 : i32
    %c0_i32_0 = arith.constant 0 : i32
    %c0_i32_1 = arith.constant 0 : i32
    return %c0_i32, %c0_i32_0 : i32, i32
  }
  func.func @transform_4(%arg0: i32) -> (i32, i32, i32) {
    %c0_i32 = arith.constant 0 : i32
    %c0_i32_0 = arith.constant 0 : i32
    %c0_i32_1 = arith.constant 0 : i32
    %c0_i32_2 = arith.constant 0 : i32
    return %c0_i32, %c0_i32_0, %c0_i32_1 : i32, i32, i32
  }
  func.func @transform_5(%arg0: i32) -> (i32, i32) {
    %c0_i32 = arith.constant 0 : i32
    %c0_i32_0 = arith.constant 0 : i32
    %c0_i32_1 = arith.constant 0 : i32
    return %c0_i32, %c0_i32_0 : i32, i32
  }
  func.func @transform_6(%arg0: i32) -> (i32, i32) {
    %c0_i32 = arith.constant 0 : i32
    %c0_i32_0 = arith.constant 0 : i32
    %c0_i32_1 = arith.constant 0 : i32
    return %c0_i32, %c0_i32_0 : i32, i32
  }
  func.func @transform_7(%arg0: i32) -> (i32, i32) {
    %c0_i32 = arith.constant 0 : i32
    %c0_i32_0 = arith.constant 0 : i32
    %c0_i32_1 = arith.constant 0 : i32
    return %c0_i32, %c0_i32_0 : i32, i32
  }
  func.func @transform_8(%arg0: i32) -> (i32, i32) {
    %c0_i32 = arith.constant 0 : i32
    %c0_i32_0 = arith.constant 0 : i32
    %c0_i32_1 = arith.constant 0 : i32
    return %c0_i32, %c0_i32_0 : i32, i32
  }
  func.func @transform_9(%arg0: i32) -> (i32, i32, i32) {
    %c0_i32 = arith.constant 0 : i32
    %c0_i32_0 = arith.constant 0 : i32
    %c0_i32_1 = arith.constant 0 : i32
    %c0_i32_2 = arith.constant 0 : i32
    return %c0_i32, %c0_i32_0, %c0_i32_1 : i32, i32, i32
  }
  func.func @transform_10(%arg0: i32) -> (i32, i32, i32) {
    %c0_i32 = arith.constant 0 : i32
    %c0_i32_0 = arith.constant 0 : i32
    %c0_i32_1 = arith.constant 0 : i32
    %c0_i32_2 = arith.constant 0 : i32
    return %c0_i32, %c0_i32_0, %c0_i32_1 : i32, i32, i32
  }
  func.func @transform_11(%arg0: i32) -> (i32, i32, i32, i32) {
    %c0_i32 = arith.constant 0 : i32
    %c0_i32_0 = arith.constant 0 : i32
    %c0_i32_1 = arith.constant 0 : i32
    %c0_i32_2 = arith.constant 0 : i32
    %c0_i32_3 = arith.constant 0 : i32
    return %c0_i32, %c0_i32_0, %c0_i32_1, %c0_i32_2 : i32, i32, i32, i32
  }
  func.func @transform_12(%arg0: i32) -> (i32, i32, i32) {
    %c0_i32 = arith.constant 0 : i32
    %c0_i32_0 = arith.constant 0 : i32
    %c0_i32_1 = arith.constant 0 : i32
    %c0_i32_2 = arith.constant 0 : i32
    return %c0_i32, %c0_i32_0, %c0_i32_1 : i32, i32, i32
  }
  func.func @transform_13(%arg0: i32) -> (i32, i32, i32) {
    %c0_i32 = arith.constant 0 : i32
    %c0_i32_0 = arith.constant 0 : i32
    %c0_i32_1 = arith.constant 0 : i32
    %c0_i32_2 = arith.constant 0 : i32
    return %c0_i32, %c0_i32_0, %c0_i32_1 : i32, i32, i32
  }
  func.func @transform_14(%arg0: i32) -> (i32, i32) {
    %c0_i32 = arith.constant 0 : i32
    %c0_i32_0 = arith.constant 0 : i32
    %c0_i32_1 = arith.constant 0 : i32
    return %c0_i32, %c0_i32_0 : i32, i32
  }
  func.func @transform_15(%arg0: i32) -> (i32, i32, i32) {
    %c0_i32 = arith.constant 0 : i32
    %c0_i32_0 = arith.constant 0 : i32
    %c0_i32_1 = arith.constant 0 : i32
    return %arg0, %c0_i32, %c0_i32_0 : i32, i32, i32
  }
}

</mosaic_0001>

<bundles_post_ra>
// kernel: modified_bottleneck1_forward.1
= control target key start
LH: loop header
LB: loop body
LE: loop exit
PB: predicated region body
PF: predicated region fallthrough
CT: control target
= control target key end

     0   :  { %s7065_s18 = smov 0   ;;  %s7855_s0 = inlined_call_operand.vmem [shape: f32[2,4,16,128], index: 0, kind: input, shape index: {}]   ;;  %s7856_s1 = inlined_call_operand.vmem [shape: f32[1,100], index: 1, kind: input, shape index: {}]   ;;  %s7857_s2 = inlined_call_operand.vmem [shape: f32[9,4,16], index: 2, kind: input, shape index: {}]   ;;  %s7858_s3 = inlined_call_operand.vmem [shape: f32[4,1], index: 3, kind: input, shape index: {}]   ;;  %s7859_s4 = inlined_call_operand.vmem [shape: f32[9,4,4], index: 4, kind: input, shape index: {}]   ;;  %s7860_s5 = inlined_call_operand.vmem [shape: f32[4,1], index: 5, kind: input, shape index: {}]   ;;  %s7861_s6 = inlined_call_operand.vmem [shape: f32[32,4], index: 6, kind: input, shape index: {}]   ;;  %s7862_s7 = inlined_call_operand.vmem [shape: f32[32,16], index: 7, kind: input, shape index: {}]   ;;  %s7863_s8 = inlined_call_operand.vmem [shape: f32[32,1], index: 8, kind: input, shape index: {}]   ;;  %s7864_s9 = inlined_call_operand.vmem [shape: f32[4,8,32], index: 9, kind: input, shape index: {}]   ;;  %s7865_s10 = inlined_call_operand.vmem [shape: f32[4,8,1], index: 10, kind: input, shape index: {}]   ;;  %s7866_s11 = inlined_call_operand.vmem [shape: f32[4,9,8,8], index: 11, kind: input, shape index: {}]   ;;  %s7867_s12 = inlined_call_operand.vmem [shape: f32[4,8,1], index: 12, kind: input, shape index: {}]   ;;  %s7868_s13 = inlined_call_operand.vmem [shape: f32[4,32,8], index: 13, kind: input, shape index: {}]   ;;  %s7869_s14 = inlined_call_operand.vmem [shape: f32[5,1], index: 14, kind: input, shape index: {}]   ;;  %s7870_s15 = inlined_call_operand.vmem [shape: f32[2,32,128], index: 15, kind: output, shape index: {}]  }
   0x1   :  { %7891 = sst [smem:[#allocation3_spill]] %s7855_s0 }
   0x2   :  { %7892 = sst [smem:[#allocation4_spill]] %s7857_s2 }
   0x3   :  { %7893 = sst [smem:[#allocation5_spill]] %s7858_s3 }
   0x4   :  { %7894 = sst [smem:[#allocation6_spill]] %s7859_s4 }
   0x5   :  { %7895 = sst [smem:[#allocation7_spill]] %s7860_s5 }
   0x6 LB: > { %s6083_s19 = sadd.s32 4294967295, %s6969_s18   ;;  %p6087_p0 = scmp.ge.s32.totalorder %s6969_s18, 1  ;;  %s6969_s18 = sphi %s7065_s18, %s25_s18  }
   0x7   : > { %p437_p1 = scmp.lt.s32.totalorder %s6969_s18, 3 }
   0x9   : > { %p438_p2 = pnand %p6087_p0, %p437_p1 }
   0xa   : > { %p485_p3 = scmp.lt.s32.totalorder (!%p438_p2), %s6083_s19, 1  ;;  %v6971_v0 = vmov (!%p438_p2), 0.0|0.0   ;;  %vm6972_vm0 = vmmov (!%p438_p2), 0   ;;  %v6973_v1 = vmov (!%p438_p2), 0.0   ;;  %s7896_s0 = sld [smem:[#allocation3_spill]] (!%p438_p2)  ;;  %v6978_v14 = vmov (!%p438_p2), 0  }
   0xb   : > { %441 = sbr.rel (%p438_p2) target bundleno = 4877 (0x130d), region = 80  ;;  %6823 = vmatprep.subr.bf16.mxu0 (!%p438_p2), %v6971_v0  ;;  %6445 = vmatprep.mubr.msk.f32.mxu0 (!%p438_p2), %vm6972_vm0, %v6973_v1  ;;  %496 = vst [vmem:[#allocation2] sm:$0xff] (!%p438_p2), %v6973_v1  ;;  %s7885_s24 = smov (!%p438_p2), 126   ;;  %vm519_vm1 = vcmask (!%p438_p2), 130048   ;;  %vm1275_vm2 = vcmask (!%p438_p2), 912480   ;;  %vm1289_vm3 = vcmask (!%p438_p2), 1043456  }
   0xc   : > { %6826 = vmatprep.subr.bf16.mxu1 (!%p438_p2), %v6971_v0  ;;  %6452 = vmatprep.mubr.msk.f32.mxu1 (!%p438_p2), %vm6972_vm0, %v6973_v1  ;;  %s7887_s25 = smov (!%p438_p2), 127   ;;  %s7879_s26 = smov (!%p438_p2), 117   ;;  %vm1285_vm4 = vcmask (!%p438_p2), 31744   ;;  %vm2289_vm9 = vcmask (!%p438_p2), 261120   ;;  %vm2369_vm10 = vcmask (!%p438_p2), 916576   ;;  %vm2380_vm11 = vcmask (!%p438_p2), 64512  }
   0xd   : > { %s7883_s27 = smov (!%p438_p2), 116   ;;  %6955 = vset.pattern.permute.xlu1 (!%p438_p2), %v6978_v14  ;;  %6956 = vset.pattern.permute.xlu0 (!%p438_p2), %v6978_v14  ;;  %s7897_s3 = sld [smem:[#allocation5_spill]] (!%p438_p2) }
   0xe   : > { %s7898_s2 = sld [smem:[#allocation4_spill]] (!%p438_p2)  ;;  %s7889_s17 = smov (!%p438_p2), 12  }
   0xf   : > { %s7875_s21 = smov (!%p438_p2), 115   ;;  %s7871_s22 = smov (!%p438_p2), 106  }
  0x10   : > { %s7881_s28 = smov (!%p438_p2), 105   ;;  %s7899_s5 = sld [smem:[#allocation7_spill]] (!%p438_p2) }
  0x11   : > { %s7900_s4 = sld [smem:[#allocation6_spill]] (!%p438_p2)  ;;  %s7901_s30 = smov (!%p438_p2), 117  }
  0x12   : > { %s7912_s19 = smov (!%p485_p3, %s6083_s19), 1  ;;  %s7907_s16 = smov 105  }
  0x13   : > { %s6271_s20 = sshll.u32 %s7912_s19, 6  ;;  %v501_v15 = vld [vmem:[%s7897_s3] sm:$0xf] }
  0x14   : > { %s489_s23 = scalar_lea.vmem %s7896_s0, %s6271_s20  ;;  %v6094_v28 = vld [vmem:[%s7898_s2 + $0x4] sm:$0xf]  ;;  %v502_v37 = vld [vmem:[%s7898_s2] sm:$0xf]  ;;  %v6099_v38 = vld [vmem:[%s7898_s2 + $0x8] sm:$0xf] }
  0x15   : > { %v7086_v2 = vld [vmem:[%s489_s23 + $0x20] sm:$0xff]  ;;  %v7088_v3 = vld [vmem:[%s489_s23 + $0x28] sm:$0xff]  ;;  %v7090_v4 = vld [vmem:[%s489_s23 + $0x30] sm:$0xff]  ;;  %s7877_s20 = smov 125   ;;  %s7909_s0 = smov 127  }
  0x16   : > { %v6945_v5 = vpack.i.bf16 %v7088_v3, %v7086_v2  ;;  %v7094_v6 = vld [vmem:[%s489_s23 + $0x38] sm:$0xff]  ;;  %v7096_v7 = vld [vmem:[%s489_s23 + $0x10] sm:$0xff]  ;;  %v7106_v11 = vld [vmem:[%s489_s23] sm:$0xff] }
  0x17   : > { %v7098_v8 = vld [vmem:[%s489_s23 + $0x18] sm:$0xff]  ;;  %v6920_v9 = vpack.i.bf16 %v7094_v6, %v7090_v4  ;;  %v7108_v12 = vld [vmem:[%s489_s23 + $0x8] sm:$0xff]  ;;  %v6105_v48 = vld [vmem:[%s7898_s2 + $0x10] sm:$0xf]  ;;  %s7873_s23 = smov 107  }
  0x18   : > { %6911 = vrot.lane.b32.xlu0 %v6945_v5, %s7885_s24  ;;  %v6925_v10 = vpack.i.bf16 %v7098_v8, %v7096_v7  ;;  %v6930_v13 = vpack.i.bf16 %v7108_v12, %v7106_v11  ;;  %v6101_v47 = vld [vmem:[%s7898_s2 + $0xc] sm:$0xf]  ;;  %v6107_v56 = vld [vmem:[%s7898_s2 + $0x14] sm:$0xf]  ;;  %v6109_v57 = vld [vmem:[%s7898_s2 + $0x18] sm:$0xf] }
  0x19   : > { %6921 = vrot.lane.b32.xlu1 %v6920_v9, %s7885_s24  ;;  %v6111_v59 = vld [vmem:[%s7898_s2 + $0x1c] sm:$0xf]  ;;  %v6113_v60 = vld [vmem:[%s7898_s2 + $0x20] sm:$0xf]  ;;  %s7910_s2 = smov 126  }
  0x1c   : > { %6916 = vrot.lane.b32.xlu0 %v6920_v9, %s7887_s25 }
  0x1d   : > { %6926 = vrot.lane.b32.xlu1 %v6925_v10, %s7879_s26 }
  0x20   : > { %6931 = vrot.lane.b32.xlu0 %v6930_v13, %s7883_s27 }
  0x21   : > { %6936 = vrot.lane.b32.xlu1 %v6925_v10, %s7883_s27 }
  0x24   : > { %6941 = vrot.lane.b32.xlu0 %v6920_v9, %s7879_s26 }
  0x25   : > { %6946 = vrot.lane.b32.xlu1 %v6945_v5, %s7883_s27 }
  0x28   : > { %6951 = vrot.lane.b32.xlu0 %v6920_v9, %s7883_s27 }
  0x29   : > { %1259 = vperm.xlu1 %6955, %v501_v15  }
  0x8a   : > { %v6912_v16 = vpop.permute.xlu0 %6911 }
  0x8b   : > { %v6914_v17 = vunpack.i.h.bf16 %v6912_v16  ;;  %v6913_v18 = vunpack.i.l.bf16 %v6912_v16  ;;  %v6922_v19 = vpop.permute.xlu1 %6921 }
  0x8c   : > { %v6924_v20 = vunpack.i.h.bf16 %v6922_v19  ;;  %v6923_v21 = vunpack.i.l.bf16 %v6922_v19 }
  0x8d   : > { %v6824_v22 = vpack.c.bf16 %v6914_v17, %v6913_v18 }
  0x8e   : > { %v6917_v23 = vpop.permute.xlu0 %6916  ;;  %v6830_v24 = vpack.c.bf16 %v6924_v20, %v6923_v21 }
  0x8f   : > { %v6919_v25 = vunpack.i.h.bf16 %v6917_v23  ;;  %v6918_v26 = vunpack.i.l.bf16 %v6917_v23  ;;  %6825 = vmatpush3.bf16.msra.mxu0 %v6824_v22  ;;  %v6927_v27 = vpop.permute.xlu1 %6926 }
  0x90   : > { %6829 = vmatprep.subr.bf16.mxu0 %v6971_v0  ;;  %v6929_v29 = vunpack.i.h.bf16 %v6927_v27  ;;  %v6928_v30 = vunpack.i.l.bf16 %v6927_v27 }
  0x91   : > { %v6827_v31 = vpack.c.bf16 %v6919_v25, %v6918_v26 }
  0x92   : > { %6446 = vmatmul.mubr.msk.f32.vlgmr.msra.gmra.mrb[0].mxu0 %vm519_vm1, %v6094_v28  ;;  %v6932_v32 = vpop.permute.xlu0 %6931  ;;  %v6833_v33 = vpack.c.bf16 %v6929_v29, %v6928_v30 }
  0x93   : > { %6831 = vmatpush3.bf16.msra.mxu0 %v6830_v24  ;;  %v6934_v34 = vunpack.i.h.bf16 %v6932_v32  ;;  %v6933_v35 = vunpack.i.l.bf16 %v6932_v32  ;;  %6828 = vmatpush3.bf16.msra.mxu1 %v6827_v31  ;;  %v6937_v36 = vpop.permute.xlu1 %6936 }
  0x94   : > { %6459 = vmatprep.mubr.msk.f32.mxu0 %vm6972_vm0, %v6973_v1  ;;  %v6939_v39 = vunpack.i.h.bf16 %v6937_v36  ;;  %v6938_v40 = vunpack.i.l.bf16 %v6937_v36  ;;  %6832 = vmatprep.subr.bf16.mxu1 %v6971_v0 }
  0x95   : > { %v6836_v41 = vpack.c.bf16 %v6934_v34, %v6933_v35  ;;  %6835 = vmatprep.subr.bf16.mxu0 %v6971_v0  ;;  %v7188_v35 = vld [vmem:[%s7856_s1] ss:$0 sm:$0xff] }
  0x96   : > { %6453 = vmatmul.mubr.msk.f32.vlgmr.msra.gmra.mrb[0].mxu1 %vm519_vm1, %v502_v37  ;;  %6460 = vmatmul.mubr.msk.f32.vlgmr.msra.gmra.mrb[2].mxu0 %vm519_vm1, %v6099_v38  ;;  %v6942_v42 = vpop.permute.xlu0 %6941  ;;  %v6839_v43 = vpack.c.bf16 %v6939_v39, %v6938_v40  ;;  %v2114_v40 = vmax.f32 %v7106_v11, %v7096_v7 }
  0x97   : > { %v6944_v44 = vunpack.i.h.bf16 %v6942_v42  ;;  %v6943_v45 = vunpack.i.l.bf16 %v6942_v42  ;;  %6834 = vmatpush3.bf16.msra.mxu1 %v6833_v33  ;;  %6837 = vmatpush3.bf16.msra.mxu0 %v6836_v41  ;;  %v6947_v46 = vpop.permute.xlu1 %6946  ;;  %v2115_v41 = vmax.f32 %v7108_v12, %v7098_v8  ;;  %v2129_v12 = vld [vmem:[%s7863_s8 + $0x8] sm:$0xff] }
  0x98   : > { %6466 = vmatprep.mubr.msk.f32.mxu1 %vm6972_vm0, %v6973_v1  ;;  %v6949_v49 = vunpack.i.h.bf16 %v6947_v46  ;;  %v6948_v50 = vunpack.i.l.bf16 %v6947_v46  ;;  %6473 = vmatprep.mubr.msk.f32.mxu0 %vm6972_vm0, %v6973_v1  ;;  %v2118_v42 = vmax.f32 %v2114_v40, %v7086_v2  ;;  %v2128_v2 = vld [vmem:[%s7863_s8] sm:$0xff] }
  0x99   : > { %v6842_v51 = vpack.c.bf16 %v6944_v44, %v6943_v45  ;;  %6838 = vmatprep.subr.bf16.mxu1 %v6971_v0  ;;  %6841 = vmatprep.subr.bf16.mxu0 %v6971_v0  ;;  %v2131_v44 = vld [vmem:[%s7863_s8 + $0x18] sm:$0xff]  ;;  %v6116_v45 = vld [vmem:[%s7900_s4 + $0x4] sm:$0xf]  ;;  %v1278_v46 = vld [vmem:[%s7900_s4] sm:$0xf] }
  0x9a   : > { %6467 = vmatmul.mubr.msk.f32.vlgmr.msra.gmra.mrb[2].mxu1 %vm519_vm1, %v6101_v47  ;;  %v6952_v52 = vpop.permute.xlu0 %6951  ;;  %6474 = vmatmul.mubr.msk.f32.vlgmr.msra.gmra.mrb[4].mxu0 %vm519_vm1, %v6105_v48  ;;  %v6845_v53 = vpack.c.bf16 %v6949_v49, %v6948_v50  ;;  %v2122_v7 = vmax.f32 %v2118_v42, %v7090_v4  ;;  %v2283_v4 = vld [vmem:[%s7865_s10] sm:$0xff]  ;;  %v6121_v49 = vld [vmem:[%s7900_s4 + $0x8] sm:$0xf]  ;;  %v6124_v50 = vld [vmem:[%s7900_s4 + $0xc] sm:$0xf] }
  0x9b   : > { %v6954_v54 = vunpack.i.h.bf16 %v6952_v52  ;;  %v6953_v55 = vunpack.i.l.bf16 %v6952_v52  ;;  %6840 = vmatpush3.bf16.msra.mxu1 %v6839_v43  ;;  %6843 = vmatpush3.bf16.msra.mxu0 %v6842_v51  ;;  %v2119_v43 = vmax.f32 %v2115_v41, %v7088_v3  ;;  %v2130_v3 = vld [vmem:[%s7863_s8 + $0x10] sm:$0xff] }
  0x9c   : > { %6480 = vmatprep.mubr.msk.f32.mxu1 %vm6972_vm0, %v6973_v1  ;;  %6487 = vmatprep.mubr.msk.f32.mxu0 %vm6972_vm0, %v6973_v1 }
  0x9d   : > { %v6848_v58 = vpack.c.bf16 %v6954_v54, %v6953_v55  ;;  %6844 = vmatprep.subr.bf16.mxu1 %v6971_v0  ;;  %6847 = vmatprep.subr.bf16.mxu0 %v6971_v0  ;;  %v2123_v11 = vmax.f32 %v2119_v43, %v7094_v6  ;;  %v1277_v6 = vld [vmem:[%s7899_s5] sm:$0xf]  ;;  %v6130_v54 = vld [vmem:[%s7900_s4 + $0x14] sm:$0xf] }
  0x9e   : > { %6481 = vmatmul.mubr.msk.f32.vlgmr.msra.gmra.mrb[4].mxu1 %vm519_vm1, %v6107_v56  ;;  %6488 = vmatmul.mubr.msk.f32.vlgmr.msra.gmra.mrb[6].mxu0 %vm519_vm1, %v6109_v57  ;;  %v6133_v57 = vld [vmem:[%s7900_s4 + $0x18] sm:$0xf] }
  0x9f   : > { %6846 = vmatpush3.bf16.msra.mxu1 %v6845_v53  ;;  %6849 = vmatpush3.bf16.msra.mxu0 %v6848_v58  ;;  %v6957_v8 = vpack.i.bf16 %v2123_v11, %v2122_v7  ;;  %v6127_v53 = vld [vmem:[%s7900_s4 + $0x10] sm:$0xf]  ;;  %v6136_v58 = vld [vmem:[%s7900_s4 + $0x1c] sm:$0xf] }
  0xa0   : > { %6494 = vmatprep.mubr.msk.f32.mxu1 %vm6972_vm0, %v6973_v1  ;;  %6501 = vmatprep.mubr.msk.f32.mxu0 %vm6972_vm0, %v6973_v1 }
  0xa1   : > { %6504 = vmatprep.subr.mxu1 %v6973_v1  ;;  %6509 = vmatprep.subr.mxu0 %v6973_v1 }
  0xa2   : > { %6495 = vmatmul.mubr.msk.f32.vlgmr.msra.gmra.mrb[6].mxu1 %vm519_vm1, %v6111_v59  ;;  %6502 = vmatmul.mubr.msk.f32.vlgmr.msra.gmra.mrb[8].mxu0 %vm519_vm1, %v6113_v60 }
  0xa3   : > { %6506 = vmatprep.mubr.msk.f32.mxu1 %vm6972_vm0, %v6973_v1  ;;  %6511 = vmatprep.mubr.msk.f32.mxu0 %vm6972_vm0, %v6973_v1 }
  0xa8   : > { %v1260_v32 = vpop.permute.xlu1 %1259 }
 0x165   : > { %v589_v61 = vpop.f32.mrb[0].mxu0 }
 0x166   : > { %v6447_v62 = vpop.f32.mrb[1].mxu0 }
 0x169   : > { %v670_v63 = vpop.f32.mrb[0].mxu1  ;;  %v751_v5 = vpop.f32.mrb[2].mxu0 }
 0x16a   : > { %v671_v9 = vadd.f32 %v670_v63, %v589_v61  ;;  %v6454_v10 = vpop.f32.mrb[1].mxu1  ;;  %v6461_v13 = vpop.f32.mrb[3].mxu0  ;;  %v6139_v61 = vld [vmem:[%s7900_s4 + $0x20] sm:$0xf]  ;;  %s6272_s4 = sshll.u32 %s7912_s19, 5 }
 0x16b   : > { %v2124_v63 = vld [vmem:[%s7862_s7] sm:$0xff] }
 0x16c   : > { %v755_v14 = vadd.f32 %v751_v5, %v671_v9 }
 0x16d   : > { %v838_v15 = vpop.f32.mrb[2].mxu1  ;;  %v924_v16 = vpop.f32.mrb[4].mxu0 }
 0x16e   : > { %v842_v17 = vadd.f32 %v838_v15, %v755_v14  ;;  %v6468_v18 = vpop.f32.mrb[3].mxu1  ;;  %v6475_v19 = vpop.f32.mrb[5].mxu0  ;;  %v2125_v14 = vld [vmem:[%s7862_s7 + $0x8] sm:$0xff]  ;;  %v2126_v15 = vld [vmem:[%s7862_s7 + $0x10] sm:$0xff] }
 0x16f   : > { %v2265_v18 = vld [vmem:[%s7869_s14] sm:$0x1] }
 0x170   : > { %v928_v20 = vadd.f32 %v924_v16, %v842_v17  ;;  %v2127_v16 = vld [vmem:[%s7862_s7 + $0x18] sm:$0xff]  ;;  %v2006_v17 = vld [vmem:[%s7861_s6] sm:$0xff]  ;;  %6878 = vpush %v2265_v18 }
 0x171   : > { %v1006_v21 = vpop.f32.mrb[4].mxu1  ;;  %v1088_v22 = vpop.f32.mrb[6].mxu0 }
 0x172   : > { %v1010_v23 = vadd.f32 %v1006_v21, %v928_v20  ;;  %v6482_v24 = vpop.f32.mrb[5].mxu1  ;;  %v6489_v25 = vpop.f32.mrb[7].mxu0 }
 0x174   : > { %v1092_v26 = vadd.f32 %v1088_v22, %v1010_v23 }
 0x175   : > { %v1170_v27 = vpop.f32.mrb[6].mxu1  ;;  %v1252_v28 = vpop.f32.mrb[8].mxu0 }
 0x176   : > { %v1174_v29 = vadd.f32 %v1170_v27, %v1092_v26  ;;  %v6496_v30 = vpop.f32.mrb[7].mxu1  ;;  %v6503_v31 = vpop.f32.mrb[9].mxu0 }
 0x178   : > { %v1256_v33 = vadd.f32 %v1252_v28, %v1174_v29 }
 0x17a   : > { %v1262_v34 = vadd.f32 %v1260_v32, %v1256_v33 }
 0x17c   : > { %v1263_v36 = vmax.f32 %v1262_v34, 0.0 }
 0x17e   : > { %v1270_v37 = vmul.f32 %v7188_v35, %v1263_v36 }
 0x180   : > { %1272 = vrot.lane.b32.xlu0 %v1270_v37, %s7889_s17 }
 0x1f2   : > { %v1273_v38 = vpop.permute.xlu0 %1272 }
 0x1f3   : > { %1276 = vst.msk [vmem:[#allocation2] sm:$0xf] %vm1275_vm2, %v1273_v38 }
 0x1fa   : > { %v1279_v39 = vld [vmem:[#allocation2] sm:$0xf] }
 0x1fb   : > { %1362 = vrot.lane.b32.xlu0 %v1279_v39, %s7887_s25  ;;  %1283 = vrot.lane.b32.xlu1 %v1279_v39, %s7885_s24 }
 0x1ff   : > { %1521 = vrot.lane.b32.xlu0 %v1279_v39, %s7879_s26  ;;  %1441 = vrot.lane.b32.xlu1 %v1279_v39, %s7877_s20  ;;  %s7904_s26 = smov 116   ;;  %s7905_s20 = smov 106  }
 0x203   : > { %1681 = vrot.lane.b32.xlu0 %v1279_v39, %s7875_s21  ;;  %1601 = vrot.lane.b32.xlu1 %v1279_v39, %s7883_s27  ;;  %s7903_s21 = smov 115  }
 0x207   : > { %1841 = vrot.lane.b32.xlu0 %v1279_v39, %s7871_s22  ;;  %1761 = vrot.lane.b32.xlu1 %v1279_v39, %s7873_s23  ;;  %s7902_s22 = smov 125   ;;  %s7908_s23 = smov 12  }
 0x20b   : > { %1921 = vrot.lane.b32.xlu1 %v1279_v39, %s7881_s28  ;;  %2001 = vperm.xlu0 %6956, %v1277_v6   ;;  %v2008_v6 = vld [vmem:[%s7861_s6 + $0x10] sm:$0xff]  ;;  %s6879_s28 = spop %6878 }
 0x20f   : > { %6958 = vrot.lane.b32.xlu1 %v6957_v8, %s7883_s27  ;;  %2139 = vperm.xlu0 %6956, %v2129_v12   ;;  %v2009_v12 = vld [vmem:[%s7861_s6 + $0x18] sm:$0xff]  ;;  %s7906_s27 = smov 107  }
 0x213   : > { %2134 = vperm.xlu1 %6955, %v2128_v2   ;;  %2149 = vperm.xlu0 %6956, %v2131_v44  }
 0x217   : > { %2144 = vperm.xlu1 %6955, %v2130_v3  }
 0x21b   : > { %2286 = vperm.xlu1 %6955, %v2283_v4   ;;  %v2007_v4 = vld [vmem:[%s7861_s6 + $0x8] sm:$0xff] }
 0x26d   : > { %v1363_v47 = vpop.permute.xlu0 %1362  ;;  %v1284_v48 = vpop.permute.xlu1 %1283 }
 0x26e   : > { %6505 = vmatpush3.msk.msra.mxu1 %vm1289_vm3, %v1284_v48  ;;  %6510 = vmatpush3.msk.msra.mxu0 %vm1289_vm3, %v1363_v47 }
 0x26f   : > { %6507 = vmatmul.mubr.msk.f32.vlgmr.msra.gmra.mrb[8].mxu1 %vm1285_vm4, %v6116_v45  ;;  %6512 = vmatmul.mubr.msk.f32.vlgmr.msra.gmra.mrb[10].mxu0 %vm1285_vm4, %v1278_v46 }
 0x270   : > { %6519 = vmatprep.subr.mxu0 %v6973_v1  ;;  %6514 = vmatprep.subr.mxu1 %v6973_v1 }
 0x271   : > { %v1522_v51 = vpop.permute.xlu0 %1521  ;;  %v1442_v52 = vpop.permute.xlu1 %1441  ;;  %6516 = vmatprep.mubr.msk.f32.mxu1 %vm6972_vm0, %v6973_v1  ;;  %6521 = vmatprep.mubr.msk.f32.mxu0 %vm6972_vm0, %v6973_v1 }
 0x272   : > { %6515 = vmatpush3.msk.msra.mxu1 %vm1289_vm3, %v1442_v52  ;;  %6520 = vmatpush3.msk.msra.mxu0 %vm1289_vm3, %v1522_v51 }
 0x273   : > { %6517 = vmatmul.mubr.msk.f32.vlgmr.msra.gmra.mrb[10].mxu1 %vm1285_vm4, %v6121_v49  ;;  %6522 = vmatmul.mubr.msk.f32.vlgmr.msra.gmra.mrb[12].mxu0 %vm1285_vm4, %v6124_v50 }
 0x274   : > { %6529 = vmatprep.subr.mxu0 %v6973_v1  ;;  %6524 = vmatprep.subr.mxu1 %v6973_v1 }
 0x275   : > { %v1682_v55 = vpop.permute.xlu0 %1681  ;;  %v1602_v56 = vpop.permute.xlu1 %1601  ;;  %6526 = vmatprep.mubr.msk.f32.mxu1 %vm6972_vm0, %v6973_v1  ;;  %6531 = vmatprep.mubr.msk.f32.mxu0 %vm6972_vm0, %v6973_v1 }
 0x276   : > { %6525 = vmatpush3.msk.msra.mxu1 %vm1289_vm3, %v1602_v56  ;;  %6530 = vmatpush3.msk.msra.mxu0 %vm1289_vm3, %v1682_v55 }
 0x277   : > { %6527 = vmatmul.mubr.msk.f32.vlgmr.msra.gmra.mrb[12].mxu1 %vm1285_vm4, %v6127_v53  ;;  %6532 = vmatmul.mubr.msk.f32.vlgmr.msra.gmra.mrb[14].mxu0 %vm1285_vm4, %v6130_v54 }
 0x278   : > { %6539 = vmatprep.subr.mxu0 %v6973_v1  ;;  %6534 = vmatprep.subr.mxu1 %v6973_v1 }
 0x279   : > { %v1842_v59 = vpop.permute.xlu0 %1841  ;;  %v1762_v60 = vpop.permute.xlu1 %1761  ;;  %6536 = vmatprep.mubr.msk.f32.mxu1 %vm6972_vm0, %v6973_v1  ;;  %6541 = vmatprep.mubr.msk.f32.mxu0 %vm6972_vm0, %v6973_v1 }
 0x27a   : > { %6535 = vmatpush3.msk.msra.mxu1 %vm1289_vm3, %v1762_v60  ;;  %6540 = vmatpush3.msk.msra.mxu0 %vm1289_vm3, %v1842_v59  ;;  %v2272_v59 = vstv %s6879_s28 }
 0x27b   : > { %6537 = vmatmul.mubr.msk.f32.vlgmr.msra.gmra.mrb[14].mxu1 %vm1285_vm4, %v6133_v57  ;;  %6542 = vmatmul.mubr.msk.f32.vlgmr.msra.gmra.mrb[16].mxu0 %vm1285_vm4, %v6136_v58 }
 0x27c   : > { %6544 = vmatprep.subr.mxu1 %v6973_v1  ;;  %6546 = vmatprep.mubr.msk.f32.mxu1 %vm6972_vm0, %v6973_v1 }
 0x27d   : > { %v1922_v62 = vpop.permute.xlu1 %1921  ;;  %6551 = vmatprep.mubr.msk.f32.mxu0 %vm1285_vm4, %v2006_v17 }
 0x27e   : > { %6545 = vmatpush3.msk.msra.mxu1 %vm1289_vm3, %v1922_v62 }
 0x27f   : > { %6547 = vmatmul.mubr.msk.f32.vlgmr.msra.gmra.mrb[16].mxu1 %vm1285_vm4, %v6139_v61 }
 0x280   : > { %6561 = vmatprep.mubr.msk.f32.mxu1 %vm519_vm1, %v2124_v63 }
 0x281   : > { %v6959_v5 = vpop.permute.xlu1 %6958 }
 0x282   : > { %v6961_v9 = vunpack.i.h.bf16 %v6959_v5  ;;  %v6960_v10 = vunpack.i.l.bf16 %v6959_v5 }
 0x284   : > { %v6850_v13 = vpack.c.bf16 %v6961_v9, %v6960_v10 }
 0x286   : > { %6851 = vmatprep.subr.bf16.mxu1 %v6850_v13 }
 0x287   : > { %6853 = vmatpush3.bf16.msra.mxu1 %v6850_v13 }
 0x288   : > { %6578 = vmatprep.subr.mxu1 %v6973_v1 }
 0x28a   : > { %6562 = vmatmul.mubr.msk.f32.vlgmr.msra.gmra.mrb[18].mxu1 %vm519_vm1, %v2125_v14  ;;  %v2002_v8 = vpop.permute.xlu0 %2001 }
 0x28b   : > { %6564 = vmatprep.mubr.msk.f32.mxu1 %vm519_vm1, %v2126_v15 }
 0x28e   : > { %6565 = vmatmul.mubr.msk.f32.gmra.mrb[20].mxu1 %vm519_vm1, %v2127_v16  ;;  %v2140_v48 = vpop.permute.xlu0 %2139 }
 0x28f   : > { %6580 = vmatprep.mubr.msk.f32.mxu1 %vm6972_vm0, %v6973_v1 }
 0x292   : > { %v2135_v49 = vpop.permute.xlu1 %2134  ;;  %v2150_v52 = vpop.permute.xlu0 %2149 }
 0x296   : > { %v2145_v53 = vpop.permute.xlu1 %2144 }
 0x342   : > { %v1358_v19 = vpop.f32.mrb[8].mxu1  ;;  %v1435_v20 = vpop.f32.mrb[10].mxu0 }
 0x343   : > { %v1436_v21 = vadd.f32 %v1435_v20, %v1358_v19  ;;  %v6508_v22 = vpop.f32.mrb[9].mxu1  ;;  %v6513_v23 = vpop.f32.mrb[11].mxu0 }
 0x346   : > { %v1514_v24 = vpop.f32.mrb[10].mxu1  ;;  %v1594_v25 = vpop.f32.mrb[12].mxu0 }
 0x347   : > { %v1518_v26 = vadd.f32 %v1514_v24, %v1436_v21  ;;  %v6518_v27 = vpop.f32.mrb[11].mxu1  ;;  %v6523_v28 = vpop.f32.mrb[13].mxu0 }
 0x349   : > { %v1598_v29 = vadd.f32 %v1594_v25, %v1518_v26  ;;  %v2282_v25 = vld [vmem:[%s7864_s9] sm:$0xff]  ;;  %v2287_v26 = vpop.permute.xlu1 %2286 }
 0x34a   : > { %v1674_v30 = vpop.f32.mrb[12].mxu1  ;;  %v1754_v31 = vpop.f32.mrb[14].mxu0 }
 0x34b   : > { %v1678_v32 = vadd.f32 %v1674_v30, %v1598_v29  ;;  %v6528_v33 = vpop.f32.mrb[13].mxu1  ;;  %v6533_v34 = vpop.f32.mrb[15].mxu0 }
 0x34c   : > { %v2371_v34 = vld [vmem:[%s7867_s12] sm:$0xff] }
 0x34d   : > { %v1758_v36 = vadd.f32 %v1754_v31, %v1678_v32 }
 0x34e   : > { %v1834_v37 = vpop.f32.mrb[14].mxu1  ;;  %v1914_v38 = vpop.f32.mrb[16].mxu0 }
 0x34f   : > { %v1838_v39 = vadd.f32 %v1834_v37, %v1758_v36  ;;  %v6538_v40 = vpop.f32.mrb[15].mxu1  ;;  %v6543_v41 = vpop.f32.mrb[17].mxu0  ;;  %v6180_v36 = vld [vmem:[%s7865_s10 + $0x8] sm:$0xff] }
 0x350   : > { %v6158_v37 = vld [vmem:[%s7866_s11 + $0x8] sm:$0xff]  ;;  %v6161_v41 = vld [vmem:[%s7866_s11 + $0x10] sm:$0xff] }
 0x351   : > { %v1918_v42 = vadd.f32 %v1914_v38, %v1838_v39  ;;  %v2372_v38 = vld [vmem:[%s7866_s11] sm:$0xff] }
 0x352   : > { %v1994_v43 = vpop.f32.mrb[16].mxu1 }
 0x353   : > { %v1998_v7 = vadd.f32 %v1994_v43, %v1918_v42  ;;  %v6548_v11 = vpop.f32.mrb[17].mxu1  ;;  %v6163_v42 = vld [vmem:[%s7866_s11 + $0x18] sm:$0xff] }
 0x354   : > { %v6165_v11 = vld [vmem:[%s7866_s11 + $0x20] sm:$0xff] }
 0x355   : > { %v2004_v2 = vadd.f32 %v2002_v8, %v1998_v7  ;;  %v6167_v8 = vld [vmem:[%s7866_s11 + $0x28] sm:$0xff] }
 0x357   : > { %v2005_v3 = vmax.f32 %v2004_v2, 0.0 }
 0x359   : > { %6549 = vmatprep.subr.msk.mxu0 %vm1289_vm3, %v2005_v3 }
 0x35a   : > { %6550 = vmatpush3.msk.msra.mxu0 %vm1289_vm3, %v2005_v3 }
 0x35b   : > { %6552 = vmatmul.mubr.msk.f32.vlgmr.msra.gmra.mrb[18].mxu0 %vm1285_vm4, %v2007_v4  ;;  %6854 = vmatprep.subr.bf16.mxu0 %v6971_v0  ;;  %v6169_v4 = vld [vmem:[%s7866_s11 + $0x30] sm:$0xff] }
 0x35c   : > { %6554 = vmatprep.mubr.msk.f32.mxu0 %vm1285_vm4, %v2008_v6  ;;  %v6171_v6 = vld [vmem:[%s7866_s11 + $0x38] sm:$0xff] }
 0x35d   : > { %v6563_v44 = vpop.f32.mrb[18].mxu1 }
 0x35e   : > { %v2238_v45 = vpop.f32.mrb[19].mxu1  ;;  %v2244_v50 = vadd.f32 %v6563_v44, %v2140_v48  ;;  %v3195_v48 = vld [vmem:[%s7869_s14 + $0x1] sm:$0x1] }
 0x35f   : > { %6555 = vmatmul.mubr.msk.f32.gmra.mrb[20].mxu0 %vm1285_vm4, %v2009_v12  ;;  %v2239_v51 = vadd.f32 %v2238_v45, %v2135_v49  ;;  %v6173_v45 = vld [vmem:[%s7866_s11 + $0x40] sm:$0xff]  ;;  %6880 = vpush %v3195_v48  ;;  %v6182_v48 = vld [vmem:[%s7867_s12 + $0x8] sm:$0xff] }
 0x360   : > { %6575 = vmatprep.mubr.msk.f32.mxu0 %vm6972_vm0, %v6973_v1  ;;  %v2258_v54 = vmax.f32 %v2244_v50, 0.0 }
 0x361   : > { %v6566_v46 = vpop.f32.mrb[20].mxu1  ;;  %v2257_v56 = vmax.f32 %v2239_v51, 0.0 }
 0x362   : > { %v2248_v47 = vpop.f32.mrb[21].mxu1  ;;  %v2254_v55 = vadd.f32 %v6566_v46, %v2150_v52 }
 0x363   : > { %v2249_v57 = vadd.f32 %v2248_v47, %v2145_v53  ;;  %v3090_v47 = vld [vmem:[%s7868_s13] sm:$0xff] }
 0x364   : > { %v2260_v63 = vmax.f32 %v2254_v55, 0.0 }
 0x365   : > { %v2259_v9 = vmax.f32 %v2249_v57, 0.0 }
 0x42e   : > { %v6553_v58 = vpop.f32.mrb[18].mxu0 }
 0x42f   : > { %v2262_v60 = vadd.f32 %v6553_v58, %v2258_v54  ;;  %v2091_v61 = vpop.f32.mrb[19].mxu0 }
 0x430   : > { %v2261_v62 = vadd.f32 %v2257_v56, %v2091_v61 }
 0x431   : > { %vm2267_vm5 = vcmp.ge.f32.partialorder %v2262_v60, 0.0  ;;  %v2275_v5 = vmul.f32 %v2272_v59, %v2262_v60 }
 0x432   : > { %vm2266_vm6 = vcmp.ge.f32.partialorder %v2261_v62, 0.0  ;;  %v2274_v10 = vmul.f32 %v2272_v59, %v2261_v62  ;;  %v6556_v13 = vpop.f32.mrb[20].mxu0 }
 0x433   : > { %v2264_v14 = vadd.f32 %v6556_v13, %v2260_v63  ;;  %v2101_v15 = vpop.f32.mrb[21].mxu0  ;;  %v7337_v16 = vsel %vm2267_vm5, %v2262_v60, %v2275_v5 }
 0x434   : > { %v2263_v17 = vadd.f32 %v2259_v9, %v2101_v15  ;;  %v7339_v18 = vsel %vm2266_vm6, %v2261_v62, %v2274_v10 }
 0x435   : > { %vm2269_vm7 = vcmp.ge.f32.partialorder %v2264_v14, 0.0  ;;  %v2277_v19 = vmul.f32 %v2272_v59, %v2264_v14  ;;  %v6855_v20 = vpack.c.bf16 %v7337_v16, %v7339_v18 }
 0x436   : > { %vm2268_vm8 = vcmp.ge.f32.partialorder %v2263_v17, 0.0  ;;  %v2276_v21 = vmul.f32 %v2272_v59, %v2263_v17 }
 0x437   : > { %v7343_v22 = vsel %vm2269_vm7, %v2264_v14, %v2277_v19  ;;  %6856 = vmatpush3.bf16.msra.mxu0 %v6855_v20 }
 0x438   : > { %v7345_v23 = vsel %vm2268_vm8, %v2263_v17, %v2276_v21  ;;  %6857 = vmatprep.subr.bf16.mxu0 %v6971_v0 }
 0x439   : > { %v6858_v24 = vpack.c.bf16 %v7343_v22, %v7345_v23 }
 0x43b   : > { %6859 = vmatpush3.bf16.msra.mxu0 %v6858_v24 }
 0x43c   : > { %6583 = vmatprep.subr.mxu0 %v6973_v1 }
 0x43e   : > { %6576 = vmatmul.mubr.msk.f32.vlgmr.msra.gmra.mrb[22].mxu0 %vm2289_vm9, %v2282_v25 }
 0x43f   : > { %6585 = vmatprep.mubr.msk.f32.mxu0 %vm6972_vm0, %v6973_v1 }
 0x511   : > { %v2359_v27 = vpop.f32.mrb[22].mxu0 }
 0x512   : > { %v2360_v28 = vadd.f32 %v2359_v27, %v2287_v26  ;;  %v6577_v29 = vpop.f32.mrb[23].mxu0 }
 0x513   : > { %v3092_v29 = vld [vmem:[%s7868_s13 + $0x10] sm:$0xff] }
 0x514   : > { %v2363_v30 = vmax.f32 %v2360_v28, 0.0  ;;  %v3091_v28 = vld [vmem:[%s7868_s13 + $0x8] sm:$0xff] }
 0x516   : > { %v2364_v31 = vmul.f32 %v7188_v35, %v2363_v30  ;;  %v3093_v30 = vld [vmem:[%s7868_s13 + $0x18] sm:$0xff] }
 0x518   : > { %2366 = vrot.lane.b32.xlu0 %v2364_v31, %s7889_s17  ;;  %s7826_s17 = scalar_lea.vmem %s7870_s15, %s6272_s4 }
 0x519   : > { %498 = vst [vmem:[%s7826_s17 + $0x8] sm:$0xff] %v6973_v1  ;;  %497 = vst [vmem:[%s7826_s17] sm:$0xff] %v6973_v1 }
 0x51a   : > { %499 = vst [vmem:[%s7826_s17 + $0x10] sm:$0xff] %v6973_v1  ;;  %500 = vst [vmem:[%s7826_s17 + $0x18] sm:$0xff] %v6973_v1 }
 0x58a   : > { %v2367_v32 = vpop.permute.xlu0 %2366 }
 0x58b   : > { %2370 = vst.msk [vmem:[#allocation2] sm:$0xff] %vm2369_vm10, %v2367_v32 }
 0x592   : > { %v2373_v33 = vld [vmem:[#allocation2] sm:$0xff] }
 0x593   : > { %2454 = vrot.lane.b32.xlu0 %v2373_v33, %s7887_s25  ;;  %2377 = vrot.lane.b32.xlu1 %v2373_v33, %s7885_s24  ;;  %s6881_s24 = spop %6880 }
 0x594   : > { %v3202_v32 = vstv %s6881_s24 }
 0x597   : > { %2611 = vrot.lane.b32.xlu0 %v2373_v33, %s7901_s30  ;;  %2532 = vrot.lane.b32.xlu1 %v2373_v33, %s7902_s22 }
 0x59b   : > { %2769 = vrot.lane.b32.xlu0 %v2373_v33, %s7903_s21  ;;  %2690 = vrot.lane.b32.xlu1 %v2373_v33, %s7904_s26 }
 0x59f   : > { %2927 = vrot.lane.b32.xlu0 %v2373_v33, %s7905_s20  ;;  %2848 = vrot.lane.b32.xlu1 %v2373_v33, %s7906_s27 }
 0x5a3   : > { %3085 = vperm.xlu0 %6956, %v2371_v34   ;;  %3006 = vrot.lane.b32.xlu1 %v2373_v33, %s7907_s16 }
 0x5a7   : > { %3218 = vperm.xlu1 %6955, %v6180_v36  }
 0x605   : > { %v2455_v39 = vpop.permute.xlu0 %2454  ;;  %v2378_v40 = vpop.permute.xlu1 %2377 }
 0x606   : > { %6579 = vmatpush3.msra.mxu1 %v2378_v40  ;;  %6584 = vmatpush3.msra.mxu0 %v2455_v39 }
 0x607   : > { %6581 = vmatmul.mubr.msk.f32.vlgmr.msra.gmra.mrb[22].mxu1 %vm2380_vm11, %v6158_v37  ;;  %6586 = vmatmul.mubr.msk.f32.vlgmr.msra.gmra.mrb[24].mxu0 %vm2380_vm11, %v2372_v38 }
 0x608   : > { %6593 = vmatprep.subr.mxu0 %v6973_v1  ;;  %6588 = vmatprep.subr.mxu1 %v6973_v1 }
 0x609   : > { %v2612_v43 = vpop.permute.xlu0 %2611  ;;  %v2533_v7 = vpop.permute.xlu1 %2532  ;;  %6590 = vmatprep.mubr.msk.f32.mxu1 %vm6972_vm0, %v6973_v1  ;;  %6595 = vmatprep.mubr.msk.f32.mxu0 %vm6972_vm0, %v6973_v1 }
 0x60a   : > { %6589 = vmatpush3.msra.mxu1 %v2533_v7  ;;  %6594 = vmatpush3.msra.mxu0 %v2612_v43 }
 0x60b   : > { %6591 = vmatmul.mubr.msk.f32.vlgmr.msra.gmra.mrb[24].mxu1 %vm2380_vm11, %v6161_v41  ;;  %6596 = vmatmul.mubr.msk.f32.vlgmr.msra.gmra.mrb[26].mxu0 %vm2380_vm11, %v6163_v42 }
 0x60c   : > { %6603 = vmatprep.subr.mxu0 %v6973_v1  ;;  %6598 = vmatprep.subr.mxu1 %v6973_v1 }
 0x60d   : > { %v2770_v2 = vpop.permute.xlu0 %2769  ;;  %v2691_v3 = vpop.permute.xlu1 %2690  ;;  %6600 = vmatprep.mubr.msk.f32.mxu1 %vm6972_vm0, %v6973_v1  ;;  %6605 = vmatprep.mubr.msk.f32.mxu0 %vm6972_vm0, %v6973_v1 }
 0x60e   : > { %6599 = vmatpush3.msra.mxu1 %v2691_v3  ;;  %6604 = vmatpush3.msra.mxu0 %v2770_v2 }
 0x60f   : > { %6601 = vmatmul.mubr.msk.f32.vlgmr.msra.gmra.mrb[26].mxu1 %vm2380_vm11, %v6165_v11  ;;  %6606 = vmatmul.mubr.msk.f32.vlgmr.msra.gmra.mrb[28].mxu0 %vm2380_vm11, %v6167_v8 }
 0x610   : > { %6613 = vmatprep.subr.mxu0 %v6973_v1  ;;  %6608 = vmatprep.subr.mxu1 %v6973_v1 }
 0x611   : > { %v2928_v12 = vpop.permute.xlu0 %2927  ;;  %v2849_v44 = vpop.permute.xlu1 %2848  ;;  %6610 = vmatprep.mubr.msk.f32.mxu1 %vm6972_vm0, %v6973_v1  ;;  %6615 = vmatprep.mubr.msk.f32.mxu0 %vm6972_vm0, %v6973_v1 }
 0x612   : > { %6609 = vmatpush3.msra.mxu1 %v2849_v44  ;;  %6614 = vmatpush3.msra.mxu0 %v2928_v12 }
 0x613   : > { %6611 = vmatmul.mubr.msk.f32.vlgmr.msra.gmra.mrb[28].mxu1 %vm2380_vm11, %v6169_v4  ;;  %6616 = vmatmul.mubr.msk.f32.vlgmr.msra.gmra.mrb[30].mxu0 %vm2380_vm11, %v6171_v6 }
 0x614   : > { %6618 = vmatprep.subr.mxu1 %v6973_v1  ;;  %6620 = vmatprep.mubr.msk.f32.mxu1 %vm6972_vm0, %v6973_v1 }
 0x615   : > { %v3007_v46 = vpop.permute.xlu1 %3006  ;;  %6625 = vmatprep.mubr.msk.f32.mxu0 %vm2380_vm11, %v3090_v47 }
 0x616   : > { %6619 = vmatpush3.msra.mxu1 %v3007_v46 }
 0x617   : > { %6621 = vmatmul.mubr.msk.f32.vlgmr.msra.gmra.mrb[30].mxu1 %vm2380_vm11, %v6173_v45  ;;  %6860 = vmatprep.subr.bf16.mxu1 %v6971_v0 }
 0x618   : > { %6639 = vmatprep.mubr.msk.f32.mxu1 %vm6972_vm0, %v6973_v1 }
 0x622   : > { %v3086_v25 = vpop.permute.xlu0 %3085 }
 0x626   : > { %v3219_v3 = vpop.permute.xlu1 %3218 }
 0x6da   : > { %v2450_v49 = vpop.f32.mrb[22].mxu1  ;;  %v2526_v50 = vpop.f32.mrb[24].mxu0 }
 0x6db   : > { %v2527_v51 = vadd.f32 %v2526_v50, %v2450_v49  ;;  %v6582_v52 = vpop.f32.mrb[23].mxu1  ;;  %v6587_v53 = vpop.f32.mrb[25].mxu0  ;;  %v6210_v49 = vld [vmem:[%s7865_s10 + $0x10] sm:$0xff] }
 0x6dc   : > { %v6184_v50 = vld [vmem:[%s7866_s11 + $0x50] sm:$0xff] }
 0x6de   : > { %v2604_v54 = vpop.f32.mrb[24].mxu1  ;;  %v2683_v55 = vpop.f32.mrb[26].mxu0 }
 0x6df   : > { %v2608_v56 = vadd.f32 %v2604_v54, %v2527_v51  ;;  %v6592_v57 = vpop.f32.mrb[25].mxu1  ;;  %v6597_v58 = vpop.f32.mrb[27].mxu0  ;;  %v6183_v51 = vld [vmem:[%s7866_s11 + $0x48] sm:$0xff]  ;;  %v6187_v54 = vld [vmem:[%s7866_s11 + $0x58] sm:$0xff] }
 0x6e0   : > { %v6191_v58 = vld [vmem:[%s7866_s11 + $0x68] sm:$0xff] }
 0x6e1   : > { %v2687_v59 = vadd.f32 %v2683_v55, %v2608_v56  ;;  %v6189_v55 = vld [vmem:[%s7866_s11 + $0x60] sm:$0xff] }
 0x6e2   : > { %v2762_v60 = vpop.f32.mrb[26].mxu1  ;;  %v2841_v61 = vpop.f32.mrb[28].mxu0 }
 0x6e3   : > { %v2766_v62 = vadd.f32 %v2762_v60, %v2687_v59  ;;  %v6602_v63 = vpop.f32.mrb[27].mxu1  ;;  %v6607_v5 = vpop.f32.mrb[29].mxu0  ;;  %v6193_v59 = vld [vmem:[%s7866_s11 + $0x70] sm:$0xff] }
 0x6e4   : > { %v6197_v63 = vld [vmem:[%s7866_s11 + $0x80] sm:$0xff] }
 0x6e5   : > { %v2845_v9 = vadd.f32 %v2841_v61, %v2766_v62  ;;  %v6195_v62 = vld [vmem:[%s7866_s11 + $0x78] sm:$0xff] }
 0x6e6   : > { %v2920_v10 = vpop.f32.mrb[28].mxu1  ;;  %v2999_v13 = vpop.f32.mrb[30].mxu0 }
 0x6e7   : > { %v2924_v14 = vadd.f32 %v2920_v10, %v2845_v9  ;;  %v6612_v15 = vpop.f32.mrb[29].mxu1  ;;  %v6617_v17 = vpop.f32.mrb[31].mxu0  ;;  %v6199_v10 = vld [vmem:[%s7866_s11 + $0x88] sm:$0xff] }
 0x6e8   : > { %v4127_v15 = vld [vmem:[%s7869_s14 + $0x2] sm:$0x1] }
 0x6e9   : > { %v3003_v19 = vadd.f32 %v2999_v13, %v2924_v14  ;;  %v6201_v14 = vld [vmem:[%s7868_s13 + $0x20] sm:$0xff]  ;;  %6882 = vpush %v4127_v15  ;;  %v6240_v15 = vld [vmem:[%s7865_s10 + $0x18] sm:$0xff] }
 0x6ea   : > { %v3078_v20 = vpop.f32.mrb[30].mxu1 }
 0x6eb   : > { %v3082_v21 = vadd.f32 %v3078_v20, %v3003_v19  ;;  %v6622_v24 = vpop.f32.mrb[31].mxu1 }
 0x6ed   : > { %v3088_v26 = vadd.f32 %v3086_v25, %v3082_v21 }
 0x6ef   : > { %v3089_v27 = vmax.f32 %v3088_v26, 0.0 }
 0x6f1   : > { %6623 = vmatprep.subr.mxu0 %v3089_v27 }
 0x6f2   : > { %6624 = vmatpush3.msra.mxu0 %v3089_v27 }
 0x6f3   : > { %6626 = vmatmul.mubr.msk.f32.vlgmr.msra.gmra.mrb[32].mxu0 %vm2380_vm11, %v3091_v28  ;;  %6642 = vmatprep.subr.mxu0 %v6973_v1 }
 0x6f4   : > { %6628 = vmatprep.mubr.msk.f32.mxu0 %vm2380_vm11, %v3092_v29 }
 0x6f7   : > { %6629 = vmatmul.mubr.msk.f32.gmra.mrb[34].mxu0 %vm2380_vm11, %v3093_v30 }
 0x6f8   : > { %6644 = vmatprep.mubr.msk.f32.mxu0 %vm6972_vm0, %v6973_v1 }
 0x71a   : > { %s6883_s28 = spop %6882 }
 0x7c6   : > { %v6627_v31 = vpop.f32.mrb[32].mxu0 }
 0x7c7   : > { %v3192_v33 = vadd.f32 %v6627_v31, %v7337_v16  ;;  %v3172_v34 = vpop.f32.mrb[33].mxu0 }
 0x7c8   : > { %v3191_v36 = vadd.f32 %v3172_v34, %v7339_v18 }
 0x7c9   : > { %vm3197_vm12 = vcmp.ge.f32.partialorder %v3192_v33, 0.0  ;;  %v3205_v37 = vmul.f32 %v3202_v32, %v3192_v33 }
 0x7ca   : > { %vm3196_vm13 = vcmp.ge.f32.partialorder %v3191_v36, 0.0  ;;  %v3204_v38 = vmul.f32 %v3202_v32, %v3191_v36  ;;  %v6630_v39 = vpop.f32.mrb[34].mxu0 }
 0x7cb   : > { %v3194_v40 = vadd.f32 %v6630_v39, %v7343_v22  ;;  %v3182_v41 = vpop.f32.mrb[35].mxu0  ;;  %v7460_v42 = vsel %vm3197_vm12, %v3192_v33, %v3205_v37 }
 0x7cc   : > { %v3193_v43 = vadd.f32 %v3182_v41, %v7345_v23  ;;  %v7463_v7 = vsel %vm3196_vm13, %v3191_v36, %v3204_v38  ;;  %v6179_v23 = vld [vmem:[%s7864_s9 + $0x8] sm:$0xff] }
 0x7cd   : > { %vm3199_vm14 = vcmp.ge.f32.partialorder %v3194_v40, 0.0  ;;  %v3207_v11 = vmul.f32 %v3202_v32, %v3194_v40  ;;  %v6861_v16 = vpack.c.bf16 %v7460_v42, %v7463_v7 }
 0x7ce   : > { %vm3198_vm15 = vcmp.ge.f32.partialorder %v3193_v43, 0.0  ;;  %v3206_v18 = vmul.f32 %v3202_v32, %v3193_v43 }
 0x7cf   : > { %v7467_v8 = vsel %vm3199_vm14, %v3194_v40, %v3207_v11  ;;  %6862 = vmatpush3.bf16.msra.mxu1 %v6861_v16 }
 0x7d0   : > { %v7469_v2 = vsel %vm3198_vm15, %v3193_v43, %v3206_v18  ;;  %6863 = vmatprep.subr.bf16.mxu1 %v6971_v0 }
 0x7d1   : > { %v6864_v22 = vpack.c.bf16 %v7467_v8, %v7469_v2 }
 0x7d3   : > { %6865 = vmatpush3.bf16.msra.mxu1 %v6864_v22 }
 0x7d4   : > { %6647 = vmatprep.subr.mxu1 %v6973_v1 }
 0x7d6   : > { %6640 = vmatmul.mubr.msk.f32.vlgmr.msra.gmra.mrb[32].mxu1 %vm2289_vm9, %v6179_v23 }
 0x7d7   : > { %6649 = vmatprep.mubr.msk.f32.mxu1 %vm6972_vm0, %v6973_v1 }
 0x8a9   : > { %v3290_v4 = vpop.f32.mrb[32].mxu1 }
 0x8aa   : > { %v3291_v6 = vadd.f32 %v3290_v4, %v3219_v3  ;;  %v6641_v12 = vpop.f32.mrb[33].mxu1 }
 0x8ab   : > { %v6203_v12 = vld [vmem:[%s7868_s13 + $0x30] sm:$0xff] }
 0x8ac   : > { %v3294_v44 = vmax.f32 %v3291_v6, 0.0  ;;  %v6202_v6 = vld [vmem:[%s7868_s13 + $0x28] sm:$0xff] }
 0x8ae   : > { %v3295_v45 = vmul.f32 %v7188_v35, %v3294_v44  ;;  %v6204_v44 = vld [vmem:[%s7868_s13 + $0x38] sm:$0xff] }
 0x8b0   : > { %3297 = vrot.lane.b32.xlu0 %v3295_v45, %s7908_s23 }
 0x922   : > { %v3298_v46 = vpop.permute.xlu0 %3297 }
 0x923   : > { %3300 = vst.msk [vmem:[#allocation2] sm:$0xff] %vm2369_vm10, %v3298_v46  ;;  %v4134_v46 = vstv %s6883_s28 }
 0x92a   : > { %v3305_v47 = vld [vmem:[#allocation2] sm:$0xff] }
 0x92b   : > { %3385 = vrot.lane.b32.xlu0 %v3305_v47, %s7909_s0  ;;  %3309 = vrot.lane.b32.xlu1 %v3305_v47, %s7910_s2 }
 0x92f   : > { %3542 = vrot.lane.b32.xlu0 %v3305_v47, %s7901_s30  ;;  %3463 = vrot.lane.b32.xlu1 %v3305_v47, %s7902_s22 }
 0x933   : > { %3700 = vrot.lane.b32.xlu0 %v3305_v47, %s7903_s21  ;;  %3621 = vrot.lane.b32.xlu1 %v3305_v47, %s7904_s26 }
 0x937   : > { %3858 = vrot.lane.b32.xlu0 %v3305_v47, %s7905_s20  ;;  %3779 = vrot.lane.b32.xlu1 %v3305_v47, %s7906_s27 }
 0x93b   : > { %4016 = vperm.xlu0 %6956, %v6182_v48   ;;  %3937 = vrot.lane.b32.xlu1 %v3305_v47, %s7907_s16 }
 0x93f   : > { %4150 = vperm.xlu1 %6955, %v6210_v49  }
 0x99d   : > { %v3386_v52 = vpop.permute.xlu0 %3385  ;;  %v3310_v53 = vpop.permute.xlu1 %3309 }
 0x99e   : > { %6643 = vmatpush3.msra.mxu0 %v3310_v53  ;;  %6648 = vmatpush3.msra.mxu1 %v3386_v52 }
 0x99f   : > { %6645 = vmatmul.mubr.msk.f32.vlgmr.msra.gmra.mrb[36].mxu0 %vm2380_vm11, %v6184_v50  ;;  %6650 = vmatmul.mubr.msk.f32.vlgmr.msra.gmra.mrb[34].mxu1 %vm2380_vm11, %v6183_v51 }
 0x9a0   : > { %6657 = vmatprep.subr.mxu1 %v6973_v1  ;;  %6652 = vmatprep.subr.mxu0 %v6973_v1 }
 0x9a1   : > { %v3543_v56 = vpop.permute.xlu0 %3542  ;;  %v3464_v57 = vpop.permute.xlu1 %3463  ;;  %6654 = vmatprep.mubr.msk.f32.mxu0 %vm6972_vm0, %v6973_v1  ;;  %6659 = vmatprep.mubr.msk.f32.mxu1 %vm6972_vm0, %v6973_v1 }
 0x9a2   : > { %6653 = vmatpush3.msra.mxu0 %v3464_v57  ;;  %6658 = vmatpush3.msra.mxu1 %v3543_v56 }
 0x9a3   : > { %6655 = vmatmul.mubr.msk.f32.vlgmr.msra.gmra.mrb[38].mxu0 %vm2380_vm11, %v6187_v54  ;;  %6660 = vmatmul.mubr.msk.f32.vlgmr.msra.gmra.mrb[36].mxu1 %vm2380_vm11, %v6189_v55 }
 0x9a4   : > { %6667 = vmatprep.subr.mxu1 %v6973_v1  ;;  %6662 = vmatprep.subr.mxu0 %v6973_v1 }
 0x9a5   : > { %v3701_v60 = vpop.permute.xlu0 %3700  ;;  %v3622_v61 = vpop.permute.xlu1 %3621  ;;  %6664 = vmatprep.mubr.msk.f32.mxu0 %vm6972_vm0, %v6973_v1  ;;  %6669 = vmatprep.mubr.msk.f32.mxu1 %vm6972_vm0, %v6973_v1 }
 0x9a6   : > { %6663 = vmatpush3.msra.mxu0 %v3622_v61  ;;  %6668 = vmatpush3.msra.mxu1 %v3701_v60 }
 0x9a7   : > { %6665 = vmatmul.mubr.msk.f32.vlgmr.msra.gmra.mrb[40].mxu0 %vm2380_vm11, %v6191_v58  ;;  %6670 = vmatmul.mubr.msk.f32.vlgmr.msra.gmra.mrb[38].mxu1 %vm2380_vm11, %v6193_v59 }
 0x9a8   : > { %6677 = vmatprep.subr.mxu1 %v6973_v1  ;;  %6672 = vmatprep.subr.mxu0 %v6973_v1 }
 0x9a9   : > { %v3859_v5 = vpop.permute.xlu0 %3858  ;;  %v3780_v9 = vpop.permute.xlu1 %3779  ;;  %6674 = vmatprep.mubr.msk.f32.mxu0 %vm6972_vm0, %v6973_v1  ;;  %6679 = vmatprep.mubr.msk.f32.mxu1 %vm6972_vm0, %v6973_v1 }
 0x9aa   : > { %6673 = vmatpush3.msra.mxu0 %v3780_v9  ;;  %6678 = vmatpush3.msra.mxu1 %v3859_v5 }
 0x9ab   : > { %6675 = vmatmul.mubr.msk.f32.vlgmr.msra.gmra.mrb[42].mxu0 %vm2380_vm11, %v6195_v62  ;;  %6680 = vmatmul.mubr.msk.f32.vlgmr.msra.gmra.mrb[40].mxu1 %vm2380_vm11, %v6197_v63 }
 0x9ac   : > { %6682 = vmatprep.subr.mxu0 %v6973_v1  ;;  %6684 = vmatprep.mubr.msk.f32.mxu0 %vm6972_vm0, %v6973_v1 }
 0x9ad   : > { %v3938_v13 = vpop.permute.xlu1 %3937  ;;  %6689 = vmatprep.mubr.msk.f32.mxu1 %vm2380_vm11, %v6201_v14 }
 0x9ae   : > { %6683 = vmatpush3.msra.mxu0 %v3938_v13 }
 0x9af   : > { %6685 = vmatmul.mubr.msk.f32.vlgmr.msra.gmra.mrb[44].mxu0 %vm2380_vm11, %v6199_v10  ;;  %6866 = vmatprep.subr.bf16.mxu0 %v6971_v0 }
 0x9b0   : > { %6703 = vmatprep.mubr.msk.f32.mxu0 %vm6972_vm0, %v6973_v1 }
 0x9ba   : > { %v4017_v23 = vpop.permute.xlu0 %4016 }
 0x9be   : > { %v4151_v61 = vpop.permute.xlu1 %4150 }
 0xa72   : > { %v3381_v17 = vpop.f32.mrb[36].mxu0  ;;  %v3457_v19 = vpop.f32.mrb[34].mxu1 }
 0xa73   : > { %v3458_v20 = vadd.f32 %v3457_v19, %v3381_v17  ;;  %v6646_v21 = vpop.f32.mrb[37].mxu0  ;;  %v6651_v24 = vpop.f32.mrb[35].mxu1  ;;  %v6214_v17 = vld [vmem:[%s7866_s11 + $0x98] sm:$0xff]  ;;  %v6213_v19 = vld [vmem:[%s7866_s11 + $0x90] sm:$0xff] }
 0xa74   : > { %v6217_v24 = vld [vmem:[%s7866_s11 + $0xa0] sm:$0xff] }
 0xa76   : > { %v3535_v25 = vpop.f32.mrb[38].mxu0  ;;  %v3614_v26 = vpop.f32.mrb[36].mxu1 }
 0xa77   : > { %v3539_v27 = vadd.f32 %v3535_v25, %v3458_v20  ;;  %v6656_v28 = vpop.f32.mrb[39].mxu0  ;;  %v6661_v29 = vpop.f32.mrb[37].mxu1  ;;  %v6219_v25 = vld [vmem:[%s7866_s11 + $0xa8] sm:$0xff] }
 0xa78   : > { %v6221_v28 = vld [vmem:[%s7866_s11 + $0xb0] sm:$0xff]  ;;  %v6223_v29 = vld [vmem:[%s7866_s11 + $0xb8] sm:$0xff] }
 0xa79   : > { %v3618_v30 = vadd.f32 %v3614_v26, %v3539_v27 }
 0xa7a   : > { %v3693_v31 = vpop.f32.mrb[40].mxu0  ;;  %v3772_v32 = vpop.f32.mrb[38].mxu1 }
 0xa7b   : > { %v3697_v33 = vadd.f32 %v3693_v31, %v3618_v30  ;;  %v6666_v34 = vpop.f32.mrb[41].mxu0  ;;  %v6671_v36 = vpop.f32.mrb[39].mxu1 }
 0xa7d   : > { %v3776_v37 = vadd.f32 %v3772_v32, %v3697_v33  ;;  %v6225_v32 = vld [vmem:[%s7866_s11 + $0xc0] sm:$0xff]  ;;  %v6227_v33 = vld [vmem:[%s7866_s11 + $0xc8] sm:$0xff] }
 0xa7e   : > { %v3851_v38 = vpop.f32.mrb[42].mxu0  ;;  %v3930_v39 = vpop.f32.mrb[40].mxu1 }
 0xa7f   : > { %v3855_v40 = vadd.f32 %v3851_v38, %v3776_v37  ;;  %v6676_v41 = vpop.f32.mrb[43].mxu0  ;;  %v6681_v43 = vpop.f32.mrb[41].mxu1  ;;  %v6229_v37 = vld [vmem:[%s7866_s11 + $0xd0] sm:$0xff] }
 0xa81   : > { %v3934_v11 = vadd.f32 %v3930_v39, %v3855_v40  ;;  %v6231_v39 = vld [vmem:[%s7868_s13 + $0x40] sm:$0xff] }
 0xa82   : > { %v4009_v16 = vpop.f32.mrb[44].mxu0  ;;  %v5059_v40 = vld [vmem:[%s7869_s14 + $0x3] sm:$0x1] }
 0xa83   : > { %v4013_v18 = vadd.f32 %v4009_v16, %v3934_v11  ;;  %v6686_v22 = vpop.f32.mrb[45].mxu0  ;;  %6884 = vpush %v5059_v40  ;;  %v6244_v40 = vld [vmem:[%s7866_s11 + $0xe0] sm:$0xff] }
 0xa85   : > { %v4019_v3 = vadd.f32 %v4017_v23, %v4013_v18 }
 0xa87   : > { %v4020_v4 = vmax.f32 %v4019_v3, 0.0 }
 0xa89   : > { %6687 = vmatprep.subr.mxu1 %v4020_v4 }
 0xa8a   : > { %6688 = vmatpush3.msra.mxu1 %v4020_v4 }
 0xa8b   : > { %6690 = vmatmul.mubr.msk.f32.vlgmr.msra.gmra.mrb[42].mxu1 %vm2380_vm11, %v6202_v6  ;;  %6706 = vmatprep.subr.mxu1 %v6973_v1 }
 0xa8c   : > { %6692 = vmatprep.mubr.msk.f32.mxu1 %vm2380_vm11, %v6203_v12 }
 0xa8f   : > { %6693 = vmatmul.mubr.msk.f32.gmra.mrb[44].mxu1 %vm2380_vm11, %v6204_v44 }
 0xa90   : > { %6708 = vmatprep.mubr.msk.f32.mxu1 %vm6972_vm0, %v6973_v1 }
 0xab4   : > { %s6885_s24 = spop %6884 }
 0xb5e   : > { %v6691_v45 = vpop.f32.mrb[42].mxu1 }
 0xb5f   : > { %v4124_v47 = vadd.f32 %v6691_v45, %v7460_v42  ;;  %v4104_v48 = vpop.f32.mrb[43].mxu1 }
 0xb60   : > { %v4123_v49 = vadd.f32 %v4104_v48, %v7463_v7 }
 0xb61   : > { %vm4129_vm1 = vcmp.ge.f32.partialorder %v4124_v47, 0.0  ;;  %v4137_v50 = vmul.f32 %v4134_v46, %v4124_v47 }
 0xb62   : > { %vm4128_vm2 = vcmp.ge.f32.partialorder %v4123_v49, 0.0  ;;  %v4136_v51 = vmul.f32 %v4134_v46, %v4123_v49  ;;  %v6694_v52 = vpop.f32.mrb[44].mxu1 }
 0xb63   : > { %v4126_v53 = vadd.f32 %v6694_v52, %v7467_v8  ;;  %v4114_v54 = vpop.f32.mrb[45].mxu1  ;;  %v7584_v55 = vsel %vm4129_vm1, %v4124_v47, %v4137_v50 }
 0xb64   : > { %v4125_v56 = vadd.f32 %v4114_v54, %v7469_v2  ;;  %v7587_v57 = vsel %vm4128_vm2, %v4123_v49, %v4136_v51  ;;  %v6209_v2 = vld [vmem:[%s7864_s9 + $0x10] sm:$0xff] }
 0xb65   : > { %vm4131_vm3 = vcmp.ge.f32.partialorder %v4126_v53, 0.0  ;;  %v4139_v58 = vmul.f32 %v4134_v46, %v4126_v53  ;;  %v6867_v42 = vpack.c.bf16 %v7584_v55, %v7587_v57 }
 0xb66   : > { %vm4130_vm4 = vcmp.ge.f32.partialorder %v4125_v56, 0.0  ;;  %v4138_v7 = vmul.f32 %v4134_v46, %v4125_v56 }
 0xb67   : > { %v7591_v59 = vsel %vm4131_vm3, %v4126_v53, %v4139_v58  ;;  %6868 = vmatpush3.bf16.msra.mxu0 %v6867_v42 }
 0xb68   : > { %v7593_v60 = vsel %vm4130_vm4, %v4125_v56, %v4138_v7  ;;  %6869 = vmatprep.subr.bf16.mxu0 %v6971_v0 }
 0xb69   : > { %v6870_v8 = vpack.c.bf16 %v7591_v59, %v7593_v60 }
 0xb6b   : > { %6871 = vmatpush3.bf16.msra.mxu0 %v6870_v8 }
 0xb6c   : > { %6711 = vmatprep.subr.mxu0 %v6973_v1 }
 0xb6e   : > { %6704 = vmatmul.mubr.msk.f32.vlgmr.msra.gmra.mrb[46].mxu0 %vm2289_vm9, %v6209_v2 }
 0xb6f   : > { %6713 = vmatprep.mubr.msk.f32.mxu0 %vm6972_vm0, %v6973_v1 }
 0xc41   : > { %v4222_v62 = vpop.f32.mrb[46].mxu0 }
 0xc42   : > { %v4223_v63 = vadd.f32 %v4222_v62, %v4151_v61  ;;  %v6705_v5 = vpop.f32.mrb[47].mxu0  ;;  %v6232_v62 = vld [vmem:[%s7868_s13 + $0x48] sm:$0xff] }
 0xc43   : > { %v6234_v5 = vld [vmem:[%s7868_s13 + $0x58] sm:$0xff] }
 0xc44   : > { %v4226_v9 = vmax.f32 %v4223_v63, 0.0  ;;  %v6233_v63 = vld [vmem:[%s7868_s13 + $0x50] sm:$0xff] }
 0xc46   : > { %v4227_v10 = vmul.f32 %v7188_v35, %v4226_v9  ;;  %v6212_v35 = vld [vmem:[%s7867_s12 + $0x10] sm:$0xff] }
 0xc48   : > { %4229 = vrot.lane.b32.xlu0 %v4227_v10, %s7908_s23  ;;  %v5066_v10 = vstv %s6885_s24 }
 0xcba   : > { %v4230_v13 = vpop.permute.xlu0 %4229 }
 0xcbb   : > { %4232 = vst.msk [vmem:[#allocation2] sm:$0xff] %vm2369_vm10, %v4230_v13 }
 0xcc2   : > { %v4237_v14 = vld [vmem:[#allocation2] sm:$0xff] }
 0xcc3   : > { %4317 = vrot.lane.b32.xlu0 %v4237_v14, %s7909_s0  ;;  %4241 = vrot.lane.b32.xlu1 %v4237_v14, %s7910_s2 }
 0xcc7   : > { %4474 = vrot.lane.b32.xlu0 %v4237_v14, %s7901_s30  ;;  %4395 = vrot.lane.b32.xlu1 %v4237_v14, %s7902_s22 }
 0xccb   : > { %4632 = vrot.lane.b32.xlu0 %v4237_v14, %s7903_s21  ;;  %4553 = vrot.lane.b32.xlu1 %v4237_v14, %s7904_s26 }
 0xccf   : > { %4790 = vrot.lane.b32.xlu0 %v4237_v14, %s7905_s20  ;;  %4711 = vrot.lane.b32.xlu1 %v4237_v14, %s7906_s27 }
 0xcd3   : > { %4948 = vperm.xlu0 %6956, %v6212_v35   ;;  %4869 = vrot.lane.b32.xlu1 %v4237_v14, %s7907_s16 }
 0xcd7   : > { %5082 = vperm.xlu1 %6955, %v6240_v15  }
 0xd35   : > { %v4318_v20 = vpop.permute.xlu0 %4317  ;;  %v4242_v21 = vpop.permute.xlu1 %4241 }
 0xd36   : > { %6707 = vmatpush3.msra.mxu1 %v4242_v21  ;;  %6712 = vmatpush3.msra.mxu0 %v4318_v20 }
 0xd37   : > { %6709 = vmatmul.mubr.msk.f32.vlgmr.msra.gmra.mrb[46].mxu1 %vm2380_vm11, %v6214_v17  ;;  %6714 = vmatmul.mubr.msk.f32.vlgmr.msra.gmra.mrb[48].mxu0 %vm2380_vm11, %v6213_v19 }
 0xd38   : > { %6721 = vmatprep.subr.mxu0 %v6973_v1  ;;  %6716 = vmatprep.subr.mxu1 %v6973_v1 }
 0xd39   : > { %v4475_v26 = vpop.permute.xlu0 %4474  ;;  %v4396_v27 = vpop.permute.xlu1 %4395  ;;  %6718 = vmatprep.mubr.msk.f32.mxu1 %vm6972_vm0, %v6973_v1  ;;  %6723 = vmatprep.mubr.msk.f32.mxu0 %vm6972_vm0, %v6973_v1 }
 0xd3a   : > { %6717 = vmatpush3.msra.mxu1 %v4396_v27  ;;  %6722 = vmatpush3.msra.mxu0 %v4475_v26 }
 0xd3b   : > { %6719 = vmatmul.mubr.msk.f32.vlgmr.msra.gmra.mrb[48].mxu1 %vm2380_vm11, %v6217_v24  ;;  %6724 = vmatmul.mubr.msk.f32.vlgmr.msra.gmra.mrb[50].mxu0 %vm2380_vm11, %v6219_v25 }
 0xd3c   : > { %6731 = vmatprep.subr.mxu0 %v6973_v1  ;;  %6726 = vmatprep.subr.mxu1 %v6973_v1 }
 0xd3d   : > { %v4633_v30 = vpop.permute.xlu0 %4632  ;;  %v4554_v31 = vpop.permute.xlu1 %4553  ;;  %6728 = vmatprep.mubr.msk.f32.mxu1 %vm6972_vm0, %v6973_v1  ;;  %6733 = vmatprep.mubr.msk.f32.mxu0 %vm6972_vm0, %v6973_v1 }
 0xd3e   : > { %6727 = vmatpush3.msra.mxu1 %v4554_v31  ;;  %6732 = vmatpush3.msra.mxu0 %v4633_v30 }
 0xd3f   : > { %6729 = vmatmul.mubr.msk.f32.vlgmr.msra.gmra.mrb[50].mxu1 %vm2380_vm11, %v6221_v28  ;;  %6734 = vmatmul.mubr.msk.f32.vlgmr.msra.gmra.mrb[52].mxu0 %vm2380_vm11, %v6223_v29 }
 0xd40   : > { %6741 = vmatprep.subr.mxu0 %v6973_v1  ;;  %6736 = vmatprep.subr.mxu1 %v6973_v1 }
 0xd41   : > { %v4791_v34 = vpop.permute.xlu0 %4790  ;;  %v4712_v36 = vpop.permute.xlu1 %4711  ;;  %6738 = vmatprep.mubr.msk.f32.mxu1 %vm6972_vm0, %v6973_v1  ;;  %6743 = vmatprep.mubr.msk.f32.mxu0 %vm6972_vm0, %v6973_v1 }
 0xd42   : > { %6737 = vmatpush3.msra.mxu1 %v4712_v36  ;;  %6742 = vmatpush3.msra.mxu0 %v4791_v34  ;;  %v6962_v34 = vld [vmem:[%s7856_s1] ss:$0 sm:$0xff] }
 0xd43   : > { %6739 = vmatmul.mubr.msk.f32.vlgmr.msra.gmra.mrb[52].mxu1 %vm2380_vm11, %v6225_v32  ;;  %6744 = vmatmul.mubr.msk.f32.vlgmr.msra.gmra.mrb[54].mxu0 %vm2380_vm11, %v6227_v33 }
 0xd44   : > { %6746 = vmatprep.subr.mxu1 %v6973_v1  ;;  %6748 = vmatprep.mubr.msk.f32.mxu1 %vm6972_vm0, %v6973_v1 }
 0xd45   : > { %v4870_v38 = vpop.permute.xlu1 %4869  ;;  %6753 = vmatprep.mubr.msk.f32.mxu0 %vm2380_vm11, %v6231_v39  ;;  %v6242_v39 = vld [vmem:[%s7867_s12 + $0x18] sm:$0xff] }
 0xd46   : > { %6747 = vmatpush3.msra.mxu1 %v4870_v38 }
 0xd47   : > { %6749 = vmatmul.mubr.msk.f32.vlgmr.msra.gmra.mrb[54].mxu1 %vm2380_vm11, %v6229_v37  ;;  %6872 = vmatprep.subr.bf16.mxu1 %v6971_v0 }
 0xd48   : > { %6767 = vmatprep.mubr.msk.f32.mxu1 %vm6972_vm0, %v6973_v1 }
 0xd52   : > { %v4949_v8 = vpop.permute.xlu0 %4948 }
 0xd56   : > { %v5083_v30 = vpop.permute.xlu1 %5082 }
 0xe0a   : > { %v4313_v41 = vpop.f32.mrb[46].mxu1  ;;  %v4389_v43 = vpop.f32.mrb[48].mxu0 }
 0xe0b   : > { %v4390_v11 = vadd.f32 %v4389_v43, %v4313_v41  ;;  %v6710_v16 = vpop.f32.mrb[47].mxu1  ;;  %v6715_v18 = vpop.f32.mrb[49].mxu0  ;;  %v6243_v41 = vld [vmem:[%s7866_s11 + $0xd8] sm:$0xff] }
 0xe0c   : > { %v6247_v16 = vld [vmem:[%s7866_s11 + $0xe8] sm:$0xff]  ;;  %v6249_v18 = vld [vmem:[%s7866_s11 + $0xf0] sm:$0xff] }
 0xe0e   : > { %v4467_v22 = vpop.f32.mrb[48].mxu1  ;;  %v4546_v23 = vpop.f32.mrb[50].mxu0 }
 0xe0f   : > { %v4471_v3 = vadd.f32 %v4467_v22, %v4390_v11  ;;  %v6720_v4 = vpop.f32.mrb[49].mxu1  ;;  %v6725_v6 = vpop.f32.mrb[51].mxu0 }
 0xe10   : > { %v6253_v4 = vld [vmem:[%s7866_s11 + $0x100] sm:$0xff] }
 0xe11   : > { %v4550_v12 = vadd.f32 %v4546_v23, %v4471_v3  ;;  %v6251_v3 = vld [vmem:[%s7866_s11 + $0xf8] sm:$0xff] }
 0xe12   : > { %v4625_v44 = vpop.f32.mrb[50].mxu1  ;;  %v4704_v45 = vpop.f32.mrb[52].mxu0 }
 0xe13   : > { %v4629_v46 = vadd.f32 %v4625_v44, %v4550_v12  ;;  %v6730_v47 = vpop.f32.mrb[51].mxu1  ;;  %v6735_v48 = vpop.f32.mrb[53].mxu0  ;;  %v6255_v44 = vld [vmem:[%s7866_s11 + $0x108] sm:$0xff] }
 0xe14   : > { %v6259_v48 = vld [vmem:[%s7866_s11 + $0x118] sm:$0xff] }
 0xe15   : > { %v4708_v49 = vadd.f32 %v4704_v45, %v4629_v46  ;;  %v6257_v45 = vld [vmem:[%s7866_s11 + $0x110] sm:$0xff] }
 0xe16   : > { %v4783_v50 = vpop.f32.mrb[52].mxu1  ;;  %v4862_v51 = vpop.f32.mrb[54].mxu0 }
 0xe17   : > { %v4787_v52 = vadd.f32 %v4783_v50, %v4708_v49  ;;  %v6740_v53 = vpop.f32.mrb[53].mxu1  ;;  %v6745_v54 = vpop.f32.mrb[55].mxu0  ;;  %v6261_v50 = vld [vmem:[%s7868_s13 + $0x60] sm:$0xff] }
 0xe19   : > { %v4866_v56 = vadd.f32 %v4862_v51, %v4787_v52  ;;  %v5991_v51 = vld [vmem:[%s7869_s14 + $0x4] sm:$0x1] }
 0xe1a   : > { %v4941_v58 = vpop.f32.mrb[54].mxu1  ;;  %6886 = vpush %v5991_v51 }
 0xe1b   : > { %v4945_v42 = vadd.f32 %v4941_v58, %v4866_v56  ;;  %v6750_v7 = vpop.f32.mrb[55].mxu1 }
 0xe1d   : > { %v4951_v2 = vadd.f32 %v4949_v8, %v4945_v42 }
 0xe1f   : > { %v4952_v61 = vmax.f32 %v4951_v2, 0.0 }
 0xe21   : > { %6751 = vmatprep.subr.mxu0 %v4952_v61 }
 0xe22   : > { %6752 = vmatpush3.msra.mxu0 %v4952_v61 }
 0xe23   : > { %6754 = vmatmul.mubr.msk.f32.vlgmr.msra.gmra.mrb[56].mxu0 %vm2380_vm11, %v6232_v62  ;;  %6770 = vmatprep.subr.mxu0 %v6973_v1 }
 0xe24   : > { %6756 = vmatprep.mubr.msk.f32.mxu0 %vm2380_vm11, %v6233_v63 }
 0xe27   : > { %6757 = vmatmul.mubr.msk.f32.gmra.mrb[58].mxu0 %vm2380_vm11, %v6234_v5 }
 0xe28   : > { %6772 = vmatprep.mubr.msk.f32.mxu0 %vm6972_vm0, %v6973_v1 }
 0xe4b   : > { %s6887_s28 = spop %6886 }
 0xef6   : > { %v6755_v9 = vpop.f32.mrb[56].mxu0 }
 0xef7   : > { %v5056_v13 = vadd.f32 %v6755_v9, %v7584_v55  ;;  %v5036_v14 = vpop.f32.mrb[57].mxu0 }
 0xef8   : > { %v5055_v35 = vadd.f32 %v5036_v14, %v7587_v57 }
 0xef9   : > { %vm5061_vm5 = vcmp.ge.f32.partialorder %v5056_v13, 0.0  ;;  %v5069_v15 = vmul.f32 %v5066_v10, %v5056_v13 }
 0xefa   : > { %vm5060_vm6 = vcmp.ge.f32.partialorder %v5055_v35, 0.0  ;;  %v5068_v17 = vmul.f32 %v5066_v10, %v5055_v35  ;;  %v6758_v19 = vpop.f32.mrb[58].mxu0 }
 0xefb   : > { %v5058_v20 = vadd.f32 %v6758_v19, %v7591_v59  ;;  %v5046_v21 = vpop.f32.mrb[59].mxu0  ;;  %v7708_v24 = vsel %vm5061_vm5, %v5056_v13, %v5069_v15 }
 0xefc   : > { %v5057_v25 = vadd.f32 %v5046_v21, %v7593_v60  ;;  %v7711_v26 = vsel %vm5060_vm6, %v5055_v35, %v5068_v17  ;;  %v6239_v60 = vld [vmem:[%s7864_s9 + $0x18] sm:$0xff] }
 0xefd   : > { %vm5063_vm7 = vcmp.ge.f32.partialorder %v5058_v20, 0.0  ;;  %v5071_v27 = vmul.f32 %v5066_v10, %v5058_v20  ;;  %v6873_v55 = vpack.c.bf16 %v7708_v24, %v7711_v26 }
 0xefe   : > { %vm5062_vm8 = vcmp.ge.f32.partialorder %v5057_v25, 0.0  ;;  %v5070_v57 = vmul.f32 %v5066_v10, %v5057_v25 }
 0xeff   : > { %v7715_v28 = vsel %vm5063_vm7, %v5058_v20, %v5071_v27  ;;  %6874 = vmatpush3.bf16.msra.mxu1 %v6873_v55 }
 0xf00   : > { %v7717_v29 = vsel %vm5062_vm8, %v5057_v25, %v5070_v57  ;;  %6875 = vmatprep.subr.bf16.mxu1 %v6971_v0 }
 0xf01   : > { %v6876_v59 = vpack.c.bf16 %v7715_v28, %v7717_v29 }
 0xf03   : > { %6877 = vmatpush3.bf16.msra.mxu1 %v6876_v59 }
 0xf04   : > { %6775 = vmatprep.subr.mxu1 %v6973_v1 }
 0xf06   : > { %6768 = vmatmul.mubr.msk.f32.vlgmr.msra.gmra.mrb[56].mxu1 %vm2289_vm9, %v6239_v60 }
 0xf07   : > { %6777 = vmatprep.mubr.msk.f32.mxu1 %vm6972_vm0, %v6973_v1 }
 0xfd9   : > { %v5154_v31 = vpop.f32.mrb[56].mxu1 }
 0xfda   : > { %v5155_v32 = vadd.f32 %v5154_v31, %v5083_v30  ;;  %v6769_v33 = vpop.f32.mrb[57].mxu1  ;;  %v6262_v30 = vld [vmem:[%s7868_s13 + $0x68] sm:$0xff]  ;;  %v6263_v31 = vld [vmem:[%s7868_s13 + $0x70] sm:$0xff] }
 0xfdc   : > { %v5158_v0 = vmax.f32 %v5155_v32, 0.0  ;;  %v6264_v32 = vld [vmem:[%s7868_s13 + $0x78] sm:$0xff] }
 0xfde   : > { %v5159_v36 = vmul.f32 %v6962_v34, %v5158_v0  ;;  %v5998_v0 = vstv %s6887_s28 }
 0xfe0   : > { %5161 = vrot.lane.b32.xlu0 %v5159_v36, %s7908_s23 }
0x1052   : > { %v5162_v37 = vpop.permute.xlu0 %5161 }
0x1053   : > { %5164 = vst.msk [vmem:[#allocation2] sm:$0xff] %vm2369_vm10, %v5162_v37 }
0x105a   : > { %v5169_v38 = vld [vmem:[#allocation2] sm:$0xff] }
0x105b   : > { %5249 = vrot.lane.b32.xlu0 %v5169_v38, %s7909_s0  ;;  %5173 = vrot.lane.b32.xlu1 %v5169_v38, %s7910_s2 }
0x105f   : > { %5406 = vrot.lane.b32.xlu0 %v5169_v38, %s7901_s30  ;;  %5327 = vrot.lane.b32.xlu1 %v5169_v38, %s7902_s22 }
0x1063   : > { %5564 = vrot.lane.b32.xlu0 %v5169_v38, %s7903_s21  ;;  %5485 = vrot.lane.b32.xlu1 %v5169_v38, %s7904_s26 }
0x1067   : > { %5722 = vrot.lane.b32.xlu0 %v5169_v38, %s7905_s20  ;;  %5643 = vrot.lane.b32.xlu1 %v5169_v38, %s7906_s27 }
0x106b   : > { %5880 = vperm.xlu0 %6956, %v6242_v39   ;;  %5801 = vrot.lane.b32.xlu1 %v5169_v38, %s7907_s16 }
0x10cd   : > { %v5250_v43 = vpop.permute.xlu0 %5249  ;;  %v5174_v11 = vpop.permute.xlu1 %5173 }
0x10ce   : > { %6771 = vmatpush3.msra.mxu0 %v5174_v11  ;;  %6776 = vmatpush3.msra.mxu1 %v5250_v43 }
0x10cf   : > { %6773 = vmatmul.mubr.msk.f32.vlgmr.msra.gmra.mrb[60].mxu0 %vm2380_vm11, %v6244_v40  ;;  %6778 = vmatmul.mubr.msk.f32.vlgmr.msra.gmra.mrb[58].mxu1 %vm2380_vm11, %v6243_v41 }
0x10d0   : > { %6785 = vmatprep.subr.mxu1 %v6973_v1  ;;  %6780 = vmatprep.subr.mxu0 %v6973_v1 }
0x10d1   : > { %v5407_v22 = vpop.permute.xlu0 %5406  ;;  %v5328_v23 = vpop.permute.xlu1 %5327  ;;  %6782 = vmatprep.mubr.msk.f32.mxu0 %vm6972_vm0, %v6973_v1  ;;  %6787 = vmatprep.mubr.msk.f32.mxu1 %vm6972_vm0, %v6973_v1 }
0x10d2   : > { %6781 = vmatpush3.msra.mxu0 %v5328_v23  ;;  %6786 = vmatpush3.msra.mxu1 %v5407_v22 }
0x10d3   : > { %6783 = vmatmul.mubr.msk.f32.vlgmr.msra.gmra.mrb[62].mxu0 %vm2380_vm11, %v6247_v16  ;;  %6788 = vmatmul.mubr.msk.f32.vlgmr.msra.gmra.mrb[60].mxu1 %vm2380_vm11, %v6249_v18 }
0x10d4   : > { %6795 = vmatprep.subr.mxu1 %v6973_v1  ;;  %6790 = vmatprep.subr.mxu0 %v6973_v1 }
0x10d5   : > { %v5565_v6 = vpop.permute.xlu0 %5564  ;;  %v5486_v12 = vpop.permute.xlu1 %5485  ;;  %6792 = vmatprep.mubr.msk.f32.mxu0 %vm6972_vm0, %v6973_v1  ;;  %6797 = vmatprep.mubr.msk.f32.mxu1 %vm6972_vm0, %v6973_v1 }
0x10d6   : > { %6791 = vmatpush3.msra.mxu0 %v5486_v12  ;;  %6796 = vmatpush3.msra.mxu1 %v5565_v6 }
0x10d7   : > { %6793 = vmatmul.mubr.msk.f32.vlgmr.msra.gmra.mrb[64].mxu0 %vm2380_vm11, %v6251_v3  ;;  %6798 = vmatmul.mubr.msk.f32.vlgmr.msra.gmra.mrb[62].mxu1 %vm2380_vm11, %v6253_v4 }
0x10d8   : > { %6805 = vmatprep.subr.mxu1 %v6973_v1  ;;  %6800 = vmatprep.subr.mxu0 %v6973_v1 }
0x10d9   : > { %v5723_v46 = vpop.permute.xlu0 %5722  ;;  %v5644_v47 = vpop.permute.xlu1 %5643  ;;  %6802 = vmatprep.mubr.msk.f32.mxu0 %vm6972_vm0, %v6973_v1  ;;  %6807 = vmatprep.mubr.msk.f32.mxu1 %vm6972_vm0, %v6973_v1 }
0x10da   : > { %6801 = vmatpush3.msra.mxu0 %v5644_v47  ;;  %6806 = vmatpush3.msra.mxu1 %v5723_v46 }
0x10db   : > { %6803 = vmatmul.mubr.msk.f32.vlgmr.msra.gmra.mrb[66].mxu0 %vm2380_vm11, %v6255_v44  ;;  %6808 = vmatmul.mubr.msk.f32.vlgmr.msra.gmra.mrb[64].mxu1 %vm2380_vm11, %v6257_v45 }
0x10dc   : > { %6810 = vmatprep.subr.mxu0 %v6973_v1  ;;  %6812 = vmatprep.mubr.msk.f32.mxu0 %vm6972_vm0, %v6973_v1 }
0x10dd   : > { %v5802_v49 = vpop.permute.xlu1 %5801  ;;  %6817 = vmatprep.mubr.msk.f32.mxu1 %vm2380_vm11, %v6261_v50 }
0x10de   : > { %6811 = vmatpush3.msra.mxu0 %v5802_v49 }
0x10df   : > { %6813 = vmatmul.mubr.msk.f32.vlgmr.msra.gmra.mrb[68].mxu0 %vm2380_vm11, %v6259_v48 }
0x10ea   : > { %v5881_v57 = vpop.permute.xlu0 %5880 }
0x11a2   : > { %v5245_v52 = vpop.f32.mrb[60].mxu0  ;;  %v5321_v53 = vpop.f32.mrb[58].mxu1 }
0x11a3   : > { %v5322_v54 = vadd.f32 %v5321_v53, %v5245_v52  ;;  %v6774_v56 = vpop.f32.mrb[61].mxu0  ;;  %v6779_v58 = vpop.f32.mrb[59].mxu1 }
0x11a6   : > { %v5399_v42 = vpop.f32.mrb[62].mxu0  ;;  %v5478_v7 = vpop.f32.mrb[60].mxu1 }
0x11a7   : > { %v5403_v8 = vadd.f32 %v5399_v42, %v5322_v54  ;;  %v6784_v2 = vpop.f32.mrb[63].mxu0  ;;  %v6789_v61 = vpop.f32.mrb[61].mxu1 }
0x11a9   : > { %v5482_v62 = vadd.f32 %v5478_v7, %v5403_v8 }
0x11aa   : > { %v5557_v63 = vpop.f32.mrb[64].mxu0  ;;  %v5636_v5 = vpop.f32.mrb[62].mxu1 }
0x11ab   : > { %v5561_v9 = vadd.f32 %v5557_v63, %v5482_v62  ;;  %v6794_v10 = vpop.f32.mrb[65].mxu0  ;;  %v6799_v13 = vpop.f32.mrb[63].mxu1 }
0x11ad   : > { %v5640_v14 = vadd.f32 %v5636_v5, %v5561_v9 }
0x11ae   : > { %v5715_v35 = vpop.f32.mrb[66].mxu0  ;;  %v5794_v15 = vpop.f32.mrb[64].mxu1 }
0x11af   : > { %v5719_v17 = vadd.f32 %v5715_v35, %v5640_v14  ;;  %v6804_v19 = vpop.f32.mrb[67].mxu0  ;;  %v6809_v20 = vpop.f32.mrb[65].mxu1 }
0x11b1   : > { %v5798_v21 = vadd.f32 %v5794_v15, %v5719_v17 }
0x11b2   : > { %v5873_v25 = vpop.f32.mrb[68].mxu0 }
0x11b3   : > { %v5877_v27 = vadd.f32 %v5873_v25, %v5798_v21  ;;  %v6814_v55 = vpop.f32.mrb[69].mxu0 }
0x11b5   : > { %v5883_v59 = vadd.f32 %v5881_v57, %v5877_v27 }
0x11b7   : > { %v5884_v60 = vmax.f32 %v5883_v59, 0.0 }
0x11b9   : > { %6815 = vmatprep.subr.mxu1 %v5884_v60 }
0x11ba   : > { %6816 = vmatpush3.msra.mxu1 %v5884_v60 }
0x11bb   : > { %6818 = vmatmul.mubr.msk.f32.vlgmr.msra.gmra.mrb[66].mxu1 %vm2380_vm11, %v6262_v30 }
0x11bc   : > { %6820 = vmatprep.mubr.msk.f32.mxu1 %vm2380_vm11, %v6263_v31 }
0x11bf   : > { %6821 = vmatmul.mubr.msk.f32.gmra.mrb[68].mxu1 %vm2380_vm11, %v6264_v32 }
0x128e   : > { %v6819_v33 = vpop.f32.mrb[66].mxu1 }
0x128f   : > { %v5988_v34 = vadd.f32 %v6819_v33, %v7708_v24  ;;  %v5968_v36 = vpop.f32.mrb[67].mxu1 }
0x1290   : > { %v5987_v37 = vadd.f32 %v5968_v36, %v7711_v26 }
0x1291   : > { %v6001_v38 = vmul.f32 %v5998_v0, %v5988_v34  ;;  %vm5993_vm0 = vcmp.ge.f32.partialorder %v5988_v34, 0.0 }
0x1292   : > { %v6000_v39 = vmul.f32 %v5998_v0, %v5987_v37  ;;  %v6822_v40 = vpop.f32.mrb[68].mxu1  ;;  %vm5992_vm9 = vcmp.ge.f32.partialorder %v5987_v37, 0.0 }
0x1293   : > { %v5990_v41 = vadd.f32 %v6822_v40, %v7715_v28  ;;  %v5978_v43 = vpop.f32.mrb[69].mxu1  ;;  %v6005_v11 = vsel %vm5993_vm0, %v5988_v34, %v6001_v38 }
0x1294   : > { %v5989_v1 = vadd.f32 %v5978_v43, %v7717_v29  ;;  %6014 = vrot.lane.b32.xlu0 %v6005_v11, %s7908_s23  ;;  %v6004_v24 = vsel %vm5992_vm9, %v5987_v37, %v6000_v39 }
0x1295   : > { %v6003_v16 = vmul.f32 %v5998_v0, %v5990_v41  ;;  %6012 = vrot.lane.b32.xlu1 %v6004_v24, %s7908_s23  ;;  %vm5995_vm11 = vcmp.ge.f32.partialorder %v5990_v41, 0.0 }
0x1296   : > { %v6002_v26 = vmul.f32 %v5998_v0, %v5989_v1  ;;  %vm5994_vm12 = vcmp.ge.f32.partialorder %v5989_v1, 0.0 }
0x1297   : > { %v6007_v18 = vsel %vm5995_vm11, %v5990_v41, %v6003_v16 }
0x1298   : > { %6018 = vrot.lane.b32.xlu0 %v6007_v18, %s7908_s23  ;;  %v6006_v28 = vsel %vm5994_vm12, %v5989_v1, %v6002_v26 }
0x1299   : > { %6016 = vrot.lane.b32.xlu1 %v6006_v28, %s7908_s23 }
0x1306   : > { %v6015_v22 = vpop.permute.xlu0 %6014 }
0x1307   : > { %6025 = vst.msk [vmem:[%s7826_s17 + $0x8] sm:$0xff] %vm2369_vm10, %v6015_v22  ;;  %v6013_v29 = vpop.permute.xlu1 %6012 }
0x1308   : > { %6024 = vst.msk [vmem:[%s7826_s17] sm:$0xff] %vm2369_vm10, %v6013_v29 }
0x130a   : > { %v6019_v23 = vpop.permute.xlu0 %6018 }
0x130b   : > { %6027 = vst.msk [vmem:[%s7826_s17 + $0x18] sm:$0xff] %vm2369_vm10, %v6019_v23  ;;  %v6017_v3 = vpop.permute.xlu1 %6016 }
0x130c   : > { %6026 = vst.msk [vmem:[%s7826_s17 + $0x10] sm:$0xff] %vm2369_vm10, %v6017_v3 }
0x130d PF: > { %s25_s18 = sadd.s32 1, %s6969_s18  }
0x130e   : > { %p22_p4 = scmp.ge.s32.totalorder %s25_s18, 4  }
0x1310   :  { %24 = sbr.rel (!%p22_p4) target bundleno = 6 (0x6), region = 176 }

</bundles_post_ra>
